<compile_context>
chip_gen: v7x
topology: tpu7x:2x2x1
jax: 0.10.0
libtpu: 0.0.40
codegen_flags: <defaults>
</compile_context>

<pallas_src>
import jax
import jax.numpy as jnp
from jax import lax
from jax.scipy.linalg import solve_triangular
from jax.experimental import pallas as pl
from jax.experimental.pallas import tpu as pltpu


# -----------------------------------------------------------------------------
# Kernel: 2-layer GRU recurrence (transposed layout) + fused output heads
# -----------------------------------------------------------------------------
def gru_head_kernel(gi0_ref, whhcat_ref, wih1t_ref, bhh_ref, bih1_ref,
                    wheadst_ref, bheadst_ref, out_ref, hcat_ref):
    # gi0_ref:     [TT, 3H, tm] bf16  precomputed x_t*W_ih0 + b_ih0 (gates r,z,n)
    # whhcat_ref:  [6H, 2H]     f32   block-diag [W_hh0^T ; W_hh1^T]
    # wih1t_ref:   [3H, H]      f32   W_ih1^T
    # bhh_ref:     [6H, 1]      f32   [b_hh_l0 ; b_hh_l1]
    # bih1_ref:    [3H, 1]      f32   b_ih_l1
    # wheadst_ref: [HP, H]      f32   [W_mean ; W_d ; W_v ; 0-pad]^T, HP mult of 128
    # bheadst_ref: [HP, 1]      f32
    # out_ref:     [HP, tm]     f32   rows: [mu, softplus(d), v_0..v_{R-1}, pad]
    # hcat_ref:    [2H, tm]     f32   hidden state [h0 ; h1], carried across T blocks
    t_blk = pl.program_id(1)
    H = wih1t_ref.shape[1]
    TT = gi0_ref.shape[0]

    @pl.when(t_blk == 0)
    def _init():
        hcat_ref[...] = jnp.zeros_like(hcat_ref)

    whhcat = whhcat_ref[...]
    wih1t = wih1t_ref[...]
    bhh = bhh_ref[...]
    bih1 = bih1_ref[...]

    def gates(gi, gh, h):
        # sublane-aligned slices (H is a multiple of 8); ops are lane-dense in tm
        r = jax.nn.sigmoid(gi[:H] + gh[:H])
        z = jax.nn.sigmoid(gi[H:2 * H] + gh[H:2 * H])
        n = jnp.tanh(gi[2 * H:] + r * gh[2 * H:])
        return (1.0 - z) * n + z * h

    hcat = hcat_ref[...]                               # [2H, tm] f32
    # Short static unroll (TT <= 4): enough MXU/EUP overlap across the serial
    # h0 -> h1 chain without blowing the 64-vreg file.
    for k in range(TT):
        # One fused block-diagonal matmul covers BOTH recurrent projections and
        # depends only on the old states.
        ghcat = jnp.dot(whhcat, hcat,
                        preferred_element_type=jnp.float32) + bhh      # [6H, tm]
        gi0 = gi0_ref[k].astype(jnp.float32)                           # [3H, tm]
        h0 = gates(gi0, ghcat[:3 * H], hcat[:H])
        gi1 = jnp.dot(wih1t, h0,
                      preferred_element_type=jnp.float32) + bih1       # [3H, tm]
        h1 = gates(gi1, ghcat[3 * H:], hcat[H:])
        hcat = jnp.concatenate([h0, h1], axis=0)
    hcat_ref[...] = hcat

    @pl.when(t_blk == pl.num_programs(1) - 1)
    def _heads():
        h1f = hcat[H:]                                                 # [H, tm]
        heads = jnp.dot(wheadst_ref[...], h1f,
                        preferred_element_type=jnp.float32) + bheadst_ref[...]
        # stable softplus merged into a single unmasked store (row 1 = d head)
        sp = jnp.maximum(heads, 0.0) + jnp.log(1.0 + jnp.exp(-jnp.abs(heads)))
        row = lax.broadcasted_iota(jnp.int32, heads.shape, 0)
        out_ref[...] = jnp.where(row == 1, sp, heads)


# -----------------------------------------------------------------------------
# Tiling heuristics (generation-aware, per the review)
# -----------------------------------------------------------------------------
def _pick_tile_m(m):
    """M sits on the lane axis of the streamed gi0 block, so a tile must be a
    multiple of 128 lanes or cover the whole axis.  No forced 2-way split: the
    'parallel' M axis is a serial loop on single-TC chips (v5e/v6e)."""
    return 128 if (m % 128 == 0 and m > 128) else m


def _pick_tile_t(t):
    """Largest divisor of T that is <= 4 (cap the in-kernel unroll; more steps
    in flight buy no extra overlap on the serial recurrence but spill vregs)."""
    for c in (4, 3, 2):
        if t % c == 0:
            return c
    return 1


def _vmem_limit_bytes(tt, tm, H, HP):
    """Limit derived from the actual double-buffer footprint, capped at ~75% of
    the chip's per-core VMEM (64 MiB on v7x, 128 MiB on v5e/v6e)."""
    cap = 64 << 20
    try:
        info = pltpu.get_tpu_info()
        for name in ("vmem_capacity_bytes", "vmem_size_bytes", "vmem_bytes"):
            val = getattr(info, name, None)
            if val:
                cap = int(val)
                break
    except Exception:
        pass
    budget = (cap * 3) // 4
    need = (2 * tt * 3 * H * tm * 2                       # gi0 double buffer (bf16)
            + 2 * HP * tm * 4                             # out double buffer
            + 2 * (6 * H * 2 * H + 3 * H * H + HP * H + 9 * H + HP) * 4  # weights
            + 2 * H * tm * 4                              # hidden-state scratch
            + (8 << 20))                                  # compiler headroom
    return int(min(budget, max(need, 16 << 20)))


# -----------------------------------------------------------------------------
# Parameter init (deterministic, PyTorch-style uniform(-1/sqrt(H), 1/sqrt(H)))
# Gate order inside every 3H block is (r, z, n), matching nn.GRU.
# -----------------------------------------------------------------------------
def init_params(key, H, R):
    ks = jax.random.split(key, 14)
    s = 1.0 / (H ** 0.5)
    u = lambda k, shape: jax.random.uniform(k, shape, jnp.float32, -s, s)
    wih0 = u(ks[0], (1, 3 * H))
    whh0 = u(ks[1], (H, 3 * H))
    b0 = jnp.stack([u(ks[2], (3 * H,)), u(ks[3], (3 * H,))])     # [b_ih_l0; b_hh_l0]
    wih1 = u(ks[4], (H, 3 * H))
    whh1 = u(ks[5], (H, 3 * H))
    b1 = jnp.stack([u(ks[6], (3 * H,)), u(ks[7], (3 * H,))])
    wm, bm = u(ks[8], (H, 1)), u(ks[9], (1,))
    wd, bd = u(ks[10], (H, 1)), u(ks[11], (1,))
    wv, bv = u(ks[12], (H, R)), u(ks[13], (R,))
    wheads = jnp.concatenate([wm, wd, wv], axis=1)               # [H, 2+R]
    bheads = jnp.concatenate([bm, bd, bv])[None, :]              # [1, 2+R]
    return (wih0, whh0, b0, wih1, whh1, b1, wheads, bheads)


# -----------------------------------------------------------------------------
# Forward pass (Pallas hot path + small-matrix XLA glue)
# -----------------------------------------------------------------------------
def copula_forward(params, x, y):
    wih0, whh0, b0, wih1, whh1, b1, wheads, bheads = params
    B, N, T = x.shape
    H = whh0.shape[0]
    R = wheads.shape[1] - 2
    M = B * N
    HP = ((2 + R + 127) // 128) * 128                # head rows padded to 128
    assert H % 8 == 0, "hidden_dim must be a multiple of 8 for sublane-aligned gates"

    # Fused block-diagonal recurrent weight: one matmul per step for both layers.
    whhcat_t = jnp.zeros((6 * H, 2 * H), jnp.float32)
    whhcat_t = whhcat_t.at[:3 * H, :H].set(whh0.T)
    whhcat_t = whhcat_t.at[3 * H:, H:].set(whh1.T)
    wih1_t = wih1.T                                              # [3H, H]
    bhh = jnp.concatenate([b0[1], b1[1]])[:, None]               # [6H, 1]
    bih1 = b1[0][:, None]                                        # [3H, 1]
    wheads_t = jnp.zeros((HP, H), jnp.float32).at[:2 + R, :].set(wheads.T)
    bheads_t = jnp.zeros((HP, 1), jnp.float32).at[:2 + R, 0].set(bheads[0])

    # Precompute the layer-0 input projection for all timesteps (input_size==1),
    # transposed so M is the lane axis; streamed in bf16 (dominant HBM traffic).
    x_tm = x.reshape(M, T).T.astype(jnp.float32)                 # [T, M]
    gi0_all = (wih0[0][None, :, None] * x_tm[:, None, :]
               + b0[0][None, :, None]).astype(jnp.bfloat16)      # [T, 3H, M]

    tm = _pick_tile_m(M)
    tt = _pick_tile_t(T)
    grid = (M // tm, T // tt)

    heads = pl.pallas_call(
        gru_head_kernel,
        grid=grid,
        in_specs=[
            pl.BlockSpec((tt, 3 * H, tm), lambda i, t: (t, 0, i)),
            pl.BlockSpec((6 * H, 2 * H), lambda i, t: (0, 0)),
            pl.BlockSpec((3 * H, H), lambda i, t: (0, 0)),
            pl.BlockSpec((6 * H, 1), lambda i, t: (0, 0)),
            pl.BlockSpec((3 * H, 1), lambda i, t: (0, 0)),
            pl.BlockSpec((HP, H), lambda i, t: (0, 0)),
            pl.BlockSpec((HP, 1), lambda i, t: (0, 0)),
        ],
        out_specs=pl.BlockSpec((HP, tm), lambda i, t: (0, i)),
        out_shape=jax.ShapeDtypeStruct((HP, M), jnp.float32),
        scratch_shapes=[pltpu.VMEM((2 * H, tm), jnp.float32)],
        compiler_params=pltpu.CompilerParams(
            dimension_semantics=("parallel", "arbitrary"),
            vmem_limit_bytes=_vmem_limit_bytes(tt, tm, H, HP)),
    )(gi0_all, whhcat_t, wih1_t, bhh, bih1, wheads_t, bheads_t)

    mu = heads[0].reshape(B, N)
    dsp = heads[1].reshape(B, N)                   # softplus already applied in-kernel
    v = heads[2:2 + R].T.reshape(B, N, R)

    # sigma = v v^T + diag(softplus(d)); at small N this is trivial XLA work
    # (a Pallas call here is pure launch overhead per the review).
    sigma = jnp.einsum('bnr,bmr->bnm', v, v) + jax.vmap(jnp.diag)(dsp)

    resid = y[..., 0] - mu                                           # [B, N]
    # TODO(synk): torch.inverse / torch.logdet have no Pallas TPU primitive; the
    # tiny N x N linear algebra stays in XLA.  Sigma is SPD by construction
    # (softplus(d) > 0), so Cholesky gives both the quad form and the logdet.
    chol = jnp.linalg.cholesky(sigma)                                # [B, N, N]
    zsol = solve_triangular(chol, resid[..., None], lower=True)      # [B, N, 1]
    quad = jnp.sum(zsol[..., 0] ** 2, axis=1)                        # [B]
    logdet = 2.0 * jnp.sum(jnp.log(jnp.diagonal(chol, axis1=1, axis2=2)), axis=1)
    return jnp.mean(quad + logdet)


# -----------------------------------------------------------------------------
# Pure-JAX reference (same math, no Pallas, f32) for a sanity check
# -----------------------------------------------------------------------------
def reference_forward(params, x, y):
    wih0, whh0, b0, wih1, whh1, b1, wheads, bheads = params
    B, N, T = x.shape
    H = whh0.shape[0]
    M = B * N
    xs = x.reshape(M, T).T                                        # [T, M]

    def cell(h, gi, whh, bhh):
        gh = h @ whh + bhh
        r = jax.nn.sigmoid(gi[:, :H] + gh[:, :H])
        z = jax.nn.sigmoid(gi[:, H:2 * H] + gh[:, H:2 * H])
        n = jnp.tanh(gi[:, 2 * H:] + r * gh[:, 2 * H:])
        return (1.0 - z) * n + z * h

    def step(carry, x_t):
        h0, h1 = carry
        gi0 = x_t[:, None] * wih0 + b0[0:1]
        h0 = cell(h0, gi0, whh0, b0[1:2])
        gi1 = h0 @ wih1 + b1[0:1]
        h1 = cell(h1, gi1, whh1, b1[1:2])
        return (h0, h1), None

    init = (jnp.zeros((M, H), jnp.float32), jnp.zeros((M, H), jnp.float32))
    (h0, h1), _ = lax.scan(step, init, xs)
    heads = h1 @ wheads + bheads
    mu = heads[:, 0].reshape(B, N)
    dsp = jax.nn.softplus(heads[:, 1]).reshape(B, N)              # log(1+exp(d)), stable
    v = heads[:, 2:].reshape(B, N, -1)
    sigma = jnp.einsum('bnr,bmr->bnm', v, v) + jax.vmap(jnp.diag)(dsp)
    resid = y[..., 0] - mu
    inv = jnp.linalg.inv(sigma)
    quad = jnp.einsum('bn,bnm,bm->b', resid, inv, resid)
    sign, logabs = jnp.linalg.slogdet(sigma)
    logdet = jnp.where(sign > 0, logabs, jnp.nan)                 # torch.logdet semantics
    return jnp.mean(quad + logdet)


if __name__ == "__main__":
    B, N, T = 2, 8, 8        # batch, copula dimension (x.shape[1]), sequence length
    H, R = 32, 8             # hidden_dim, rank (small versions of module defaults)

    key = jax.random.PRNGKey(0)
    kx, ky, kp = jax.random.split(key, 3)
    x = jax.random.normal(kx, (B, N, T), jnp.float32)
    y = jax.random.normal(ky, (B, N, 1), jnp.float32)
    params = init_params(kp, H, R)

    fwd = jax.jit(copula_forward)
    out = fwd(params, x, y)
    jax.block_until_ready(out)

    ref = reference_forward(params, x, y)
    assert bool(jnp.isfinite(out)), "kernel produced non-finite output"
    assert abs(float(out) - float(ref)) <= 5e-2 * max(1.0, abs(float(ref))), \
        f"mismatch: pallas={float(out)} ref={float(ref)}"

    print("KERNEL_OK")
</pallas_src>

<mosaic_0001>
module attributes {stable_mosaic.version = 11 : i64} {
  func.func @gru_head_kernel(%arg0: i32, %arg1: i32, %arg2: memref<4x96x16xbf16, #tpu.memory_space<vmem>>, %arg3: memref<192x64xf32, #tpu.memory_space<vmem>>, %arg4: memref<96x32xf32, #tpu.memory_space<vmem>>, %arg5: memref<192x1xf32, #tpu.memory_space<vmem>>, %arg6: memref<96x1xf32, #tpu.memory_space<vmem>>, %arg7: memref<128x32xf32, #tpu.memory_space<vmem>>, %arg8: memref<128x1xf32, #tpu.memory_space<vmem>>, %arg9: memref<128x16xf32, #tpu.memory_space<vmem>>, %arg10: memref<64x16xf32, #tpu.memory_space<vmem>>) attributes {dimension_semantics = [#tpu.dimension_semantics<parallel>, #tpu.dimension_semantics<arbitrary>], iteration_bounds = array<i64: 1, 2>, scalar_prefetch = 0 : i64, scratch_operands = 1 : i64, tpu.core_type = #tpu.core_type<tc>, window_params = [{transform_indices = @transform_0, window_bounds = array<i64: 4, 96, 16>}, {pipeline_mode = #tpu.pipeline_mode<synchronous>, transform_indices = @transform_1, window_bounds = array<i64: 192, 64>}, {pipeline_mode = #tpu.pipeline_mode<synchronous>, transform_indices = @transform_2, window_bounds = array<i64: 96, 32>}, {pipeline_mode = #tpu.pipeline_mode<synchronous>, transform_indices = @transform_3, window_bounds = array<i64: 192, 1>}, {pipeline_mode = #tpu.pipeline_mode<synchronous>, transform_indices = @transform_4, window_bounds = array<i64: 96, 1>}, {pipeline_mode = #tpu.pipeline_mode<synchronous>, transform_indices = @transform_5, window_bounds = array<i64: 128, 32>}, {pipeline_mode = #tpu.pipeline_mode<synchronous>, transform_indices = @transform_6, window_bounds = array<i64: 128, 1>}, {transform_indices = @transform_7, window_bounds = array<i64: 128, 16>}]} {
    %c0_i32 = arith.constant 0 : i32
    %0 = arith.cmpi eq, %arg1, %c0_i32 : i32
    %1 = arith.extui %0 : i1 to i32
    %c0_i32_0 = arith.constant 0 : i32
    %2 = arith.cmpi ne, %1, %c0_i32_0 : i32
    scf.if %2 {
      %cst_53 = arith.constant 0.000000e+00 : f32
      %276 = vector.broadcast %cst_53 : f32 to vector<64x16xf32>
      %c0_54 = arith.constant 0 : index
      %c0_55 = arith.constant 0 : index
      %277 = vector.load %arg10[%c0_54, %c0_55] : memref<64x16xf32, #tpu.memory_space<vmem>>, vector<64x16xf32>
      tpu.vector_store %arg10[%c0_54, %c0_55], %276 {strides = array<i32>} : memref<64x16xf32, #tpu.memory_space<vmem>>, vector<64x16xf32>,
    } else {
    }
    %c0 = arith.constant 0 : index
    %c0_1 = arith.constant 0 : index
    %3 = vector.load %arg3[%c0, %c0_1] : memref<192x64xf32, #tpu.memory_space<vmem>>, vector<192x64xf32>
    %c0_2 = arith.constant 0 : index
    %c0_3 = arith.constant 0 : index
    %4 = vector.load %arg4[%c0_2, %c0_3] : memref<96x32xf32, #tpu.memory_space<vmem>>, vector<96x32xf32>
    %c0_4 = arith.constant 0 : index
    %c0_5 = arith.constant 0 : index
    %5 = vector.load %arg5[%c0_4, %c0_5] : memref<192x1xf32, #tpu.memory_space<vmem>>, vector<192x1xf32>
    %c0_6 = arith.constant 0 : index
    %c0_7 = arith.constant 0 : index
    %6 = vector.load %arg6[%c0_6, %c0_7] : memref<96x1xf32, #tpu.memory_space<vmem>>, vector<96x1xf32>
    %c0_8 = arith.constant 0 : index
    %c0_9 = arith.constant 0 : index
    %7 = vector.load %arg10[%c0_8, %c0_9] : memref<64x16xf32, #tpu.memory_space<vmem>>, vector<64x16xf32>
    %cst = arith.constant dense<0.000000e+00> : vector<192x16xf32>
    %8 = tpu.matmul %3, %7, %cst {dimension_numbers = #tpu.dot_dimension_numbers<[1], [0], [0], [1], [0, 0, 1, 1], [], []>} : vector<192x64xf32>, vector<64x16xf32>, vector<192x16xf32> -> vector<192x16xf32>
    %9 = vector.broadcast %5 : vector<192x1xf32> to vector<192x16xf32>
    %10 = arith.addf %8, %9 : vector<192x16xf32>
    %c0_10 = arith.constant 0 : index
    %c0_11 = arith.constant 0 : index
    %c0_12 = arith.constant 0 : index
    %11 = vector.load %arg2[%c0_10, %c0_11, %c0_12] : memref<4x96x16xbf16, #tpu.memory_space<vmem>>, vector<1x96x16xbf16>
    %12 = vector.shape_cast %11 : vector<1x96x16xbf16> to vector<96x16xbf16>
    %13 = arith.extf %12 : vector<96x16xbf16> to vector<96x16xf32>
    %14 = vector.extract_strided_slice %10 {offsets = [0, 0], sizes = [96, 16], strides = [1, 1]} : vector<192x16xf32> to vector<96x16xf32>
    %15 = vector.extract_strided_slice %7 {offsets = [0, 0], sizes = [32, 16], strides = [1, 1]} : vector<64x16xf32> to vector<32x16xf32>
    %16 = vector.extract_strided_slice %13 {offsets = [0, 0], sizes = [32, 16], strides = [1, 1]} : vector<96x16xf32> to vector<32x16xf32>
    %17 = vector.extract_strided_slice %14 {offsets = [0, 0], sizes = [32, 16], strides = [1, 1]} : vector<96x16xf32> to vector<32x16xf32>
    %18 = arith.addf %16, %17 : vector<32x16xf32>
    %19 = arith.negf %18 : vector<32x16xf32>
    %20 = math.exp %19 : vector<32x16xf32>
    %cst_13 = arith.constant 1.000000e+00 : f32
    %21 = vector.broadcast %cst_13 : f32 to vector<32x16xf32>
    %22 = arith.addf %21, %20 : vector<32x16xf32>
    %23 = arith.divf %21, %22 : vector<32x16xf32>
    %24 = vector.extract_strided_slice %13 {offsets = [32, 0], sizes = [32, 16], strides = [1, 1]} : vector<96x16xf32> to vector<32x16xf32>
    %25 = vector.extract_strided_slice %14 {offsets = [32, 0], sizes = [32, 16], strides = [1, 1]} : vector<96x16xf32> to vector<32x16xf32>
    %26 = arith.addf %24, %25 : vector<32x16xf32>
    %27 = arith.negf %26 : vector<32x16xf32>
    %28 = math.exp %27 : vector<32x16xf32>
    %cst_14 = arith.constant 1.000000e+00 : f32
    %29 = vector.broadcast %cst_14 : f32 to vector<32x16xf32>
    %30 = arith.addf %29, %28 : vector<32x16xf32>
    %31 = arith.divf %29, %30 : vector<32x16xf32>
    %32 = vector.extract_strided_slice %13 {offsets = [64, 0], sizes = [32, 16], strides = [1, 1]} : vector<96x16xf32> to vector<32x16xf32>
    %33 = vector.extract_strided_slice %14 {offsets = [64, 0], sizes = [32, 16], strides = [1, 1]} : vector<96x16xf32> to vector<32x16xf32>
    %34 = arith.mulf %23, %33 : vector<32x16xf32>
    %35 = arith.addf %32, %34 : vector<32x16xf32>
    %36 = math.tanh %35 : vector<32x16xf32>
    %cst_15 = arith.constant 1.000000e+00 : f32
    %37 = vector.broadcast %cst_15 : f32 to vector<32x16xf32>
    %38 = arith.subf %37, %31 : vector<32x16xf32>
    %39 = arith.mulf %38, %36 : vector<32x16xf32>
    %40 = arith.mulf %31, %15 : vector<32x16xf32>
    %41 = arith.addf %39, %40 : vector<32x16xf32>
    %cst_16 = arith.constant dense<0.000000e+00> : vector<96x16xf32>
    %42 = tpu.matmul %4, %41, %cst_16 {dimension_numbers = #tpu.dot_dimension_numbers<[1], [0], [0], [1], [0, 0, 1, 1], [], []>} : vector<96x32xf32>, vector<32x16xf32>, vector<96x16xf32> -> vector<96x16xf32>
    %43 = vector.broadcast %6 : vector<96x1xf32> to vector<96x16xf32>
    %44 = arith.addf %42, %43 : vector<96x16xf32>
    %45 = vector.extract_strided_slice %10 {offsets = [96, 0], sizes = [96, 16], strides = [1, 1]} : vector<192x16xf32> to vector<96x16xf32>
    %46 = vector.extract_strided_slice %7 {offsets = [32, 0], sizes = [32, 16], strides = [1, 1]} : vector<64x16xf32> to vector<32x16xf32>
    %47 = vector.extract_strided_slice %44 {offsets = [0, 0], sizes = [32, 16], strides = [1, 1]} : vector<96x16xf32> to vector<32x16xf32>
    %48 = vector.extract_strided_slice %45 {offsets = [0, 0], sizes = [32, 16], strides = [1, 1]} : vector<96x16xf32> to vector<32x16xf32>
    %49 = arith.addf %47, %48 : vector<32x16xf32>
    %50 = arith.negf %49 : vector<32x16xf32>
    %51 = math.exp %50 : vector<32x16xf32>
    %cst_17 = arith.constant 1.000000e+00 : f32
    %52 = vector.broadcast %cst_17 : f32 to vector<32x16xf32>
    %53 = arith.addf %52, %51 : vector<32x16xf32>
    %54 = arith.divf %52, %53 : vector<32x16xf32>
    %55 = vector.extract_strided_slice %44 {offsets = [32, 0], sizes = [32, 16], strides = [1, 1]} : vector<96x16xf32> to vector<32x16xf32>
    %56 = vector.extract_strided_slice %45 {offsets = [32, 0], sizes = [32, 16], strides = [1, 1]} : vector<96x16xf32> to vector<32x16xf32>
    %57 = arith.addf %55, %56 : vector<32x16xf32>
    %58 = arith.negf %57 : vector<32x16xf32>
    %59 = math.exp %58 : vector<32x16xf32>
    %cst_18 = arith.constant 1.000000e+00 : f32
    %60 = vector.broadcast %cst_18 : f32 to vector<32x16xf32>
    %61 = arith.addf %60, %59 : vector<32x16xf32>
    %62 = arith.divf %60, %61 : vector<32x16xf32>
    %63 = vector.extract_strided_slice %44 {offsets = [64, 0], sizes = [32, 16], strides = [1, 1]} : vector<96x16xf32> to vector<32x16xf32>
    %64 = vector.extract_strided_slice %45 {offsets = [64, 0], sizes = [32, 16], strides = [1, 1]} : vector<96x16xf32> to vector<32x16xf32>
    %65 = arith.mulf %54, %64 : vector<32x16xf32>
    %66 = arith.addf %63, %65 : vector<32x16xf32>
    %67 = math.tanh %66 : vector<32x16xf32>
    %cst_19 = arith.constant 1.000000e+00 : f32
    %68 = vector.broadcast %cst_19 : f32 to vector<32x16xf32>
    %69 = arith.subf %68, %62 : vector<32x16xf32>
    %70 = arith.mulf %69, %67 : vector<32x16xf32>
    %71 = arith.mulf %62, %46 : vector<32x16xf32>
    %72 = arith.addf %70, %71 : vector<32x16xf32>
    %73 = tpu.concatenate %41, %72 in 0 : vector<32x16xf32>, vector<32x16xf32> -> vector<64x16xf32>
    %cst_20 = arith.constant dense<0.000000e+00> : vector<192x16xf32>
    %74 = tpu.matmul %3, %73, %cst_20 {dimension_numbers = #tpu.dot_dimension_numbers<[1], [0], [0], [1], [0, 0, 1, 1], [], []>} : vector<192x64xf32>, vector<64x16xf32>, vector<192x16xf32> -> vector<192x16xf32>
    %75 = vector.broadcast %5 : vector<192x1xf32> to vector<192x16xf32>
    %76 = arith.addf %74, %75 : vector<192x16xf32>
    %c1 = arith.constant 1 : index
    %c0_21 = arith.constant 0 : index
    %c0_22 = arith.constant 0 : index
    %77 = vector.load %arg2[%c1, %c0_21, %c0_22] : memref<4x96x16xbf16, #tpu.memory_space<vmem>>, vector<1x96x16xbf16>
    %78 = vector.shape_cast %77 : vector<1x96x16xbf16> to vector<96x16xbf16>
    %79 = arith.extf %78 : vector<96x16xbf16> to vector<96x16xf32>
    %80 = vector.extract_strided_slice %76 {offsets = [0, 0], sizes = [96, 16], strides = [1, 1]} : vector<192x16xf32> to vector<96x16xf32>
    %81 = vector.extract_strided_slice %73 {offsets = [0, 0], sizes = [32, 16], strides = [1, 1]} : vector<64x16xf32> to vector<32x16xf32>
    %82 = vector.extract_strided_slice %79 {offsets = [0, 0], sizes = [32, 16], strides = [1, 1]} : vector<96x16xf32> to vector<32x16xf32>
    %83 = vector.extract_strided_slice %80 {offsets = [0, 0], sizes = [32, 16], strides = [1, 1]} : vector<96x16xf32> to vector<32x16xf32>
    %84 = arith.addf %82, %83 : vector<32x16xf32>
    %85 = arith.negf %84 : vector<32x16xf32>
    %86 = math.exp %85 : vector<32x16xf32>
    %cst_23 = arith.constant 1.000000e+00 : f32
    %87 = vector.broadcast %cst_23 : f32 to vector<32x16xf32>
    %88 = arith.addf %87, %86 : vector<32x16xf32>
    %89 = arith.divf %87, %88 : vector<32x16xf32>
    %90 = vector.extract_strided_slice %79 {offsets = [32, 0], sizes = [32, 16], strides = [1, 1]} : vector<96x16xf32> to vector<32x16xf32>
    %91 = vector.extract_strided_slice %80 {offsets = [32, 0], sizes = [32, 16], strides = [1, 1]} : vector<96x16xf32> to vector<32x16xf32>
    %92 = arith.addf %90, %91 : vector<32x16xf32>
    %93 = arith.negf %92 : vector<32x16xf32>
    %94 = math.exp %93 : vector<32x16xf32>
    %cst_24 = arith.constant 1.000000e+00 : f32
    %95 = vector.broadcast %cst_24 : f32 to vector<32x16xf32>
    %96 = arith.addf %95, %94 : vector<32x16xf32>
    %97 = arith.divf %95, %96 : vector<32x16xf32>
    %98 = vector.extract_strided_slice %79 {offsets = [64, 0], sizes = [32, 16], strides = [1, 1]} : vector<96x16xf32> to vector<32x16xf32>
    %99 = vector.extract_strided_slice %80 {offsets = [64, 0], sizes = [32, 16], strides = [1, 1]} : vector<96x16xf32> to vector<32x16xf32>
    %100 = arith.mulf %89, %99 : vector<32x16xf32>
    %101 = arith.addf %98, %100 : vector<32x16xf32>
    %102 = math.tanh %101 : vector<32x16xf32>
    %cst_25 = arith.constant 1.000000e+00 : f32
    %103 = vector.broadcast %cst_25 : f32 to vector<32x16xf32>
    %104 = arith.subf %103, %97 : vector<32x16xf32>
    %105 = arith.mulf %104, %102 : vector<32x16xf32>
    %106 = arith.mulf %97, %81 : vector<32x16xf32>
    %107 = arith.addf %105, %106 : vector<32x16xf32>
    %cst_26 = arith.constant dense<0.000000e+00> : vector<96x16xf32>
    %108 = tpu.matmul %4, %107, %cst_26 {dimension_numbers = #tpu.dot_dimension_numbers<[1], [0], [0], [1], [0, 0, 1, 1], [], []>} : vector<96x32xf32>, vector<32x16xf32>, vector<96x16xf32> -> vector<96x16xf32>
    %109 = vector.broadcast %6 : vector<96x1xf32> to vector<96x16xf32>
    %110 = arith.addf %108, %109 : vector<96x16xf32>
    %111 = vector.extract_strided_slice %76 {offsets = [96, 0], sizes = [96, 16], strides = [1, 1]} : vector<192x16xf32> to vector<96x16xf32>
    %112 = vector.extract_strided_slice %73 {offsets = [32, 0], sizes = [32, 16], strides = [1, 1]} : vector<64x16xf32> to vector<32x16xf32>
    %113 = vector.extract_strided_slice %110 {offsets = [0, 0], sizes = [32, 16], strides = [1, 1]} : vector<96x16xf32> to vector<32x16xf32>
    %114 = vector.extract_strided_slice %111 {offsets = [0, 0], sizes = [32, 16], strides = [1, 1]} : vector<96x16xf32> to vector<32x16xf32>
    %115 = arith.addf %113, %114 : vector<32x16xf32>
    %116 = arith.negf %115 : vector<32x16xf32>
    %117 = math.exp %116 : vector<32x16xf32>
    %cst_27 = arith.constant 1.000000e+00 : f32
    %118 = vector.broadcast %cst_27 : f32 to vector<32x16xf32>
    %119 = arith.addf %118, %117 : vector<32x16xf32>
    %120 = arith.divf %118, %119 : vector<32x16xf32>
    %121 = vector.extract_strided_slice %110 {offsets = [32, 0], sizes = [32, 16], strides = [1, 1]} : vector<96x16xf32> to vector<32x16xf32>
    %122 = vector.extract_strided_slice %111 {offsets = [32, 0], sizes = [32, 16], strides = [1, 1]} : vector<96x16xf32> to vector<32x16xf32>
    %123 = arith.addf %121, %122 : vector<32x16xf32>
    %124 = arith.negf %123 : vector<32x16xf32>
    %125 = math.exp %124 : vector<32x16xf32>
    %cst_28 = arith.constant 1.000000e+00 : f32
    %126 = vector.broadcast %cst_28 : f32 to vector<32x16xf32>
    %127 = arith.addf %126, %125 : vector<32x16xf32>
    %128 = arith.divf %126, %127 : vector<32x16xf32>
    %129 = vector.extract_strided_slice %110 {offsets = [64, 0], sizes = [32, 16], strides = [1, 1]} : vector<96x16xf32> to vector<32x16xf32>
    %130 = vector.extract_strided_slice %111 {offsets = [64, 0], sizes = [32, 16], strides = [1, 1]} : vector<96x16xf32> to vector<32x16xf32>
    %131 = arith.mulf %120, %130 : vector<32x16xf32>
    %132 = arith.addf %129, %131 : vector<32x16xf32>
    %133 = math.tanh %132 : vector<32x16xf32>
    %cst_29 = arith.constant 1.000000e+00 : f32
    %134 = vector.broadcast %cst_29 : f32 to vector<32x16xf32>
    %135 = arith.subf %134, %128 : vector<32x16xf32>
    %136 = arith.mulf %135, %133 : vector<32x16xf32>
    %137 = arith.mulf %128, %112 : vector<32x16xf32>
    %138 = arith.addf %136, %137 : vector<32x16xf32>
    %139 = tpu.concatenate %107, %138 in 0 : vector<32x16xf32>, vector<32x16xf32> -> vector<64x16xf32>
    %cst_30 = arith.constant dense<0.000000e+00> : vector<192x16xf32>
    %140 = tpu.matmul %3, %139, %cst_30 {dimension_numbers = #tpu.dot_dimension_numbers<[1], [0], [0], [1], [0, 0, 1, 1], [], []>} : vector<192x64xf32>, vector<64x16xf32>, vector<192x16xf32> -> vector<192x16xf32>
    %141 = vector.broadcast %5 : vector<192x1xf32> to vector<192x16xf32>
    %142 = arith.addf %140, %141 : vector<192x16xf32>
    %c2 = arith.constant 2 : index
    %c0_31 = arith.constant 0 : index
    %c0_32 = arith.constant 0 : index
    %143 = vector.load %arg2[%c2, %c0_31, %c0_32] : memref<4x96x16xbf16, #tpu.memory_space<vmem>>, vector<1x96x16xbf16>
    %144 = vector.shape_cast %143 : vector<1x96x16xbf16> to vector<96x16xbf16>
    %145 = arith.extf %144 : vector<96x16xbf16> to vector<96x16xf32>
    %146 = vector.extract_strided_slice %142 {offsets = [0, 0], sizes = [96, 16], strides = [1, 1]} : vector<192x16xf32> to vector<96x16xf32>
    %147 = vector.extract_strided_slice %139 {offsets = [0, 0], sizes = [32, 16], strides = [1, 1]} : vector<64x16xf32> to vector<32x16xf32>
    %148 = vector.extract_strided_slice %145 {offsets = [0, 0], sizes = [32, 16], strides = [1, 1]} : vector<96x16xf32> to vector<32x16xf32>
    %149 = vector.extract_strided_slice %146 {offsets = [0, 0], sizes = [32, 16], strides = [1, 1]} : vector<96x16xf32> to vector<32x16xf32>
    %150 = arith.addf %148, %149 : vector<32x16xf32>
    %151 = arith.negf %150 : vector<32x16xf32>
    %152 = math.exp %151 : vector<32x16xf32>
    %cst_33 = arith.constant 1.000000e+00 : f32
    %153 = vector.broadcast %cst_33 : f32 to vector<32x16xf32>
    %154 = arith.addf %153, %152 : vector<32x16xf32>
    %155 = arith.divf %153, %154 : vector<32x16xf32>
    %156 = vector.extract_strided_slice %145 {offsets = [32, 0], sizes = [32, 16], strides = [1, 1]} : vector<96x16xf32> to vector<32x16xf32>
    %157 = vector.extract_strided_slice %146 {offsets = [32, 0], sizes = [32, 16], strides = [1, 1]} : vector<96x16xf32> to vector<32x16xf32>
    %158 = arith.addf %156, %157 : vector<32x16xf32>
    %159 = arith.negf %158 : vector<32x16xf32>
    %160 = math.exp %159 : vector<32x16xf32>
    %cst_34 = arith.constant 1.000000e+00 : f32
    %161 = vector.broadcast %cst_34 : f32 to vector<32x16xf32>
    %162 = arith.addf %161, %160 : vector<32x16xf32>
    %163 = arith.divf %161, %162 : vector<32x16xf32>
    %164 = vector.extract_strided_slice %145 {offsets = [64, 0], sizes = [32, 16], strides = [1, 1]} : vector<96x16xf32> to vector<32x16xf32>
    %165 = vector.extract_strided_slice %146 {offsets = [64, 0], sizes = [32, 16], strides = [1, 1]} : vector<96x16xf32> to vector<32x16xf32>
    %166 = arith.mulf %155, %165 : vector<32x16xf32>
    %167 = arith.addf %164, %166 : vector<32x16xf32>
    %168 = math.tanh %167 : vector<32x16xf32>
    %cst_35 = arith.constant 1.000000e+00 : f32
    %169 = vector.broadcast %cst_35 : f32 to vector<32x16xf32>
    %170 = arith.subf %169, %163 : vector<32x16xf32>
    %171 = arith.mulf %170, %168 : vector<32x16xf32>
    %172 = arith.mulf %163, %147 : vector<32x16xf32>
    %173 = arith.addf %171, %172 : vector<32x16xf32>
    %cst_36 = arith.constant dense<0.000000e+00> : vector<96x16xf32>
    %174 = tpu.matmul %4, %173, %cst_36 {dimension_numbers = #tpu.dot_dimension_numbers<[1], [0], [0], [1], [0, 0, 1, 1], [], []>} : vector<96x32xf32>, vector<32x16xf32>, vector<96x16xf32> -> vector<96x16xf32>
    %175 = vector.broadcast %6 : vector<96x1xf32> to vector<96x16xf32>
    %176 = arith.addf %174, %175 : vector<96x16xf32>
    %177 = vector.extract_strided_slice %142 {offsets = [96, 0], sizes = [96, 16], strides = [1, 1]} : vector<192x16xf32> to vector<96x16xf32>
    %178 = vector.extract_strided_slice %139 {offsets = [32, 0], sizes = [32, 16], strides = [1, 1]} : vector<64x16xf32> to vector<32x16xf32>
    %179 = vector.extract_strided_slice %176 {offsets = [0, 0], sizes = [32, 16], strides = [1, 1]} : vector<96x16xf32> to vector<32x16xf32>
    %180 = vector.extract_strided_slice %177 {offsets = [0, 0], sizes = [32, 16], strides = [1, 1]} : vector<96x16xf32> to vector<32x16xf32>
    %181 = arith.addf %179, %180 : vector<32x16xf32>
    %182 = arith.negf %181 : vector<32x16xf32>
    %183 = math.exp %182 : vector<32x16xf32>
    %cst_37 = arith.constant 1.000000e+00 : f32
    %184 = vector.broadcast %cst_37 : f32 to vector<32x16xf32>
    %185 = arith.addf %184, %183 : vector<32x16xf32>
    %186 = arith.divf %184, %185 : vector<32x16xf32>
    %187 = vector.extract_strided_slice %176 {offsets = [32, 0], sizes = [32, 16], strides = [1, 1]} : vector<96x16xf32> to vector<32x16xf32>
    %188 = vector.extract_strided_slice %177 {offsets = [32, 0], sizes = [32, 16], strides = [1, 1]} : vector<96x16xf32> to vector<32x16xf32>
    %189 = arith.addf %187, %188 : vector<32x16xf32>
    %190 = arith.negf %189 : vector<32x16xf32>
    %191 = math.exp %190 : vector<32x16xf32>
    %cst_38 = arith.constant 1.000000e+00 : f32
    %192 = vector.broadcast %cst_38 : f32 to vector<32x16xf32>
    %193 = arith.addf %192, %191 : vector<32x16xf32>
    %194 = arith.divf %192, %193 : vector<32x16xf32>
    %195 = vector.extract_strided_slice %176 {offsets = [64, 0], sizes = [32, 16], strides = [1, 1]} : vector<96x16xf32> to vector<32x16xf32>
    %196 = vector.extract_strided_slice %177 {offsets = [64, 0], sizes = [32, 16], strides = [1, 1]} : vector<96x16xf32> to vector<32x16xf32>
    %197 = arith.mulf %186, %196 : vector<32x16xf32>
    %198 = arith.addf %195, %197 : vector<32x16xf32>
    %199 = math.tanh %198 : vector<32x16xf32>
    %cst_39 = arith.constant 1.000000e+00 : f32
    %200 = vector.broadcast %cst_39 : f32 to vector<32x16xf32>
    %201 = arith.subf %200, %194 : vector<32x16xf32>
    %202 = arith.mulf %201, %199 : vector<32x16xf32>
    %203 = arith.mulf %194, %178 : vector<32x16xf32>
    %204 = arith.addf %202, %203 : vector<32x16xf32>
    %205 = tpu.concatenate %173, %204 in 0 : vector<32x16xf32>, vector<32x16xf32> -> vector<64x16xf32>
    %cst_40 = arith.constant dense<0.000000e+00> : vector<192x16xf32>
    %206 = tpu.matmul %3, %205, %cst_40 {dimension_numbers = #tpu.dot_dimension_numbers<[1], [0], [0], [1], [0, 0, 1, 1], [], []>} : vector<192x64xf32>, vector<64x16xf32>, vector<192x16xf32> -> vector<192x16xf32>
    %207 = vector.broadcast %5 : vector<192x1xf32> to vector<192x16xf32>
    %208 = arith.addf %206, %207 : vector<192x16xf32>
    %c3 = arith.constant 3 : index
    %c0_41 = arith.constant 0 : index
    %c0_42 = arith.constant 0 : index
    %209 = vector.load %arg2[%c3, %c0_41, %c0_42] : memref<4x96x16xbf16, #tpu.memory_space<vmem>>, vector<1x96x16xbf16>
    %210 = vector.shape_cast %209 : vector<1x96x16xbf16> to vector<96x16xbf16>
    %211 = arith.extf %210 : vector<96x16xbf16> to vector<96x16xf32>
    %212 = vector.extract_strided_slice %208 {offsets = [0, 0], sizes = [96, 16], strides = [1, 1]} : vector<192x16xf32> to vector<96x16xf32>
    %213 = vector.extract_strided_slice %205 {offsets = [0, 0], sizes = [32, 16], strides = [1, 1]} : vector<64x16xf32> to vector<32x16xf32>
    %214 = vector.extract_strided_slice %211 {offsets = [0, 0], sizes = [32, 16], strides = [1, 1]} : vector<96x16xf32> to vector<32x16xf32>
    %215 = vector.extract_strided_slice %212 {offsets = [0, 0], sizes = [32, 16], strides = [1, 1]} : vector<96x16xf32> to vector<32x16xf32>
    %216 = arith.addf %214, %215 : vector<32x16xf32>
    %217 = arith.negf %216 : vector<32x16xf32>
    %218 = math.exp %217 : vector<32x16xf32>
    %cst_43 = arith.constant 1.000000e+00 : f32
    %219 = vector.broadcast %cst_43 : f32 to vector<32x16xf32>
    %220 = arith.addf %219, %218 : vector<32x16xf32>
    %221 = arith.divf %219, %220 : vector<32x16xf32>
    %222 = vector.extract_strided_slice %211 {offsets = [32, 0], sizes = [32, 16], strides = [1, 1]} : vector<96x16xf32> to vector<32x16xf32>
    %223 = vector.extract_strided_slice %212 {offsets = [32, 0], sizes = [32, 16], strides = [1, 1]} : vector<96x16xf32> to vector<32x16xf32>
    %224 = arith.addf %222, %223 : vector<32x16xf32>
    %225 = arith.negf %224 : vector<32x16xf32>
    %226 = math.exp %225 : vector<32x16xf32>
    %cst_44 = arith.constant 1.000000e+00 : f32
    %227 = vector.broadcast %cst_44 : f32 to vector<32x16xf32>
    %228 = arith.addf %227, %226 : vector<32x16xf32>
    %229 = arith.divf %227, %228 : vector<32x16xf32>
    %230 = vector.extract_strided_slice %211 {offsets = [64, 0], sizes = [32, 16], strides = [1, 1]} : vector<96x16xf32> to vector<32x16xf32>
    %231 = vector.extract_strided_slice %212 {offsets = [64, 0], sizes = [32, 16], strides = [1, 1]} : vector<96x16xf32> to vector<32x16xf32>
    %232 = arith.mulf %221, %231 : vector<32x16xf32>
    %233 = arith.addf %230, %232 : vector<32x16xf32>
    %234 = math.tanh %233 : vector<32x16xf32>
    %cst_45 = arith.constant 1.000000e+00 : f32
    %235 = vector.broadcast %cst_45 : f32 to vector<32x16xf32>
    %236 = arith.subf %235, %229 : vector<32x16xf32>
    %237 = arith.mulf %236, %234 : vector<32x16xf32>
    %238 = arith.mulf %229, %213 : vector<32x16xf32>
    %239 = arith.addf %237, %238 : vector<32x16xf32>
    %cst_46 = arith.constant dense<0.000000e+00> : vector<96x16xf32>
    %240 = tpu.matmul %4, %239, %cst_46 {dimension_numbers = #tpu.dot_dimension_numbers<[1], [0], [0], [1], [0, 0, 1, 1], [], []>} : vector<96x32xf32>, vector<32x16xf32>, vector<96x16xf32> -> vector<96x16xf32>
    %241 = vector.broadcast %6 : vector<96x1xf32> to vector<96x16xf32>
    %242 = arith.addf %240, %241 : vector<96x16xf32>
    %243 = vector.extract_strided_slice %208 {offsets = [96, 0], sizes = [96, 16], strides = [1, 1]} : vector<192x16xf32> to vector<96x16xf32>
    %244 = vector.extract_strided_slice %205 {offsets = [32, 0], sizes = [32, 16], strides = [1, 1]} : vector<64x16xf32> to vector<32x16xf32>
    %245 = vector.extract_strided_slice %242 {offsets = [0, 0], sizes = [32, 16], strides = [1, 1]} : vector<96x16xf32> to vector<32x16xf32>
    %246 = vector.extract_strided_slice %243 {offsets = [0, 0], sizes = [32, 16], strides = [1, 1]} : vector<96x16xf32> to vector<32x16xf32>
    %247 = arith.addf %245, %246 : vector<32x16xf32>
    %248 = arith.negf %247 : vector<32x16xf32>
    %249 = math.exp %248 : vector<32x16xf32>
    %cst_47 = arith.constant 1.000000e+00 : f32
    %250 = vector.broadcast %cst_47 : f32 to vector<32x16xf32>
    %251 = arith.addf %250, %249 : vector<32x16xf32>
    %252 = arith.divf %250, %251 : vector<32x16xf32>
    %253 = vector.extract_strided_slice %242 {offsets = [32, 0], sizes = [32, 16], strides = [1, 1]} : vector<96x16xf32> to vector<32x16xf32>
    %254 = vector.extract_strided_slice %243 {offsets = [32, 0], sizes = [32, 16], strides = [1, 1]} : vector<96x16xf32> to vector<32x16xf32>
    %255 = arith.addf %253, %254 : vector<32x16xf32>
    %256 = arith.negf %255 : vector<32x16xf32>
    %257 = math.exp %256 : vector<32x16xf32>
    %cst_48 = arith.constant 1.000000e+00 : f32
    %258 = vector.broadcast %cst_48 : f32 to vector<32x16xf32>
    %259 = arith.addf %258, %257 : vector<32x16xf32>
    %260 = arith.divf %258, %259 : vector<32x16xf32>
    %261 = vector.extract_strided_slice %242 {offsets = [64, 0], sizes = [32, 16], strides = [1, 1]} : vector<96x16xf32> to vector<32x16xf32>
    %262 = vector.extract_strided_slice %243 {offsets = [64, 0], sizes = [32, 16], strides = [1, 1]} : vector<96x16xf32> to vector<32x16xf32>
    %263 = arith.mulf %252, %262 : vector<32x16xf32>
    %264 = arith.addf %261, %263 : vector<32x16xf32>
    %265 = math.tanh %264 : vector<32x16xf32>
    %cst_49 = arith.constant 1.000000e+00 : f32
    %266 = vector.broadcast %cst_49 : f32 to vector<32x16xf32>
    %267 = arith.subf %266, %260 : vector<32x16xf32>
    %268 = arith.mulf %267, %265 : vector<32x16xf32>
    %269 = arith.mulf %260, %244 : vector<32x16xf32>
    %270 = arith.addf %268, %269 : vector<32x16xf32>
    %271 = tpu.concatenate %239, %270 in 0 : vector<32x16xf32>, vector<32x16xf32> -> vector<64x16xf32>
    %c0_50 = arith.constant 0 : index
    %c0_51 = arith.constant 0 : index
    %272 = vector.load %arg10[%c0_50, %c0_51] : memref<64x16xf32, #tpu.memory_space<vmem>>, vector<64x16xf32>
    tpu.vector_store %arg10[%c0_50, %c0_51], %271 {strides = array<i32>} : memref<64x16xf32, #tpu.memory_space<vmem>>, vector<64x16xf32>,
    %c1_i32 = arith.constant 1 : i32
    %273 = arith.cmpi eq, %arg1, %c1_i32 : i32
    %274 = arith.extui %273 : i1 to i32
    %c0_i32_52 = arith.constant 0 : i32
    %275 = arith.cmpi ne, %274, %c0_i32_52 : i32
    scf.if %275 {
      %276 = vector.extract_strided_slice %271 {offsets = [32, 0], sizes = [32, 16], strides = [1, 1]} : vector<64x16xf32> to vector<32x16xf32>
      %c0_53 = arith.constant 0 : index
      %c0_54 = arith.constant 0 : index
      %277 = vector.load %arg7[%c0_53, %c0_54] : memref<128x32xf32, #tpu.memory_space<vmem>>, vector<128x32xf32>
      %cst_55 = arith.constant dense<0.000000e+00> : vector<128x16xf32>
      %278 = tpu.matmul %277, %276, %cst_55 {dimension_numbers = #tpu.dot_dimension_numbers<[1], [0], [0], [1], [0, 0, 1, 1], [], []>} : vector<128x32xf32>, vector<32x16xf32>, vector<128x16xf32> -> vector<128x16xf32>
      %c0_56 = arith.constant 0 : index
      %c0_57 = arith.constant 0 : index
      %279 = vector.load %arg8[%c0_56, %c0_57] : memref<128x1xf32, #tpu.memory_space<vmem>>, vector<128x1xf32>
      %280 = vector.broadcast %279 : vector<128x1xf32> to vector<128x16xf32>
      %281 = arith.addf %278, %280 : vector<128x16xf32>
      %cst_58 = arith.constant 0.000000e+00 : f32
      %282 = vector.broadcast %cst_58 : f32 to vector<128x16xf32>
      %283 = arith.maximumf %281, %282 : vector<128x16xf32>
      %284 = math.absf %281 : vector<128x16xf32>
      %cst_59 = arith.constant 0.000000e+00 : f32
      %285 = vector.broadcast %cst_59 : f32 to vector<128x16xf32>
      %286 = arith.subf %285, %284 : vector<128x16xf32>
      %287 = math.exp %286 : vector<128x16xf32>
      %cst_60 = arith.constant 1.000000e+00 : f32
      %288 = vector.broadcast %cst_60 : f32 to vector<128x16xf32>
      %289 = arith.addf %288, %287 : vector<128x16xf32>
      %290 = math.log %289 : vector<128x16xf32>
      %291 = arith.addf %283, %290 : vector<128x16xf32>
      %292 = tpu.iota {dimensions = array<i32: 0>} : vector<128x16xi32>
      %c1_i32_61 = arith.constant 1 : i32
      %293 = vector.broadcast %c1_i32_61 : i32 to vector<128x16xi32>
      %294 = arith.cmpi eq, %292, %293 : vector<128x16xi32>
      %295 = arith.select %294, %291, %281 : vector<128x16xi1>, vector<128x16xf32>
      %c0_62 = arith.constant 0 : index
      %c0_63 = arith.constant 0 : index
      %296 = vector.load %arg9[%c0_62, %c0_63] : memref<128x16xf32, #tpu.memory_space<vmem>>, vector<128x16xf32>
      tpu.vector_store %arg9[%c0_62, %c0_63], %295 {strides = array<i32>} : memref<128x16xf32, #tpu.memory_space<vmem>>, vector<128x16xf32>,
    } else {
    }
    return
  }
  func.func @transform_0(%arg0: i32, %arg1: i32) -> (i32, i32, i32) {
    %c0_i32 = arith.constant 0 : i32
    %c0_i32_0 = arith.constant 0 : i32
    return %arg1, %c0_i32, %arg0 : i32, i32, i32
  }
  func.func @transform_1(%arg0: i32, %arg1: i32) -> (i32, i32) {
    %c0_i32 = arith.constant 0 : i32
    %c0_i32_0 = arith.constant 0 : i32
    %c0_i32_1 = arith.constant 0 : i32
    return %c0_i32, %c0_i32_0 : i32, i32
  }
  func.func @transform_2(%arg0: i32, %arg1: i32) -> (i32, i32) {
    %c0_i32 = arith.constant 0 : i32
    %c0_i32_0 = arith.constant 0 : i32
    %c0_i32_1 = arith.constant 0 : i32
    return %c0_i32, %c0_i32_0 : i32, i32
  }
  func.func @transform_3(%arg0: i32, %arg1: i32) -> (i32, i32) {
    %c0_i32 = arith.constant 0 : i32
    %c0_i32_0 = arith.constant 0 : i32
    %c0_i32_1 = arith.constant 0 : i32
    return %c0_i32, %c0_i32_0 : i32, i32
  }
  func.func @transform_4(%arg0: i32, %arg1: i32) -> (i32, i32) {
    %c0_i32 = arith.constant 0 : i32
    %c0_i32_0 = arith.constant 0 : i32
    %c0_i32_1 = arith.constant 0 : i32
    return %c0_i32, %c0_i32_0 : i32, i32
  }
  func.func @transform_5(%arg0: i32, %arg1: i32) -> (i32, i32) {
    %c0_i32 = arith.constant 0 : i32
    %c0_i32_0 = arith.constant 0 : i32
    %c0_i32_1 = arith.constant 0 : i32
    return %c0_i32, %c0_i32_0 : i32, i32
  }
  func.func @transform_6(%arg0: i32, %arg1: i32) -> (i32, i32) {
    %c0_i32 = arith.constant 0 : i32
    %c0_i32_0 = arith.constant 0 : i32
    %c0_i32_1 = arith.constant 0 : i32
    return %c0_i32, %c0_i32_0 : i32, i32
  }
  func.func @transform_7(%arg0: i32, %arg1: i32) -> (i32, i32) {
    %c0_i32 = arith.constant 0 : i32
    %c0_i32_0 = arith.constant 0 : i32
    return %c0_i32, %arg0 : i32, i32
  }
}

</mosaic_0001>

<bundles_post_ra>
// kernel: squeeze.17
= control target key start
LH: loop header
LB: loop body
LE: loop exit
PB: predicated region body
PF: predicated region fallthrough
CT: control target
= control target key end

     0   :  { %vm7_vm0 = vcmask 64512   ;;  %s39_s0 = inlined_call_operand.vmem [shape: f32[16], index: 0, kind: input, shape index: {}]   ;;  %s40_s1 = inlined_call_operand.vmem [shape: f32[2,8], index: 1, kind: output, shape index: {}]  }
   0x1   :  { %v4_v0 = vld [vmem:[%s39_s0] sm:$0x1]  ;;  %s22_s0 = smov 120  }
   0x2   :  { %5 = vst [vmem:[#allocation1] sm:$0x1] %v4_v0 }
   0x9   :  { %v9_v1 = vld [vmem:[#allocation1] sm:$0x1]  }
   0xa   :  { %v6_v2 = vld [vmem:[#allocation1] sm:$0x1]   ;;  %10 = vrot.lane.b32.xlu0 %v9_v1, %s22_s0 }
   0xb   :  { %8 = vst.msk [vmem:[#allocation0] sm:$0x1] %vm7_vm0, %v6_v2  }
  0x7c   :  { %v11_v3 = vpop.permute.xlu0 %10  }
  0x7d   :  { %14 = vst.msk [vmem:[#allocation0 + $0x1] sm:$0x1] %vm7_vm0, %v11_v3  }
  0x84   :  { %v18_v4 = vld [vmem:[#allocation0] sm:$0x3] }
  0x85   :  { %20 = vst [vmem:[%s40_s1] sm:$0x3] %v18_v4 }

// kernel: custom-call.4
= control target key start
LH: loop header
LB: loop body
LE: loop exit
PB: predicated region body
PF: predicated region fallthrough
CT: control target
= control target key end

     0   :  { %s469_s6 = smov 0   ;;  %s471_s7 = smov 0   ;;  %s549_s0 = inlined_call_operand.vmem [shape: f32[2,8,8], index: 0, kind: input, shape index: {}]   ;;  %s550_s1 = inlined_call_operand.vmem [shape: f32[2,8,8], index: 1, kind: output, shape index: {}]  }
   0x1   :  { %s473_s8 = smov 0  }
   0x2 LB: > { %s367_s9 = sadd.s32 4294967295, %s456_s8   ;;  %s26_s10 = sadd.s32 1, %s452_s7  ;;  %s456_s8 = sphi %s473_s8, %s7_s8   ;;  %s452_s7 = sphi %s471_s7, %s552_s7   ;;  %s448_s6 = sphi %s469_s6, %s551_s6  }
   0x3   : > { %p28_p0 = scmp.ge.s32.totalorder %s26_s10, 2  ;;  %p369_p1 = scmp.ge.s32.totalorder %s456_s8, 2 }
   0x4   : > { %s42_s11 = sand.u32 (!%p369_p1), 1, %s456_s8   ;;  %s371_s12 = sshll.u32 (!%p369_p1), %s452_s7, 3 }
   0x5   : > { %s554_s10 = smov (%p28_p0, %s26_s10), 0  ;;  %40 = sbr.rel (%p369_p1) target bundleno = 12 (0xc), region = 16 }
   0x6   : > { %s370_s13 = sshll.u32 (!%p369_p1), %s42_s11, 3  ;;  %s48_s16 = scalar_lea.vmem (!%p369_p1), %s549_s0, %s371_s12 }
   0x7   : > { %v76_v0 = vld [vmem:[%s48_s16] sm:$0xff] (!%p369_p1)  ;;  %s44_s17 = scalar_lea.vmem (!%p369_p1), [#allocation0], %s370_s13 }
   0x8   : > { %77 = vst [vmem:[%s44_s17] sm:$0xff] (!%p369_p1), %v76_v0 }
   0xc PF: > { %p372_p2 = scmp.ge.s32.totalorder %s456_s8, 1  ;;  %p82_p3 = scmp.lt.s32.totalorder %s456_s8, 3 }
   0xe   : > { %p83_p4 = pnand %p372_p2, %p82_p3 }
   0xf   : > { %s89_s18 = sand.u32 (!%p83_p4), 1, %s367_s9   ;;  %v458_v1 = vmov (!%p83_p4), 0.0   ;;  %vm101_vm0 = vcmask (!%p83_p4), 7168   ;;  %vm119_vm1 = vcmask (!%p83_p4), 15368   ;;  %vm136_vm2 = vcmask (!%p83_p4), 1047553   ;;  %s390_s22 = sshll.u32 (!%p83_p4), %s448_s6, 3 }
  0x10   : > { %86 = sbr.rel (%p83_p4) target bundleno = 1377 (0x561), region = 54  ;;  %s373_s19 = sshll.u32 (!%p83_p4), %s89_s18, 3  ;;  %vm137_vm3 = vmand (!%p83_p4), %vm119_vm1, %vm136_vm2  ;;  %vm141_vm4 = vcmask (!%p83_p4), 23568   ;;  %vm158_vm5 = vcmask (!%p83_p4), 1047554   ;;  %vm163_vm7 = vcmask (!%p83_p4), 31768   ;;  %vm180_vm8 = vcmask (!%p83_p4), 1047555  }
  0x11   : > { %s496_s20 = scalar_lea.vmem (!%p83_p4), [#allocation1], %s373_s19  ;;  %s500_s21 = scalar_lea.vmem (!%p83_p4), [#allocation0], %s373_s19  ;;  %vm159_vm6 = vmand (!%p83_p4), %vm141_vm4, %vm158_vm5  ;;  %vm185_vm10 = vcmask (!%p83_p4), 39968   ;;  %vm202_vm11 = vcmask (!%p83_p4), 1047556   ;;  %vm207_vm13 = vcmask (!%p83_p4), 48168   ;;  %vm224_vm14 = vcmask (!%p83_p4), 1047557  }
  0x12   : > { %100 = vst [vmem:[%s496_s20] sm:$0xff] (!%p83_p4), %v458_v1  ;;  %v103_v5 = vld [vmem:[%s500_s21] ss:$0 sm:$0xff] (!%p83_p4)  ;;  %v376_v17 = vld [vmem:[%s500_s21 + $0x1] ss:$0 sm:$0xff] (!%p83_p4)  ;;  %v378_v29 = vld [vmem:[%s500_s21 + $0x2] ss:$0 sm:$0xff] (!%p83_p4)  ;;  %s280_s25 = scalar_lea.vmem (!%p83_p4), %s550_s1, %s390_s22 }
  0x13   : > { %v504_v9 = vld [vmem:[%s500_s21] sm:$0xff] (!%p83_p4)  ;;  %vm181_vm9 = vmand (!%p83_p4), %vm163_vm7, %vm180_vm8  ;;  %vm246_vm1 = vcmask (!%p83_p4), 1047558   ;;  %vm268_vm4 = vcmask (!%p83_p4), 1047559  }
  0x14   : > { %v380_v41 = vld [vmem:[%s500_s21 + $0x3] ss:$0 sm:$0xff] (!%p83_p4)  ;;  %v382_v53 = vld [vmem:[%s500_s21 + $0x4] ss:$0 sm:$0xff] (!%p83_p4)  ;;  %vm203_vm12 = vmand (!%p83_p4), %vm185_vm10, %vm202_vm11 }
  0x15   : > { %v384_v1 = vld [vmem:[%s500_s21 + $0x5] ss:$0 sm:$0xff] (!%p83_p4)  ;;  %vm225_vm15 = vmand (!%p83_p4), %vm207_vm13, %vm224_vm14 }
  0x19   : > { %v102_v2 = vld [vmem:[%s496_s20] ss:$0 sm:$0xff] }
  0x1a   : > { %v104_v3 = vmul.f32 %v102_v2, %v102_v2  ;;  %v111_v4 = vmul.f32 0.0, %v102_v2 }
  0x1c   : > { %105 = vadd.xlane.f32.xlu0 %v104_v3 }
  0x20   : > { %112 = vadd.xlane.f32.xlu0 %v111_v4 }
  0xa9   : > { %v106_v6 = vpop.xlane.xlu0 %105 }
  0xaa   : > { %v107_v7 = vsub.f32 %v103_v5, %v106_v6 }
  0xac   : > { %418 = vrsqrt.f32 %v107_v7 }
  0xad   : > { %v113_v8 = vpop.xlane.xlu0 %112 }
  0xae   : > { %v114_v10 = vsub.f32 %v504_v9, %v113_v8 }
  0xb6   : > { %v419_v11 = vpop.eup %418 }
  0xb7   : > { %v115_v12 = vmul.f32 %v419_v11, %v114_v10 }
  0xb9   : > { %v116_v13 = vsel %vm101_vm0, %v115_v12, 0.0  ;;  %vm229_vm0 = vcmask 56368  }
  0xba   : > { %118 = vst [vmem:[%s496_s20] sm:$0xff] %v116_v13  ;;  %vm247_vm2 = vmand %vm229_vm0, %vm246_vm1 }
  0xc1   : > { %v375_v14 = vld [vmem:[%s496_s20 + $0x1] ss:$0 sm:$0xff] }
  0xc2   : > { %v124_v15 = vmul.f32 %v375_v14, %v375_v14  ;;  %v131_v16 = vmul.f32 %v375_v14, %v116_v13  ;;  %v386_v14 = vld [vmem:[%s500_s21 + $0x6] ss:$0 sm:$0xff] }
  0xc4   : > { %125 = vadd.xlane.f32.xlu1 %v124_v15 }
  0xc8   : > { %132 = vadd.xlane.f32.xlu1 %v131_v16 }
 0x151   : > { %v126_v18 = vpop.xlane.xlu1 %125 }
 0x152   : > { %v127_v19 = vsub.f32 %v376_v17, %v126_v18 }
 0x154   : > { %420 = vrsqrt.f32 %v127_v19 }
 0x155   : > { %v133_v20 = vpop.xlane.xlu1 %132 }
 0x156   : > { %v134_v21 = vsub.f32 %v504_v9, %v133_v20 }
 0x15e   : > { %v421_v22 = vpop.eup %420 }
 0x15f   : > { %v135_v23 = vmul.f32 %v421_v22, %v134_v21 }
 0x161   : > { %v138_v24 = vsel %vm137_vm3, %v135_v23, 0.0  ;;  %vm251_vm3 = vcmask 64568  }
 0x162   : > { %v139_v25 = vadd.f32 %v138_v24, %v116_v13  ;;  %vm269_vm5 = vmand %vm251_vm3, %vm268_vm4 }
 0x164   : > { %140 = vst [vmem:[%s496_s20] sm:$0xff] %v139_v25 }
 0x16b   : > { %v377_v26 = vld [vmem:[%s496_s20 + $0x2] ss:$0 sm:$0xff] }
 0x16c   : > { %v153_v27 = vmul.f32 %v377_v26, %v139_v25  ;;  %v146_v28 = vmul.f32 %v377_v26, %v377_v26  ;;  %v388_v26 = vld [vmem:[%s500_s21 + $0x7] ss:$0 sm:$0xff] }
 0x16e   : > { %154 = vadd.xlane.f32.xlu1 %v153_v27  ;;  %147 = vadd.xlane.f32.xlu0 %v146_v28 }
 0x1fb   : > { %v148_v30 = vpop.xlane.xlu0 %147  ;;  %v155_v32 = vpop.xlane.xlu1 %154 }
 0x1fc   : > { %v149_v31 = vsub.f32 %v378_v29, %v148_v30  ;;  %v156_v33 = vsub.f32 %v504_v9, %v155_v32 }
 0x1fe   : > { %422 = vrsqrt.f32 %v149_v31 }
 0x208   : > { %v423_v34 = vpop.eup %422 }
 0x209   : > { %v157_v35 = vmul.f32 %v423_v34, %v156_v33 }
 0x20b   : > { %v160_v36 = vsel %vm159_vm6, %v157_v35, 0.0 }
 0x20c   : > { %v161_v37 = vadd.f32 %v160_v36, %v139_v25 }
 0x20e   : > { %162 = vst [vmem:[%s496_s20] sm:$0xff] %v161_v37 }
 0x215   : > { %v379_v38 = vld [vmem:[%s496_s20 + $0x3] ss:$0 sm:$0xff] }
 0x216   : > { %v175_v39 = vmul.f32 %v379_v38, %v161_v37  ;;  %v168_v40 = vmul.f32 %v379_v38, %v379_v38 }
 0x218   : > { %176 = vadd.xlane.f32.xlu1 %v175_v39  ;;  %169 = vadd.xlane.f32.xlu0 %v168_v40 }
 0x2a5   : > { %v170_v42 = vpop.xlane.xlu0 %169  ;;  %v177_v44 = vpop.xlane.xlu1 %176 }
 0x2a6   : > { %v171_v43 = vsub.f32 %v380_v41, %v170_v42  ;;  %v178_v45 = vsub.f32 %v504_v9, %v177_v44 }
 0x2a8   : > { %424 = vrsqrt.f32 %v171_v43 }
 0x2b2   : > { %v425_v46 = vpop.eup %424 }
 0x2b3   : > { %v179_v47 = vmul.f32 %v425_v46, %v178_v45 }
 0x2b5   : > { %v182_v48 = vsel %vm181_vm9, %v179_v47, 0.0 }
 0x2b6   : > { %v183_v49 = vadd.f32 %v182_v48, %v161_v37 }
 0x2b8   : > { %184 = vst [vmem:[%s496_s20] sm:$0xff] %v183_v49 }
 0x2bf   : > { %v381_v50 = vld [vmem:[%s496_s20 + $0x4] ss:$0 sm:$0xff] }
 0x2c0   : > { %v197_v51 = vmul.f32 %v381_v50, %v183_v49  ;;  %v190_v52 = vmul.f32 %v381_v50, %v381_v50 }
 0x2c2   : > { %198 = vadd.xlane.f32.xlu1 %v197_v51  ;;  %191 = vadd.xlane.f32.xlu0 %v190_v52 }
 0x34f   : > { %v192_v54 = vpop.xlane.xlu0 %191  ;;  %v199_v56 = vpop.xlane.xlu1 %198 }
 0x350   : > { %v193_v55 = vsub.f32 %v382_v53, %v192_v54  ;;  %v200_v57 = vsub.f32 %v504_v9, %v199_v56 }
 0x352   : > { %426 = vrsqrt.f32 %v193_v55 }
 0x35c   : > { %v427_v58 = vpop.eup %426 }
 0x35d   : > { %v201_v59 = vmul.f32 %v427_v58, %v200_v57 }
 0x35f   : > { %v204_v60 = vsel %vm203_vm12, %v201_v59, 0.0 }
 0x360   : > { %v205_v61 = vadd.f32 %v204_v60, %v183_v49 }
 0x362   : > { %206 = vst [vmem:[%s496_s20] sm:$0xff] %v205_v61 }
 0x369   : > { %v383_v62 = vld [vmem:[%s496_s20 + $0x5] ss:$0 sm:$0xff] }
 0x36a   : > { %v219_v63 = vmul.f32 %v383_v62, %v205_v61  ;;  %v212_v0 = vmul.f32 %v383_v62, %v383_v62 }
 0x36c   : > { %220 = vadd.xlane.f32.xlu1 %v219_v63  ;;  %213 = vadd.xlane.f32.xlu0 %v212_v0 }
 0x3f9   : > { %v214_v2 = vpop.xlane.xlu0 %213  ;;  %v221_v4 = vpop.xlane.xlu1 %220 }
 0x3fa   : > { %v215_v3 = vsub.f32 %v384_v1, %v214_v2  ;;  %v222_v5 = vsub.f32 %v504_v9, %v221_v4 }
 0x3fc   : > { %428 = vrsqrt.f32 %v215_v3 }
 0x406   : > { %v429_v6 = vpop.eup %428 }
 0x407   : > { %v223_v7 = vmul.f32 %v429_v6, %v222_v5 }
 0x409   : > { %v226_v8 = vsel %vm225_vm15, %v223_v7, 0.0 }
 0x40a   : > { %v227_v10 = vadd.f32 %v226_v8, %v205_v61 }
 0x40c   : > { %228 = vst [vmem:[%s496_s20] sm:$0xff] %v227_v10 }
 0x413   : > { %v385_v11 = vld [vmem:[%s496_s20 + $0x6] ss:$0 sm:$0xff] }
 0x414   : > { %v241_v12 = vmul.f32 %v385_v11, %v227_v10  ;;  %v234_v13 = vmul.f32 %v385_v11, %v385_v11 }
 0x416   : > { %242 = vadd.xlane.f32.xlu1 %v241_v12  ;;  %235 = vadd.xlane.f32.xlu0 %v234_v13 }
 0x4a3   : > { %v236_v15 = vpop.xlane.xlu0 %235  ;;  %v243_v17 = vpop.xlane.xlu1 %242 }
 0x4a4   : > { %v237_v16 = vsub.f32 %v386_v14, %v236_v15  ;;  %v244_v18 = vsub.f32 %v504_v9, %v243_v17 }
 0x4a6   : > { %430 = vrsqrt.f32 %v237_v16 }
 0x4b0   : > { %v431_v19 = vpop.eup %430 }
 0x4b1   : > { %v245_v20 = vmul.f32 %v431_v19, %v244_v18 }
 0x4b3   : > { %v248_v21 = vsel %vm247_vm2, %v245_v20, 0.0 }
 0x4b4   : > { %v249_v22 = vadd.f32 %v248_v21, %v227_v10 }
 0x4b6   : > { %250 = vst [vmem:[%s496_s20] sm:$0xff] %v249_v22 }
 0x4bd   : > { %v387_v23 = vld [vmem:[%s496_s20 + $0x7] ss:$0 sm:$0xff] }
 0x4be   : > { %v263_v24 = vmul.f32 %v387_v23, %v249_v22  ;;  %v256_v25 = vmul.f32 %v387_v23, %v387_v23 }
 0x4c0   : > { %264 = vadd.xlane.f32.xlu1 %v263_v24  ;;  %257 = vadd.xlane.f32.xlu0 %v256_v25 }
 0x54d   : > { %v258_v27 = vpop.xlane.xlu0 %257  ;;  %v265_v29 = vpop.xlane.xlu1 %264 }
 0x54e   : > { %v259_v28 = vsub.f32 %v388_v26, %v258_v27  ;;  %v266_v30 = vsub.f32 %v504_v9, %v265_v29 }
 0x550   : > { %432 = vrsqrt.f32 %v259_v28 }
 0x55a   : > { %v433_v31 = vpop.eup %432 }
 0x55b   : > { %v267_v32 = vmul.f32 %v433_v31, %v266_v30 }
 0x55d   : > { %v270_v33 = vsel %vm269_vm5, %v267_v32, 0.0 }
 0x55e   : > { %v271_v34 = vadd.f32 %v270_v33, %v249_v22 }
 0x560   : > { %272 = vst [vmem:[%s496_s20] sm:$0xff] %v271_v34  ;;  %309 = vst [vmem:[%s280_s25] sm:$0xff] %v271_v34 }
 0x561 PF: > { %s7_s8 = sadd.s32 1, %s456_s8   ;;  %s551_s6 = smov %s452_s7 }
 0x562   : > { %p4_p5 = scmp.ge.s32.totalorder %s7_s8, 4   ;;  %s552_s7 = smov %s554_s10 }
 0x564   :  { %6 = sbr.rel (!%p4_p5) target bundleno = 2 (0x2), region = 132 }

// kernel: custom-call.5
= control target key start
LH: loop header
LB: loop body
LE: loop exit
PB: predicated region body
PF: predicated region fallthrough
CT: control target
= control target key end

     0   :  { %s385_s6 = smov 0   ;;  %s387_s7 = smov 0   ;;  %s443_s0 = inlined_call_operand.vmem [shape: f32[2,1,8,8], index: 0, kind: input, shape index: {}]   ;;  %s444_s1 = inlined_call_operand.vmem [shape: f32[2,1,8,8], index: 1, kind: output, shape index: {}]  }
   0x1   :  { %s389_s8 = smov 0  }
   0x2 LB: > { %s311_s9 = sadd.s32 4294967295, %s372_s8   ;;  %s33_s10 = sadd.s32 1, %s368_s7  ;;  %s372_s8 = sphi %s389_s8, %s7_s8   ;;  %s368_s7 = sphi %s387_s7, %s446_s7   ;;  %s364_s6 = sphi %s385_s6, %s445_s6  }
   0x3   : > { %p35_p0 = scmp.ge.s32.totalorder %s33_s10, 2  ;;  %p313_p1 = scmp.ge.s32.totalorder %s372_s8, 2 }
   0x4   : > { %s49_s11 = sand.u32 (!%p313_p1), 1, %s372_s8   ;;  %s315_s12 = sshll.u32 (!%p313_p1), %s368_s7, 3 }
   0x5   : > { %s448_s10 = smov (%p35_p0, %s33_s10), 0  ;;  %47 = sbr.rel (%p313_p1) target bundleno = 12 (0xc), region = 16 }
   0x6   : > { %s314_s13 = sshll.u32 (!%p313_p1), %s49_s11, 3  ;;  %s56_s16 = scalar_lea.vmem (!%p313_p1), %s443_s0, %s315_s12 }
   0x7   : > { %v84_v0 = vld [vmem:[%s56_s16] sm:$0xff] (!%p313_p1)  ;;  %s51_s17 = scalar_lea.vmem (!%p313_p1), [#allocation0], %s314_s13 }
   0x8   : > { %85 = vst [vmem:[%s51_s17] sm:$0xff] (!%p313_p1), %v84_v0 }
   0xc PF: > { %p316_p2 = scmp.ge.s32.totalorder %s372_s8, 1  ;;  %p90_p3 = scmp.lt.s32.totalorder %s372_s8, 3 }
   0xe   : > { %p91_p4 = pnand %p316_p2, %p90_p3 }
  0x10   : > { %94 = sbr.rel (%p91_p4) target bundleno = 1213 (0x4bd), region = 54 }
  0x17   : > { %s97_s18 = sand.u32 1, %s311_s9   ;;  %v108_v1 = vlaneseq  ;;  %v374_v10 = vmov -1.0   ;;  %s320_s21 = sshll.u32 %s364_s6, 3 }
  0x18   : > { %s317_s19 = sshll.u32 %s97_s18, 3  ;;  %s219_s24 = scalar_lea.vmem %s444_s1, %s320_s21 }
  0x19   : > { %v412_v2 = vand.u32 127, %v108_v1  ;;  %v112_v3 = vshrl.u32 %v108_v1, 7  ;;  %s99_s20 = scalar_lea.vmem [#allocation0], %s317_s19 }
  0x1a   : > { %v115_v4 = vld [vmem:[%s99_s20] sm:$0xff] }
  0x1b   : > { %vm110_vm0 = vcmp.lt.s32.totalorder %v412_v2, 8  ;;  %vm114_vm1 = vcmp.eq.s32.totalorder %v112_v3, %v412_v2  ;;  %vm119_vm2 = vcmp.ge.s32.totalorder %v112_v3, %v412_v2  ;;  %vm133_vm4 = vcmp.eq.s32.totalorder %v412_v2, 0 }
  0x1c   : > { %v116_v5 = vsel %vm114_vm1, %v115_v4, 0.0  ;;  %vm120_vm3 = vmand %vm119_vm2, %vm110_vm0  ;;  %vm130_vm5 = vcmp.eq.s32.totalorder %v412_v2, %v112_v3  ;;  %v134_v11 = vsel %vm133_vm4, 1.0, %v374_v10  ;;  %vm141_vm6 = vcmp.eq.s32.totalorder %v412_v2, 1 }
  0x1d   : > { %v121_v6 = vsel %vm120_vm3, %v115_v4, 0.0  ;;  %117 = vadd.xlane.f32.xlu0 %v116_v5  ;;  %v135_v12 = vsel %vm130_vm5, %v134_v11, 0.0  ;;  %vm151_vm7 = vcmp.eq.s32.totalorder %v412_v2, 2  ;;  %vm161_vm8 = vcmp.eq.s32.totalorder %v412_v2, 3 }
  0x1e   : > { %vm171_vm9 = vcmp.eq.s32.totalorder %v412_v2, 4  ;;  %vm181_vm10 = vcmp.eq.s32.totalorder %v412_v2, 5  ;;  %vm191_vm11 = vcmp.eq.s32.totalorder %v412_v2, 6  ;;  %vm201_vm12 = vcmp.eq.s32.totalorder %v412_v2, 7 }
  0xaa   : > { %v417_v7 = vpop.xlane.xlu0 %117 }
  0xab   : > { %348 = vrcp.f32 %v417_v7  ;;  %vm208_vm13 = vweird.f32 %v417_v7 }
  0xb5   : > { %v349_v8 = vpop.eup %348 }
  0xb6   : > { %v123_v9 = vmul.f32 %v349_v8, %v121_v6 }
  0xb8   : > { %124 = vst [vmem:[#allocation2] sm:$0xff] %v123_v9 }
  0xbf   : > { %v137_v13 = vld [vmem:[#allocation2 + $0x1] ss:$0 sm:$0xff]  ;;  %v147_v16 = vld [vmem:[#allocation2 + $0x2] ss:$0 sm:$0xff]  ;;  %v157_v21 = vld [vmem:[#allocation2 + $0x3] ss:$0 sm:$0xff] }
  0xc0   : > { %v138_v14 = vxor.u32 2147483648, %v137_v13  ;;  %v148_v18 = vxor.u32 2147483648, %v147_v16  ;;  %v158_v23 = vxor.u32 2147483648, %v157_v21  ;;  %v167_v26 = vld [vmem:[#allocation2 + $0x4] ss:$0 sm:$0xff] }
  0xc1   : > { %v168_v28 = vxor.u32 2147483648, %v167_v26  ;;  %v177_v31 = vld [vmem:[#allocation2 + $0x5] ss:$0 sm:$0xff]  ;;  %v187_v36 = vld [vmem:[#allocation2 + $0x6] ss:$0 sm:$0xff] }
  0xc2   : > { %v142_v15 = vmul.f32 %v138_v14, %v135_v12  ;;  %v178_v33 = vxor.u32 2147483648, %v177_v31  ;;  %v188_v38 = vxor.u32 2147483648, %v187_v36  ;;  %v197_v41 = vld [vmem:[#allocation2 + $0x7] ss:$0 sm:$0xff] }
  0xc3   : > { %v198_v43 = vxor.u32 2147483648, %v197_v41 }
  0xc4   : > { %143 = vadd.xlane.f32.xlu0 %v142_v15 }
 0x151   : > { %v144_v17 = vpop.xlane.xlu0 %143 }
 0x152   : > { %v145_v19 = vsel %vm141_vm6, %v144_v17, %v135_v12 }
 0x153   : > { %v152_v20 = vmul.f32 %v148_v18, %v145_v19 }
 0x155   : > { %153 = vadd.xlane.f32.xlu1 %v152_v20 }
 0x1e2   : > { %v154_v22 = vpop.xlane.xlu1 %153 }
 0x1e3   : > { %v155_v24 = vsel %vm151_vm7, %v154_v22, %v145_v19 }
 0x1e4   : > { %v162_v25 = vmul.f32 %v158_v23, %v155_v24 }
 0x1e6   : > { %163 = vadd.xlane.f32.xlu1 %v162_v25 }
 0x273   : > { %v164_v27 = vpop.xlane.xlu1 %163 }
 0x274   : > { %v165_v29 = vsel %vm161_vm8, %v164_v27, %v155_v24 }
 0x275   : > { %v172_v30 = vmul.f32 %v168_v28, %v165_v29 }
 0x277   : > { %173 = vadd.xlane.f32.xlu0 %v172_v30 }
 0x304   : > { %v174_v32 = vpop.xlane.xlu0 %173 }
 0x305   : > { %v175_v34 = vsel %vm171_vm9, %v174_v32, %v165_v29 }
 0x306   : > { %v182_v35 = vmul.f32 %v178_v33, %v175_v34 }
 0x308   : > { %183 = vadd.xlane.f32.xlu1 %v182_v35 }
 0x395   : > { %v184_v37 = vpop.xlane.xlu1 %183 }
 0x396   : > { %v185_v39 = vsel %vm181_vm10, %v184_v37, %v175_v34 }
 0x397   : > { %v192_v40 = vmul.f32 %v188_v38, %v185_v39 }
 0x399   : > { %193 = vadd.xlane.f32.xlu0 %v192_v40 }
 0x426   : > { %v194_v42 = vpop.xlane.xlu0 %193 }
 0x427   : > { %v195_v44 = vsel %vm191_vm11, %v194_v42, %v185_v39 }
 0x428   : > { %v202_v45 = vmul.f32 %v198_v43, %v195_v44 }
 0x42a   : > { %203 = vadd.xlane.f32.xlu1 %v202_v45 }
 0x4b7   : > { %v204_v46 = vpop.xlane.xlu1 %203 }
 0x4b8   : > { %v205_v47 = vsel %vm201_vm12, %v204_v46, %v195_v44 }
 0x4b9   : > { %v207_v48 = vmul.f32 %v349_v8, %v205_v47 }
 0x4bb   : > { %v209_v49 = vsel %vm208_vm13, %v205_v47, %v207_v48 }
 0x4bc   : > { %248 = vst [vmem:[%s219_s24] sm:$0xff] %v209_v49 }
 0x4bd PF: > { %s7_s8 = sadd.s32 1, %s372_s8   ;;  %s445_s6 = smov %s368_s7 }
 0x4be   : > { %p4_p5 = scmp.ge.s32.totalorder %s7_s8, 4   ;;  %s446_s7 = smov %s448_s10 }
 0x4c0   :  { %6 = sbr.rel (!%p4_p5) target bundleno = 2 (0x2), region = 125 }

// kernel: copula_forward.1
= control target key start
LH: loop header
LB: loop body
LE: loop exit
PB: predicated region body
PF: predicated region fallthrough
CT: control target
= control target key end

     0   :  { %s4900_s24 = smov 0   ;;  %s4902_s25 = smov 0   ;;  %s6242_s0 = inlined_call_operand.vmem [shape: bf16[8,96,16], index: 0, kind: input, shape index: {}]   ;;  %s6243_s1 = inlined_call_operand.vmem [shape: f32[192,64], index: 1, kind: input, shape index: {}]   ;;  %s6244_s2 = inlined_call_operand.vmem [shape: f32[96,32], index: 2, kind: input, shape index: {}]   ;;  %s6245_s3 = inlined_call_operand.vmem [shape: f32[192,1], index: 3, kind: input, shape index: {}]   ;;  %s6246_s4 = inlined_call_operand.vmem [shape: f32[96,1], index: 4, kind: input, shape index: {}]   ;;  %s6247_s5 = inlined_call_operand.vmem [shape: f32[128,32], index: 5, kind: input, shape index: {}]   ;;  %s6248_s6 = inlined_call_operand.vmem [shape: f32[128,1], index: 6, kind: input, shape index: {}]   ;;  %s6249_s7 = inlined_call_operand.vmem [shape: f32[128,16], index: 7, kind: output, shape index: {}]  }
   0x1   :  { %s4904_s26 = smov 0  }
   0x2 LB: > { %s26_s27 = sadd.s32 1, %s4851_s25  ;;  %p3294_p0 = scmp.ge.s32.totalorder %s4855_s26, 1  ;;  %s4855_s26 = sphi %s4904_s26, %s17_s26   ;;  %s4851_s25 = sphi %s4902_s25, %s6443_s25   ;;  %s4847_s24 = sphi %s4900_s24, %s6442_s24  }
   0x3   : > { %p27_p1 = scmp.ge.s32.totalorder %s26_s27, 2  ;;  %p256_p2 = scmp.lt.s32.totalorder %s4855_s26, 3 }
   0x5   : > { %s6445_s27 = smov (%p27_p1, %s26_s27), 0  ;;  %p257_p3 = pnand %p3294_p0, %p256_p2 }
   0x7   : > { %260 = sbr.rel (%p257_p3) target bundleno = 2469 (0x9a5), region = 48 }
   0xe   : > { %s3295_s28 = sshll.u32 %s4847_s24, 2  ;;  %p3297_p5 = scmp.ne.s32.totalorder %s4847_s24, 0 }
   0xf   : > { %p292_p4 = scmp.lt.s32.totalorder %s3295_s28, 7  ;;  %vm309_vm0 = vcmask (!%p3297_p5), 130048   ;;  %v4857_v0 = vmov (!%p3297_p5), 0.0  }
  0x10   : > { %308 = sbr.rel (%p3297_p5) target bundleno = 23 (0x17), region = 52  ;;  %310 = vst.msk [vmem:[#allocation2] sm:$0xff] (!%p3297_p5), %vm309_vm0, %v4857_v0  ;;  %311 = vst.msk [vmem:[#allocation2 + $0x8] sm:$0xff] (!%p3297_p5), %vm309_vm0, %v4857_v0 }
  0x11   : > { %s6447_s28 = smov (!%p292_p4, %s3295_s28), 7  ;;  %312 = vst.msk [vmem:[#allocation2 + $0x10] sm:$0xff] (!%p3297_p5), %vm309_vm0, %v4857_v0  ;;  %313 = vst.msk [vmem:[#allocation2 + $0x18] sm:$0xff] (!%p3297_p5), %vm309_vm0, %v4857_v0 }
  0x12   : > { %s4441_s29 = smul.u32 48, %s6447_s28  ;;  %314 = vst.msk [vmem:[#allocation2 + $0x20] sm:$0xff] (!%p3297_p5), %vm309_vm0, %v4857_v0  ;;  %315 = vst.msk [vmem:[#allocation2 + $0x28] sm:$0xff] (!%p3297_p5), %vm309_vm0, %v4857_v0 }
  0x13   : > { %316 = vst.msk [vmem:[#allocation2 + $0x30] sm:$0xff] (!%p3297_p5), %vm309_vm0, %v4857_v0  ;;  %317 = vst.msk [vmem:[#allocation2 + $0x38] sm:$0xff] (!%p3297_p5), %vm309_vm0, %v4857_v0 }
  0x14   : > { %s4924_s9 = scalar_lea.vmem %s6242_s0, %s4441_s29 }
  0x17 PF: > { %v4927_v1 = vld [vmem:[#allocation2] sm:$0xff]  ;;  %v4929_v2 = vld [vmem:[#allocation2 + $0x8] sm:$0xff]  ;;  %vm518_vm1 = vcmask 523264   ;;  %v4858_v6 = vmov 0   ;;  %v356_v15 = vld [vmem:[%s6245_s3 + $0x10] sm:$0xff]  ;;  %vm944_vm2 = vcmask 261120  }
  0x18   : > { %v4931_v3 = vld [vmem:[#allocation2 + $0x10] sm:$0xff]  ;;  %v4237_v4 = vpack.c.bf16 %v4929_v2, %v4927_v1  ;;  %v4935_v5 = vld [vmem:[#allocation2 + $0x18] sm:$0xff]  ;;  %4469 = vset.pattern.permute.xlu0 %v4858_v6  ;;  %4470 = vset.pattern.permute.xlu1 %v4858_v6  ;;  %v4946_v10 = vld [vmem:[%s6243_s1] sm:$0xff]  ;;  %vm2699_vm3 = vcmask 130048   ;;  %p3542_p6 = scmp.ne.s32.totalorder %s4847_s24, 1 }
  0x19   : > { %v4241_v7 = vpack.c.bf16 %v4935_v5, %v4931_v3  ;;  %v4939_v8 = vld [vmem:[#allocation2 + $0x20] sm:$0xff]  ;;  %v4941_v9 = vld [vmem:[#allocation2 + $0x28] sm:$0xff]  ;;  %3909 = vmatprep.mubr.msk.f32.mxu0 %vm518_vm1, %v4946_v10  ;;  %3987 = vmatprep.mubr.msk.f32.mxu1 %vm518_vm1, %v4946_v10  ;;  %v357_v17 = vld [vmem:[%s6245_s3 + $0x18] sm:$0xff] }
  0x1a   : > { %4238 = vmatprep.subr.bf16.mxu0 %v4237_v4  ;;  %v4245_v11 = vpack.c.bf16 %v4941_v9, %v4939_v8  ;;  %v354_v12 = vld [vmem:[%s6245_s3] sm:$0xff]  ;;  %v4957_v13 = vld [vmem:[#allocation2 + $0x30] sm:$0xff]  ;;  %v4959_v14 = vld [vmem:[#allocation2 + $0x38] sm:$0xff]  ;;  %410 = vperm.xlu1 %4470, %v356_v15  }
  0x1b   : > { %4240 = vmatpush3.bf16.msra.mxu0 %v4237_v4  ;;  %400 = vperm.xlu0 %4469, %v354_v12   ;;  %v355_v16 = vld [vmem:[%s6245_s3 + $0x8] sm:$0xff]  ;;  %v4249_v18 = vpack.c.bf16 %v4959_v14, %v4957_v13  ;;  %v358_v19 = vld [vmem:[%s6245_s3 + $0x20] sm:$0xff]  ;;  %v360_v21 = vld [vmem:[%s6245_s3 + $0x30] sm:$0xff] }
  0x1c   : > { %4242 = vmatprep.subr.bf16.mxu0 %v4241_v7  ;;  %v359_v20 = vld [vmem:[%s6245_s3 + $0x28] sm:$0xff]  ;;  %v361_v23 = vld [vmem:[%s6245_s3 + $0x38] sm:$0xff]  ;;  %v4992_v24 = vld [vmem:[%s6243_s1 + $0x10] sm:$0xff] }
  0x1d   : > { %v4984_v22 = vld [vmem:[%s6243_s1 + $0x8] sm:$0xff]  ;;  %v362_v25 = vld [vmem:[%s6245_s3 + $0x40] sm:$0xff]  ;;  %v5004_v26 = vld [vmem:[%s6243_s1 + $0x18] sm:$0xff] }
  0x1e   : > { %415 = vperm.xlu1 %4470, %v357_v17   ;;  %v363_v27 = vld [vmem:[%s6245_s3 + $0x48] sm:$0xff]  ;;  %v5012_v28 = vld [vmem:[%s6243_s1 + $0x20] sm:$0xff]  ;;  %v364_v29 = vld [vmem:[%s6245_s3 + $0x50] sm:$0xff] }
  0x1f   : > { %4244 = vmatpush3.bf16.msra.mxu0 %v4241_v7  ;;  %405 = vperm.xlu0 %4469, %v355_v16   ;;  %v5024_v30 = vld [vmem:[%s6243_s1 + $0x28] sm:$0xff]  ;;  %v365_v31 = vld [vmem:[%s6245_s3 + $0x58] sm:$0xff]  ;;  %v5032_v32 = vld [vmem:[%s6243_s1 + $0x30] sm:$0xff] }
  0x20   : > { %4246 = vmatprep.subr.bf16.mxu0 %v4245_v11  ;;  %v366_v33 = vld [vmem:[%s6245_s3 + $0x60] sm:$0xff]  ;;  %v5044_v34 = vld [vmem:[%s6243_s1 + $0x38] sm:$0xff]  ;;  %v367_v35 = vld [vmem:[%s6245_s3 + $0x68] sm:$0xff] }
  0x21   : > { %v5052_v36 = vld [vmem:[%s6243_s1 + $0x40] sm:$0xff]  ;;  %v5064_v38 = vld [vmem:[%s6243_s1 + $0x48] sm:$0xff]  ;;  %v5072_v40 = vld [vmem:[%s6243_s1 + $0x50] sm:$0xff] }
  0x22   : > { %425 = vperm.xlu1 %4470, %v359_v20   ;;  %v378_v37 = vld [vmem:[%s6246_s4] sm:$0xff]  ;;  %v379_v39 = vld [vmem:[%s6246_s4 + $0x8] sm:$0xff]  ;;  %v368_v41 = vld [vmem:[%s6245_s3 + $0x70] sm:$0xff] }
  0x23   : > { %4248 = vmatpush3.bf16.msra.mxu0 %v4245_v11  ;;  %420 = vperm.xlu0 %4469, %v358_v19   ;;  %v5084_v42 = vld [vmem:[%s6243_s1 + $0x58] sm:$0xff]  ;;  %v5092_v44 = vld [vmem:[%s6243_s1 + $0x60] sm:$0xff]  ;;  %v380_v45 = vld [vmem:[%s6246_s4 + $0x10] sm:$0xff] }
  0x24   : > { %4250 = vmatprep.subr.bf16.mxu0 %v4249_v18  ;;  %v369_v43 = vld [vmem:[%s6245_s3 + $0x78] sm:$0xff]  ;;  %v5104_v46 = vld [vmem:[%s6243_s1 + $0x68] sm:$0xff]  ;;  %v5112_v48 = vld [vmem:[%s6243_s1 + $0x70] sm:$0xff] }
  0x25   : > { %v381_v47 = vld [vmem:[%s6246_s4 + $0x18] sm:$0xff]  ;;  %v370_v49 = vld [vmem:[%s6245_s3 + $0x80] sm:$0xff]  ;;  %v371_v51 = vld [vmem:[%s6245_s3 + $0x88] sm:$0xff] }
  0x26   : > { %435 = vperm.xlu1 %4470, %v361_v23   ;;  %v5124_v50 = vld [vmem:[%s6243_s1 + $0x78] sm:$0xff]  ;;  %v5132_v52 = vld [vmem:[%s6243_s1 + $0x80] sm:$0xff]  ;;  %v5144_v54 = vld [vmem:[%s6243_s1 + $0x88] sm:$0xff] }
  0x27   : > { %4252 = vmatpush3.bf16.msra.mxu0 %v4249_v18  ;;  %430 = vperm.xlu0 %4469, %v360_v21   ;;  %v382_v53 = vld [vmem:[%s6246_s4 + $0x20] sm:$0xff]  ;;  %v383_v55 = vld [vmem:[%s6246_s4 + $0x28] sm:$0xff]  ;;  %v5152_v56 = vld [vmem:[%s6243_s1 + $0x90] sm:$0xff] }
  0x28   : > { %v372_v57 = vld [vmem:[%s6245_s3 + $0x90] sm:$0xff]  ;;  %v5164_v58 = vld [vmem:[%s6243_s1 + $0x98] sm:$0xff]  ;;  %v5172_v60 = vld [vmem:[%s6243_s1 + $0xa0] sm:$0xff] }
  0x29   : > { %v373_v59 = vld [vmem:[%s6245_s3 + $0x98] sm:$0xff]  ;;  %v384_v61 = vld [vmem:[%s6246_s4 + $0x30] sm:$0xff]  ;;  %v5184_v62 = vld [vmem:[%s6243_s1 + $0xa8] sm:$0xff] }
  0x2a   : > { %3910 = vmatmul.mubr.msk.f32.vlgmr.msra.gmra.mrb[0].mxu0 %vm518_vm1, %v4984_v22  ;;  %445 = vperm.xlu1 %4470, %v363_v27   ;;  %v385_v63 = vld [vmem:[%s6246_s4 + $0x38] sm:$0xff]  ;;  %v5192_v0 = vld [vmem:[%s6243_s1 + $0xb0] sm:$0xff]  ;;  %v374_v4 = vld [vmem:[%s6245_s3 + $0xa0] sm:$0xff] }
  0x2b   : > { %3912 = vmatprep.mubr.msk.f32.mxu0 %vm518_vm1, %v4992_v24  ;;  %440 = vperm.xlu0 %4469, %v362_v25   ;;  %v5204_v6 = vld [vmem:[%s6243_s1 + $0xb8] sm:$0xff]  ;;  %v375_v7 = vld [vmem:[%s6245_s3 + $0xa8] sm:$0xff]  ;;  %v386_v11 = vld [vmem:[%s6246_s4 + $0x40] sm:$0xff] }
  0x2c   : > { %v387_v12 = vld [vmem:[%s6246_s4 + $0x48] sm:$0xff]  ;;  %v376_v15 = vld [vmem:[%s6245_s3 + $0xb0] sm:$0xff]  ;;  %v377_v16 = vld [vmem:[%s6245_s3 + $0xb8] sm:$0xff] }
  0x2d   : > { %v388_v17 = vld [vmem:[%s6246_s4 + $0x50] sm:$0xff]  ;;  %v389_v18 = vld [vmem:[%s6246_s4 + $0x58] sm:$0xff]  ;;  %v5232_v19 = vld [vmem:[%s6244_s2] sm:$0xff] }
  0x2e   : > { %3913 = vmatmul.mubr.msk.f32.gmra.mrb[2].mxu0 %vm518_vm1, %v5004_v26  ;;  %455 = vperm.xlu1 %4470, %v365_v31   ;;  %v3563_v23 = vld [vmem:[%s4924_s9] sm:$0xff]  }
  0x2f   : > { %3915 = vmatprep.mubr.msk.f32.mxu0 %vm518_vm1, %v5012_v28  ;;  %450 = vperm.xlu0 %4469, %v364_v29   ;;  %v3565_v27 = vunpack.c.h.bf16 %v3563_v23 }
  0x32   : > { %3916 = vmatmul.mubr.msk.f32.gmra.mrb[4].mxu0 %vm518_vm1, %v5024_v30  ;;  %465 = vperm.xlu1 %4470, %v367_v35   ;;  %v3658_v35 = vld [vmem:[%s4924_s9 + $0x8] sm:$0xff]  }
  0x33   : > { %3918 = vmatprep.mubr.msk.f32.mxu0 %vm518_vm1, %v5032_v32  ;;  %460 = vperm.xlu0 %4469, %v366_v33   ;;  %v3564_v33 = vunpack.c.l.bf16 %v3563_v23 }
  0x36   : > { %3919 = vmatmul.mubr.msk.f32.gmra.mrb[6].mxu0 %vm518_vm1, %v5044_v34  ;;  %891 = vperm.xlu1 %4470, %v379_v39  }
  0x37   : > { %3921 = vmatprep.mubr.msk.f32.mxu0 %vm518_vm1, %v5052_v36  ;;  %886 = vperm.xlu0 %4469, %v378_v37  }
  0x3a   : > { %3922 = vmatmul.mubr.msk.f32.gmra.mrb[8].mxu0 %vm518_vm1, %v5064_v38  ;;  %475 = vperm.xlu1 %4470, %v369_v43  }
  0x3b   : > { %3924 = vmatprep.mubr.msk.f32.mxu0 %vm518_vm1, %v5072_v40  ;;  %470 = vperm.xlu0 %4469, %v368_v41  }
  0x3e   : > { %3925 = vmatmul.mubr.msk.f32.gmra.mrb[10].mxu0 %vm518_vm1, %v5084_v42  ;;  %901 = vperm.xlu1 %4470, %v381_v47  }
  0x3f   : > { %3927 = vmatprep.mubr.msk.f32.mxu0 %vm518_vm1, %v5092_v44  ;;  %896 = vperm.xlu0 %4469, %v380_v45   ;;  %v3569_v45 = vunpack.c.h.bf16 %v3658_v35 }
  0x42   : > { %3928 = vmatmul.mubr.msk.f32.gmra.mrb[12].mxu0 %vm518_vm1, %v5104_v46  ;;  %485 = vperm.xlu1 %4470, %v371_v51   ;;  %v3568_v51 = vunpack.c.l.bf16 %v3658_v35 }
  0x43   : > { %3930 = vmatprep.mubr.msk.f32.mxu0 %vm518_vm1, %v5112_v48  ;;  %480 = vperm.xlu0 %4469, %v370_v49  }
  0x46   : > { %3931 = vmatmul.mubr.msk.f32.gmra.mrb[14].mxu0 %vm518_vm1, %v5124_v50  ;;  %911 = vperm.xlu1 %4470, %v383_v55  }
  0x47   : > { %3933 = vmatprep.mubr.msk.f32.mxu0 %vm518_vm1, %v5132_v52  ;;  %906 = vperm.xlu0 %4469, %v382_v53   ;;  %v3659_v53 = vld [vmem:[%s4924_s9 + $0x10] sm:$0xff]  }
  0x4a   : > { %3934 = vmatmul.mubr.msk.f32.gmra.mrb[16].mxu0 %vm518_vm1, %v5144_v54  ;;  %495 = vperm.xlu1 %4470, %v373_v59  }
  0x4b   : > { %3936 = vmatprep.mubr.msk.f32.mxu0 %vm518_vm1, %v5152_v56  ;;  %490 = vperm.xlu0 %4469, %v372_v57  }
  0x4e   : > { %3937 = vmatmul.mubr.msk.f32.gmra.mrb[18].mxu0 %vm518_vm1, %v5164_v58  ;;  %921 = vperm.xlu1 %4470, %v385_v63  }
  0x4f   : > { %3939 = vmatprep.mubr.msk.f32.mxu0 %vm518_vm1, %v5172_v60  ;;  %916 = vperm.xlu0 %4469, %v384_v61  }
  0x52   : > { %3940 = vmatmul.mubr.msk.f32.gmra.mrb[20].mxu0 %vm518_vm1, %v5184_v62  ;;  %505 = vperm.xlu1 %4470, %v375_v7  }
  0x53   : > { %3942 = vmatprep.mubr.msk.f32.mxu0 %vm518_vm1, %v5192_v0  ;;  %500 = vperm.xlu0 %4469, %v374_v4  }
  0x56   : > { %3943 = vmatmul.mubr.msk.f32.gmra.mrb[22].mxu0 %vm518_vm1, %v5204_v6  ;;  %931 = vperm.xlu1 %4470, %v387_v12   ;;  %v3573_v12 = vunpack.c.h.bf16 %v3659_v53 }
  0x57   : > { %926 = vperm.xlu0 %4469, %v386_v11   ;;  %3953 = vmatprep.mubr.msk.f32.mxu0 %vm944_vm2, %v5232_v19 }
  0x5a   : > { %515 = vperm.xlu1 %4470, %v377_v16  }
  0x5b   : > { %510 = vperm.xlu0 %4469, %v376_v15  }
  0x5e   : > { %941 = vperm.xlu1 %4470, %v389_v18   ;;  %v3660_v18 = vld [vmem:[%s4924_s9 + $0x18] sm:$0xff]  }
  0x5f   : > { %936 = vperm.xlu0 %4469, %v388_v17   ;;  %v3572_v17 = vunpack.c.l.bf16 %v3659_v53 }
  0x99   : > { %v5238_v21 = vpop.permute.xlu1 %410 }
  0x9a   : > { %v5236_v20 = vpop.permute.xlu0 %400 }
  0x9b   : > { %6328 = vst [vmem:[#allocation3_spill] sm:$0xff] %v5236_v20 }
  0x9d   : > { %v5243_v29 = vpop.permute.xlu1 %415 }
  0x9e   : > { %v5241_v25 = vpop.permute.xlu0 %405 }
  0x9f   : > { %6329 = vst [vmem:[#allocation4_spill] sm:$0xff] %v5241_v25 }
  0xa1   : > { %v5250_v61 = vpop.permute.xlu1 %425 }
  0xa2   : > { %6330 = vst [vmem:[#allocation5_spill] sm:$0xff] %v5250_v61  ;;  %v5253_v7 = vpop.permute.xlu0 %420 }
  0xa3   : > { %6331 = vst [vmem:[#allocation6_spill] sm:$0xff] %v5253_v7 }
  0xfd   : > { %v3911_v31 = vpop.f32.mrb[0].mxu0 }
  0xfe   : > { %v663_v37 = vadd.f32 %v3911_v31, %v5241_v25  ;;  %v657_v39 = vpop.f32.mrb[1].mxu0 }
  0xff   : > { %v658_v41 = vadd.f32 %v657_v39, %v5236_v20  ;;  %v3577_v39 = vunpack.c.h.bf16 %v3660_v18 }
 0x100   : > { %v801_v43 = vadd.f32 %v3565_v27, %v663_v37 }
 0x101   : > { %v800_v47 = vadd.f32 %v3564_v33, %v658_v41  ;;  %v3914_v49 = vpop.f32.mrb[2].mxu0  ;;  %v5258_v41 = vpop.permute.xlu1 %435 }
 0x102   : > { %v3323_v55 = vmul.f32 -1.442695, %v801_v43  ;;  %v673_v57 = vadd.f32 %v3914_v49, %v5243_v29  ;;  %v667_v59 = vpop.f32.mrb[3].mxu0  ;;  %6332 = vst [vmem:[#allocation7_spill] sm:$0xff] %v5258_v41  ;;  %v5260_v49 = vpop.permute.xlu0 %430 }
 0x103   : > { %v3322_v63 = vmul.f32 -1.442695, %v800_v47  ;;  %v668_v4 = vadd.f32 %v667_v59, %v5238_v21  ;;  %v3576_v47 = vunpack.c.l.bf16 %v3660_v18  ;;  %6333 = vst [vmem:[#allocation8_spill] sm:$0xff] %v5260_v49 }
 0x104   : > { %4471 = vpow2.f32 %v3323_v55  ;;  %v803_v11 = vadd.f32 %v3569_v45, %v673_v57 }
 0x105   : > { %4473 = vpow2.f32 %v3322_v63  ;;  %v802_v15 = vadd.f32 %v3568_v51, %v668_v4  ;;  %v3917_v16 = vpop.f32.mrb[4].mxu0 }
 0x106   : > { %v3325_v23 = vmul.f32 -1.442695, %v803_v11  ;;  %v683_v27 = vadd.f32 %v3917_v16, %v5250_v61  ;;  %v677_v31 = vpop.f32.mrb[5].mxu0 }
 0x107   : > { %v3324_v33 = vmul.f32 -1.442695, %v802_v15  ;;  %v678_v35 = vadd.f32 %v677_v31, %v5253_v7 }
 0x108   : > { %4475 = vpow2.f32 %v3325_v23  ;;  %v829_v37 = vadd.f32 %v3573_v12, %v683_v27 }
 0x109   : > { %4477 = vpow2.f32 %v3324_v33  ;;  %v828_v43 = vadd.f32 %v3572_v17, %v678_v35  ;;  %v3920_v45 = vpop.f32.mrb[6].mxu0 }
 0x10a   : > { %v3327_v51 = vmul.f32 -1.442695, %v829_v37  ;;  %v693_v53 = vadd.f32 %v3920_v45, %v5258_v41  ;;  %v687_v55 = vpop.f32.mrb[7].mxu0 }
 0x10b   : > { %v3326_v57 = vmul.f32 -1.442695, %v828_v43  ;;  %v688_v59 = vadd.f32 %v687_v55, %v5260_v49  ;;  %v5267_v55 = vpop.permute.xlu0 %440 }
 0x10c   : > { %4479 = vpow2.f32 %v3327_v51  ;;  %v831_v63 = vadd.f32 %v3577_v39, %v693_v53  ;;  %v5264_v51 = vpop.permute.xlu1 %445  ;;  %v3661_v53 = vld [vmem:[%s4924_s9 + $0x20] sm:$0xff]   ;;  %6335 = vst [vmem:[#allocation10_spill] sm:$0xff] %v5267_v55 }
 0x10d   : > { %4481 = vpow2.f32 %v3326_v57  ;;  %v830_v4 = vadd.f32 %v3576_v47, %v688_v59  ;;  %v3923_v11 = vpop.f32.mrb[8].mxu0  ;;  %6334 = vst [vmem:[#allocation9_spill] sm:$0xff] %v5264_v51 }
 0x10e   : > { %v4472_v12 = vpop.eup %4471  ;;  %v3329_v15 = vmul.f32 -1.442695, %v831_v63  ;;  %v697_v16 = vpop.f32.mrb[9].mxu0 }
 0x10f   : > { %v4474_v17 = vpop.eup %4473  ;;  %v817_v23 = vadd.f32 1.0, %v4472_v12  ;;  %v3328_v18 = vmul.f32 -1.442695, %v830_v4  ;;  %v703_v4 = vadd.f32 %v3923_v11, %v5264_v51  ;;  %v3581_v12 = vunpack.c.h.bf16 %v3661_v53 }
 0x110   : > { %v816_v27 = vadd.f32 1.0, %v4474_v17  ;;  %4483 = vpow2.f32 %v3329_v15  ;;  %v3662_v15 = vld [vmem:[%s4924_s9 + $0x28] sm:$0xff]  }
 0x111   : > { %4485 = vrcp.f32 %v817_v23  ;;  %v3926_v31 = vpop.f32.mrb[10].mxu0  ;;  %v3585_v41 = vunpack.c.h.bf16 %v3662_v15 }
 0x112   : > { %v4476_v33 = vpop.eup %4475  ;;  %4487 = vrcp.f32 %v816_v27  ;;  %v707_v35 = vpop.f32.mrb[11].mxu0  ;;  %v3580_v27 = vunpack.c.l.bf16 %v3661_v53  ;;  %v3584_v53 = vunpack.c.l.bf16 %v3662_v15 }
 0x113   : > { %v4478_v37 = vpop.eup %4477  ;;  %v819_v39 = vadd.f32 1.0, %v4476_v33  ;;  %4489 = vpow2.f32 %v3328_v18  ;;  %v698_v18 = vadd.f32 %v697_v16, %v5267_v55 }
 0x114   : > { %v818_v43 = vadd.f32 1.0, %v4478_v37 }
 0x115   : > { %4491 = vrcp.f32 %v819_v39 }
 0x116   : > { %v4480_v45 = vpop.eup %4479  ;;  %4493 = vrcp.f32 %v818_v43  ;;  %v5272_v43 = vpop.permute.xlu1 %455 }
 0x117   : > { %v4482_v47 = vpop.eup %4481  ;;  %v845_v57 = vadd.f32 1.0, %v4480_v45  ;;  %6336 = vst [vmem:[#allocation11_spill] sm:$0xff] %v5272_v43  ;;  %v5274_v45 = vpop.permute.xlu0 %450  ;;  %v713_v51 = vadd.f32 %v3926_v31, %v5272_v43 }
 0x118   : > { %v844_v63 = vadd.f32 1.0, %v4482_v47  ;;  %6337 = vst [vmem:[#allocation12_spill] sm:$0xff] %v5274_v45  ;;  %v708_v16 = vadd.f32 %v707_v35, %v5274_v45 }
 0x119   : > { %4495 = vrcp.f32 %v845_v57 }
 0x11a   : > { %v4484_v59 = vpop.eup %4483  ;;  %4497 = vrcp.f32 %v844_v63 }
 0x11b   : > { %v4486_v17 = vpop.eup %4485  ;;  %v847_v23 = vadd.f32 1.0, %v4484_v59 }
 0x11c   : > { %v4488_v33 = vpop.eup %4487  ;;  %v857_v37 = vmul.f32 %v4486_v17, %v703_v4 }
 0x11d   : > { %v4490_v39 = vpop.eup %4489  ;;  %v856_v49 = vmul.f32 %v4488_v33, %v698_v18  ;;  %4499 = vrcp.f32 %v847_v23 }
 0x11e   : > { %v846_v47 = vadd.f32 1.0, %v4490_v39  ;;  %v861_v11 = vadd.f32 %v3581_v12, %v857_v37 }
 0x11f   : > { %v4492_v7 = vpop.eup %4491  ;;  %v860_v59 = vadd.f32 %v3580_v27, %v856_v49 }
 0x120   : > { %v4494_v4 = vpop.eup %4493  ;;  %4501 = vrcp.f32 %v846_v47  ;;  %v859_v17 = vmul.f32 %v4492_v7, %v713_v51 }
 0x121   : > { %4503 = vtanh.f32 %v861_v11  ;;  %v858_v57 = vmul.f32 %v4494_v4, %v708_v16 }
 0x122   : > { %4505 = vtanh.f32 %v860_v59  ;;  %v863_v18 = vadd.f32 %v3585_v41, %v859_v17 }
 0x123   : > { %v862_v33 = vadd.f32 %v3584_v53, %v858_v57  ;;  %v4496_v31 = vpop.eup %4495 }
 0x124   : > { %4507 = vtanh.f32 %v863_v18  ;;  %v4498_v23 = vpop.eup %4497  ;;  %v869_v7 = vsub.f32 1.0, %v4496_v31  ;;  %v877_v47 = vmul.f32 %v4496_v31, %v4929_v2 }
 0x125   : > { %4509 = vtanh.f32 %v862_v33  ;;  %v5278_v63 = vpop.f32.mrb[20].mxu0  ;;  %v868_v37 = vsub.f32 1.0, %v4498_v23  ;;  %v876_v59 = vmul.f32 %v4498_v23, %v4927_v1 }
 0x126   : > { %v5280_v12 = vpop.f32.mrb[21].mxu0 }
 0x127   : > { %v4500_v49 = vpop.eup %4499 }
 0x128   : > { %v871_v16 = vsub.f32 1.0, %v4500_v49  ;;  %v879_v45 = vmul.f32 %v4500_v49, %v4935_v5  ;;  %v5310_v5 = vld [vmem:[%s6244_s2 + $0x10] sm:$0xff] }
 0x129   : > { %v5282_v27 = vpop.f32.mrb[22].mxu0  ;;  %6342 = vst [vmem:[#allocation17_spill] sm:$0xff] %v5310_v5  ;;  %v5338_v49 = vld [vmem:[%s6244_s2 + $0x30] sm:$0xff] }
 0x12a   : > { %v4502_v35 = vpop.eup %4501  ;;  %v5284_v15 = vpop.f32.mrb[23].mxu0  ;;  %6346 = vst [vmem:[#allocation21_spill] sm:$0xff] %v5338_v49 }
 0x12b   : > { %v4504_v51 = vpop.eup %4503  ;;  %v870_v17 = vsub.f32 1.0, %v4502_v35  ;;  %v878_v55 = vmul.f32 %v4502_v35, %v4931_v3  ;;  %v5305_v3 = vld [vmem:[%s6244_s2 + $0x8] sm:$0xff]  ;;  %v5347_v35 = vld [vmem:[%s6244_s2 + $0x38] sm:$0xff] }
 0x12c   : > { %v4506_v39 = vpop.eup %4505  ;;  %v873_v41 = vmul.f32 %v4504_v51, %v869_v7  ;;  %6341 = vst [vmem:[#allocation16_spill] sm:$0xff] %v5305_v3  ;;  %6347 = vst [vmem:[#allocation22_spill] sm:$0xff] %v5347_v35  ;;  %v5352_v7 = vld [vmem:[%s6244_s2 + $0x40] sm:$0xff]  ;;  %v5361_v51 = vld [vmem:[%s6244_s2 + $0x48] sm:$0xff] }
 0x12d   : > { %v872_v11 = vmul.f32 %v4506_v39, %v868_v37  ;;  %6348 = vst [vmem:[#allocation23_spill] sm:$0xff] %v5352_v7  ;;  %6349 = vst [vmem:[#allocation24_spill] sm:$0xff] %v5361_v51  ;;  %v5366_v37 = vld [vmem:[%s6244_s2 + $0x50] sm:$0xff]  ;;  %v5375_v39 = vld [vmem:[%s6244_s2 + $0x58] sm:$0xff] }
 0x12e   : > { %v4508_v53 = vpop.eup %4507  ;;  %v5288_v4 = vadd.f32 %v877_v47, %v873_v41  ;;  %6350 = vst [vmem:[#allocation25_spill] sm:$0xff] %v5366_v37  ;;  %6351 = vst [vmem:[#allocation26_spill] sm:$0xff] %v5375_v39  ;;  %v466_v41 = vpop.permute.xlu1 %465 }
 0x12f   : > { %v4510_v57 = vpop.eup %4509  ;;  %v5290_v18 = vadd.f32 %v876_v59, %v872_v11  ;;  %v875_v33 = vmul.f32 %v4508_v53, %v871_v16  ;;  %v461_v47 = vpop.permute.xlu0 %460 }
 0x130   : > { %v874_v43 = vmul.f32 %v4510_v57, %v870_v17 }
 0x131   : > { %6338 = vst [vmem:[#allocation13_spill] sm:$0xff] %v5290_v18  ;;  %v4253_v2 = vpack.c.bf16 %v5288_v4, %v5290_v18  ;;  %v5296_v31 = vadd.f32 %v879_v45, %v875_v33  ;;  %v5333_v45 = vld [vmem:[%s6244_s2 + $0x28] sm:$0xff] }
 0x132   : > { %v5298_v1 = vadd.f32 %v878_v55, %v874_v43  ;;  %v5319_v55 = vld [vmem:[%s6244_s2 + $0x18] sm:$0xff]  ;;  %v5324_v43 = vld [vmem:[%s6244_s2 + $0x20] sm:$0xff]  ;;  %6345 = vst [vmem:[#allocation20_spill] sm:$0xff] %v5333_v45  ;;  %v892_v11 = vpop.permute.xlu1 %891 }
 0x133   : > { %6339 = vst [vmem:[#allocation14_spill] sm:$0xff] %v5296_v31  ;;  %4254 = vmatprep.subr.bf16.mxu0 %v4253_v2  ;;  %4262 = vmatprep.subr.bf16.mxu1 %v4253_v2  ;;  %6343 = vst [vmem:[#allocation18_spill] sm:$0xff] %v5319_v55  ;;  %v887_v59 = vpop.permute.xlu0 %886 }
 0x134   : > { %6340 = vst [vmem:[#allocation15_spill] sm:$0xff] %v5298_v1  ;;  %4256 = vmatpush3.bf16.msra.mxu0 %v4253_v2  ;;  %4264 = vmatpush3.bf16.msra.mxu1 %v4253_v2  ;;  %v4257_v23 = vpack.c.bf16 %v5296_v31, %v5298_v1  ;;  %6344 = vst [vmem:[#allocation19_spill] sm:$0xff] %v5324_v43 }
 0x136   : > { %4258 = vmatprep.subr.bf16.mxu0 %v4257_v23  ;;  %4266 = vmatprep.subr.bf16.mxu1 %v4257_v23  ;;  %v476_v16 = vpop.permute.xlu1 %475 }
 0x137   : > { %v471_v53 = vpop.permute.xlu0 %470 }
 0x138   : > { %4260 = vmatpush3.bf16.msra.mxu0 %v4257_v23  ;;  %4268 = vmatpush3.bf16.msra.mxu1 %v4257_v23 }
 0x13a   : > { %v902_v17 = vpop.permute.xlu1 %901 }
 0x13b   : > { %3954 = vmatmul.mubr.msk.f32.vlgmr.msra.gmra.mrb[12].mxu0 %vm944_vm2, %v5305_v3  ;;  %v897_v57 = vpop.permute.xlu0 %896 }
 0x13c   : > { %3956 = vmatprep.mubr.msk.f32.mxu0 %vm944_vm2, %v5310_v5  ;;  %v5389_v3 = vadd.f32 %v897_v57, %v471_v53 }
 0x13e   : > { %v486_v33 = vpop.permute.xlu1 %485  ;;  %6355 = vst [vmem:[#allocation30_spill] sm:$0xff] %v5389_v3 }
 0x13f   : > { %3957 = vmatmul.mubr.msk.f32.gmra.mrb[14].mxu0 %vm944_vm2, %v5319_v55  ;;  %v481_v2 = vpop.permute.xlu0 %480 }
 0x140   : > { %3959 = vmatprep.mubr.msk.f32.mxu0 %vm944_vm2, %v5324_v43  ;;  %v5387_v43 = vadd.f32 %v902_v17, %v476_v16 }
 0x142   : > { %v912_v23 = vpop.permute.xlu1 %911  ;;  %6354 = vst [vmem:[#allocation29_spill] sm:$0xff] %v5387_v43 }
 0x143   : > { %3960 = vmatmul.mubr.msk.f32.gmra.mrb[16].mxu0 %vm944_vm2, %v5333_v45 }
 0x144   : > { %3962 = vmatprep.mubr.msk.f32.mxu0 %vm944_vm2, %v5338_v49 }
 0x146   : > { %v496_v49 = vpop.permute.xlu1 %495 }
 0x147   : > { %3963 = vmatmul.mubr.msk.f32.gmra.mrb[18].mxu0 %vm944_vm2, %v5347_v35 }
 0x148   : > { %3965 = vmatprep.mubr.msk.f32.mxu0 %vm944_vm2, %v5352_v7  ;;  %v5383_v7 = vadd.f32 %v887_v59, %v461_v47 }
 0x14a   : > { %6353 = vst [vmem:[#allocation28_spill] sm:$0xff] %v5383_v7  ;;  %v922_v16 = vpop.permute.xlu1 %921 }
 0x14b   : > { %3966 = vmatmul.mubr.msk.f32.gmra.mrb[24].mxu0 %vm944_vm2, %v5361_v51  ;;  %v5381_v51 = vadd.f32 %v892_v11, %v466_v41 }
 0x14c   : > { %3968 = vmatprep.mubr.msk.f32.mxu0 %vm944_vm2, %v5366_v37  ;;  %v907_v37 = vpop.permute.xlu0 %906 }
 0x14d   : > { %6352 = vst [vmem:[#allocation27_spill] sm:$0xff] %v5381_v51 }
 0x14f   : > { %3969 = vmatmul.mubr.msk.f32.gmra.mrb[26].mxu0 %vm944_vm2, %v5375_v39 }
 0x150   : > { %4065 = vmatprep.mubr.msk.f32.mxu0 %vm518_vm1, %v4946_v10  ;;  %v491_v55 = vpop.permute.xlu0 %490 }
 0x20e   : > { %v3955_v39 = vpop.f32.mrb[12].mxu0 }
 0x20f   : > { %v4342_v35 = vadd.f32 %v5381_v51, %v3955_v39  ;;  %v1047_v10 = vpop.f32.mrb[13].mxu0  ;;  %v5393_v39 = vadd.f32 %v912_v23, %v486_v33  ;;  %v5395_v51 = vadd.f32 %v907_v37, %v481_v2 }
 0x210   : > { %v4344_v45 = vadd.f32 %v5383_v7, %v1047_v10 }
 0x211   : > { %v3343_v5 = vmul.f32 -1.442695, %v4342_v35  ;;  %6356 = vst [vmem:[#allocation31_spill] sm:$0xff] %v5393_v39  ;;  %6357 = vst [vmem:[#allocation32_spill] sm:$0xff] %v5395_v51  ;;  %v917_v35 = vpop.permute.xlu0 %916 }
 0x212   : > { %v3342_v1 = vmul.f32 -1.442695, %v4344_v45  ;;  %v3958_v31 = vpop.f32.mrb[14].mxu0  ;;  %v5401_v57 = vadd.f32 %v917_v35, %v491_v55 }
 0x213   : > { %4511 = vpow2.f32 %v3343_v5  ;;  %v4346_v41 = vadd.f32 %v5387_v43, %v3958_v31  ;;  %v1057_v47 = vpop.f32.mrb[15].mxu0  ;;  %v5399_v5 = vadd.f32 %v922_v16, %v496_v49 }
 0x214   : > { %4513 = vpow2.f32 %v3342_v1  ;;  %v4348_v11 = vadd.f32 %v5389_v3, %v1057_v47  ;;  %6359 = vst [vmem:[#allocation34_spill] sm:$0xff] %v5401_v57 }
 0x215   : > { %v3345_v59 = vmul.f32 -1.442695, %v4346_v41  ;;  %6358 = vst [vmem:[#allocation33_spill] sm:$0xff] %v5399_v5  ;;  %v5404_v41 = vpop.permute.xlu1 %505 }
 0x216   : > { %v3344_v17 = vmul.f32 -1.442695, %v4348_v11  ;;  %v3961_v10 = vpop.f32.mrb[16].mxu0  ;;  %6360 = vst [vmem:[#allocation35_spill] sm:$0xff] %v5404_v41 }
 0x217   : > { %4515 = vpow2.f32 %v3345_v59  ;;  %v4350_v45 = vadd.f32 %v5393_v39, %v3961_v10  ;;  %v1067_v53 = vpop.f32.mrb[17].mxu0  ;;  %v5407_v59 = vpop.permute.xlu0 %500 }
 0x218   : > { %4517 = vpow2.f32 %v3344_v17  ;;  %v4352_v31 = vadd.f32 %v5395_v51, %v1067_v53  ;;  %6361 = vst [vmem:[#allocation36_spill] sm:$0xff] %v5407_v59  ;;  %v758_v51 = vadd.f32 %v5280_v12, %v5407_v59 }
 0x219   : > { %v3347_v1 = vmul.f32 -1.442695, %v4350_v45 }
 0x21a   : > { %v3346_v33 = vmul.f32 -1.442695, %v4352_v31  ;;  %v3964_v23 = vpop.f32.mrb[18].mxu0 }
 0x21b   : > { %4519 = vpow2.f32 %v3347_v1  ;;  %v4354_v37 = vadd.f32 %v5399_v5, %v3964_v23  ;;  %v1077_v2 = vpop.f32.mrb[19].mxu0  ;;  %v5409_v1 = vpop.permute.xlu1 %931 }
 0x21c   : > { %4521 = vpow2.f32 %v3346_v33  ;;  %v4356_v47 = vadd.f32 %v5401_v57, %v1077_v2  ;;  %v5411_v2 = vpop.permute.xlu0 %926 }
 0x21d   : > { %v4512_v11 = vpop.eup %4511  ;;  %v3349_v17 = vmul.f32 -1.442695, %v4354_v37 }
 0x21e   : > { %v4514_v49 = vpop.eup %4513  ;;  %v1123_v16 = vadd.f32 1.0, %v4512_v11  ;;  %v3348_v10 = vmul.f32 -1.442695, %v4356_v47  ;;  %v3967_v55 = vpop.f32.mrb[24].mxu0 }
 0x21f   : > { %v1122_v35 = vadd.f32 1.0, %v4514_v49  ;;  %4523 = vpow2.f32 %v3349_v17  ;;  %v1087_v45 = vpop.f32.mrb[25].mxu0  ;;  %v5413_v49 = vpop.permute.xlu1 %515 }
 0x220   : > { %4525 = vrcp.f32 %v1123_v16  ;;  %v5415_v5 = vpop.permute.xlu0 %510  ;;  %v773_v7 = vadd.f32 %v5282_v27, %v5413_v49 }
 0x221   : > { %v4516_v53 = vpop.eup %4515  ;;  %4527 = vrcp.f32 %v1122_v35  ;;  %v763_v35 = vadd.f32 %v5278_v63, %v5404_v41  ;;  %v768_v12 = vadd.f32 %v5284_v15, %v5415_v5 }
 0x222   : > { %v4518_v31 = vpop.eup %4517  ;;  %v1125_v33 = vadd.f32 1.0, %v4516_v53  ;;  %4529 = vpow2.f32 %v3348_v10  ;;  %v3970_v23 = vpop.f32.mrb[26].mxu0 }
 0x223   : > { %v1124_v57 = vadd.f32 1.0, %v4518_v31  ;;  %v1097_v37 = vpop.f32.mrb[27].mxu0  ;;  %v5425_v18 = vpop.permute.xlu1 %941 }
 0x224   : > { %4531 = vrcp.f32 %v1125_v33  ;;  %v1093_v33 = vadd.f32 %v3967_v55, %v5409_v1 }
 0x225   : > { %v4520_v11 = vpop.eup %4519  ;;  %4533 = vrcp.f32 %v1124_v57 }
 0x226   : > { %v4522_v47 = vpop.eup %4521  ;;  %v1151_v17 = vadd.f32 1.0, %v4520_v11  ;;  %v1088_v11 = vadd.f32 %v1087_v45, %v5411_v2 }
 0x227   : > { %v1150_v53 = vadd.f32 1.0, %v4522_v47 }
 0x228   : > { %4535 = vrcp.f32 %v1151_v17 }
 0x229   : > { %v4524_v16 = vpop.eup %4523  ;;  %4537 = vrcp.f32 %v1150_v53 }
 0x22a   : > { %v4526_v10 = vpop.eup %4525  ;;  %v1153_v31 = vadd.f32 1.0, %v4524_v16 }
 0x22b   : > { %v4528_v39 = vpop.eup %4527  ;;  %v1163_v57 = vmul.f32 %v4526_v10, %v763_v35  ;;  %v5429_v35 = vpop.permute.xlu0 %936 }
 0x22c   : > { %v4530_v3 = vpop.eup %4529  ;;  %v1162_v43 = vmul.f32 %v4528_v39, %v758_v51  ;;  %4539 = vrcp.f32 %v1153_v31  ;;  %v1103_v51 = vadd.f32 %v3970_v23, %v5425_v18  ;;  %v1098_v27 = vadd.f32 %v1097_v37, %v5429_v35 }
 0x22d   : > { %v1152_v63 = vadd.f32 1.0, %v4530_v3  ;;  %v1167_v47 = vadd.f32 %v1163_v57, %v1093_v33 }
 0x22e   : > { %v4532_v41 = vpop.eup %4531  ;;  %v1166_v55 = vadd.f32 %v1162_v43, %v1088_v11 }
 0x22f   : > { %v4534_v16 = vpop.eup %4533  ;;  %4541 = vrcp.f32 %v1152_v63  ;;  %v1165_v39 = vmul.f32 %v4532_v41, %v773_v7 }
 0x230   : > { %4543 = vtanh.f32 %v1167_v47  ;;  %v1164_v3 = vmul.f32 %v4534_v16, %v768_v12 }
 0x231   : > { %4545 = vtanh.f32 %v1166_v55  ;;  %v1169_v45 = vadd.f32 %v1165_v39, %v1103_v51 }
 0x232   : > { %v1168_v17 = vadd.f32 %v1164_v3, %v1098_v27  ;;  %v4536_v53 = vpop.eup %4535 }
 0x233   : > { %4547 = vtanh.f32 %v1169_v45  ;;  %v4538_v15 = vpop.eup %4537  ;;  %v1175_v31 = vsub.f32 1.0, %v4536_v53  ;;  %v1183_v7 = vmul.f32 %v4536_v53, %v4941_v9 }
 0x234   : > { %4549 = vtanh.f32 %v1168_v17  ;;  %v1174_v57 = vsub.f32 1.0, %v4538_v15  ;;  %v1182_v23 = vmul.f32 %v4538_v15, %v4939_v8 }
 0x236   : > { %v4540_v10 = vpop.eup %4539 }
 0x237   : > { %v1177_v37 = vsub.f32 1.0, %v4540_v10  ;;  %v1185_v27 = vmul.f32 %v4540_v10, %v4959_v14 }
 0x239   : > { %v4542_v43 = vpop.eup %4541 }
 0x23a   : > { %v4544_v33 = vpop.eup %4543  ;;  %v1176_v55 = vsub.f32 1.0, %v4542_v43  ;;  %v1184_v45 = vmul.f32 %v4542_v43, %v4957_v13  ;;  %v3663_v13 = vld [vmem:[%s4924_s9 + $0x30] sm:$0xff]  }
 0x23b   : > { %v4546_v11 = vpop.eup %4545  ;;  %v1179_v63 = vmul.f32 %v4544_v33, %v1175_v31  ;;  %v3589_v14 = vunpack.c.h.bf16 %v3663_v13  ;;  %v6362_v31 = vld [vmem:[#allocation6_spill] sm:$0xff] }
 0x23c   : > { %v1178_v41 = vmul.f32 %v4546_v11, %v1174_v57 }
 0x23d   : > { %v4548_v47 = vpop.eup %4547  ;;  %v5435_v12 = vadd.f32 %v1183_v7, %v1179_v63 }
 0x23e   : > { %v4550_v16 = vpop.eup %4549  ;;  %v5437_v51 = vadd.f32 %v1182_v23, %v1178_v41  ;;  %v1181_v39 = vmul.f32 %v4548_v47, %v1177_v37  ;;  %v6363_v37 = vld [vmem:[#allocation7_spill] sm:$0xff] }
 0x23f   : > { %v1180_v3 = vmul.f32 %v4550_v16, %v1176_v55 }
 0x240   : > { %v4269_v9 = vpack.c.bf16 %v5435_v12, %v5437_v51  ;;  %v5443_v17 = vadd.f32 %v1185_v27, %v1181_v39  ;;  %v6364_v39 = vld [vmem:[#allocation8_spill] sm:$0xff] }
 0x241   : > { %v5445_v8 = vadd.f32 %v1184_v45, %v1180_v3 }
 0x242   : > { %4270 = vmatprep.subr.bf16.mxu1 %v4269_v9 }
 0x243   : > { %4272 = vmatpush3.bf16.msra.mxu1 %v4269_v9  ;;  %v4273_v53 = vpack.c.bf16 %v5443_v17, %v5445_v8 }
 0x245   : > { %4274 = vmatprep.subr.bf16.mxu1 %v4273_v53 }
 0x247   : > { %4276 = vmatpush3.bf16.msra.mxu1 %v4273_v53 }
 0x24a   : > { %3988 = vmatmul.mubr.msk.f32.vlgmr.msra.gmra.mrb[0].mxu1 %vm518_vm1, %v4984_v22 }
 0x24b   : > { %3990 = vmatprep.mubr.msk.f32.mxu1 %vm518_vm1, %v4992_v24  ;;  %v3588_v24 = vunpack.c.l.bf16 %v3663_v13 }
 0x24e   : > { %3991 = vmatmul.mubr.msk.f32.gmra.mrb[2].mxu1 %vm518_vm1, %v5004_v26  ;;  %v3664_v26 = vld [vmem:[%s4924_s9 + $0x38] sm:$0xff]  }
 0x24f   : > { %3993 = vmatprep.mubr.msk.f32.mxu1 %vm518_vm1, %v5012_v28 }
 0x252   : > { %3994 = vmatmul.mubr.msk.f32.gmra.mrb[4].mxu1 %vm518_vm1, %v5024_v30 }
 0x253   : > { %3996 = vmatprep.mubr.msk.f32.mxu1 %vm518_vm1, %v5032_v32 }
 0x256   : > { %3997 = vmatmul.mubr.msk.f32.gmra.mrb[6].mxu1 %vm518_vm1, %v5044_v34 }
 0x257   : > { %3999 = vmatprep.mubr.msk.f32.mxu1 %vm518_vm1, %v5052_v36  ;;  %v3593_v36 = vunpack.c.h.bf16 %v3664_v26 }
 0x25a   : > { %4000 = vmatmul.mubr.msk.f32.gmra.mrb[8].mxu1 %vm518_vm1, %v5064_v38 }
 0x25b   : > { %4002 = vmatprep.mubr.msk.f32.mxu1 %vm518_vm1, %v5072_v40 }
 0x25e   : > { %4003 = vmatmul.mubr.msk.f32.gmra.mrb[10].mxu1 %vm518_vm1, %v5084_v42  ;;  %v3592_v42 = vunpack.c.l.bf16 %v3664_v26 }
 0x25f   : > { %4005 = vmatprep.mubr.msk.f32.mxu1 %vm518_vm1, %v5092_v44  ;;  %v3665_v44 = vld [vmem:[%s4924_s9 + $0x40] sm:$0xff]  }
 0x262   : > { %4006 = vmatmul.mubr.msk.f32.gmra.mrb[12].mxu1 %vm518_vm1, %v5104_v46 }
 0x263   : > { %4008 = vmatprep.mubr.msk.f32.mxu1 %vm518_vm1, %v5112_v48 }
 0x266   : > { %4009 = vmatmul.mubr.msk.f32.gmra.mrb[14].mxu1 %vm518_vm1, %v5124_v50 }
 0x267   : > { %4011 = vmatprep.mubr.msk.f32.mxu1 %vm518_vm1, %v5132_v52 }
 0x26a   : > { %4012 = vmatmul.mubr.msk.f32.gmra.mrb[16].mxu1 %vm518_vm1, %v5144_v54 }
 0x26b   : > { %4014 = vmatprep.mubr.msk.f32.mxu1 %vm518_vm1, %v5152_v56 }
 0x26e   : > { %4015 = vmatmul.mubr.msk.f32.gmra.mrb[18].mxu1 %vm518_vm1, %v5164_v58  ;;  %v3597_v58 = vunpack.c.h.bf16 %v3665_v44 }
 0x26f   : > { %4017 = vmatprep.mubr.msk.f32.mxu1 %vm518_vm1, %v5172_v60 }
 0x272   : > { %4018 = vmatmul.mubr.msk.f32.gmra.mrb[20].mxu1 %vm518_vm1, %v5184_v62 }
 0x273   : > { %4020 = vmatprep.mubr.msk.f32.mxu1 %vm518_vm1, %v5192_v0  ;;  %v3596_v0 = vunpack.c.l.bf16 %v3665_v44 }
 0x276   : > { %4021 = vmatmul.mubr.msk.f32.gmra.mrb[22].mxu1 %vm518_vm1, %v5204_v6  ;;  %v3666_v6 = vld [vmem:[%s4924_s9 + $0x48] sm:$0xff]  }
 0x277   : > { %4031 = vmatprep.mubr.msk.f32.mxu1 %vm944_vm2, %v5232_v19  ;;  %v3601_v11 = vunpack.c.h.bf16 %v3666_v6  ;;  %v3600_v41 = vunpack.c.l.bf16 %v3666_v6  ;;  %v6366_v6 = vld [vmem:[#allocation10_spill] sm:$0xff] }
 0x31d   : > { %v3989_v22 = vpop.f32.mrb[0].mxu1 }
 0x31e   : > { %v1262_v28 = vadd.f32 %v3989_v22, %v5241_v25  ;;  %v1256_v30 = vpop.f32.mrb[1].mxu1 }
 0x31f   : > { %v1257_v32 = vadd.f32 %v1256_v30, %v5236_v20 }
 0x320   : > { %v1401_v34 = vadd.f32 %v3589_v14, %v1262_v28 }
 0x321   : > { %v1400_v38 = vadd.f32 %v3588_v24, %v1257_v32  ;;  %v3992_v40 = vpop.f32.mrb[2].mxu1 }
 0x322   : > { %v3387_v46 = vmul.f32 -1.442695, %v1401_v34  ;;  %v1272_v48 = vadd.f32 %v3992_v40, %v5243_v29  ;;  %v1266_v50 = vpop.f32.mrb[3].mxu1 }
 0x323   : > { %v3386_v52 = vmul.f32 -1.442695, %v1400_v38  ;;  %v1267_v54 = vadd.f32 %v1266_v50, %v5238_v21 }
 0x324   : > { %4551 = vpow2.f32 %v3387_v46  ;;  %v1403_v56 = vadd.f32 %v3593_v36, %v1272_v48  ;;  %v3667_v46 = vld [vmem:[%s4924_s9 + $0x50] sm:$0xff]  }
 0x325   : > { %4553 = vpow2.f32 %v3386_v52  ;;  %v1402_v60 = vadd.f32 %v3592_v42, %v1267_v54  ;;  %v3995_v62 = vpop.f32.mrb[4].mxu1  ;;  %v6365_v54 = vld [vmem:[#allocation9_spill] sm:$0xff] }
 0x326   : > { %v3389_v19 = vmul.f32 -1.442695, %v1403_v56  ;;  %v1282_v15 = vadd.f32 %v3995_v62, %v5250_v61  ;;  %v1276_v10 = vpop.f32.mrb[5].mxu1 }
 0x327   : > { %v3388_v43 = vmul.f32 -1.442695, %v1402_v60  ;;  %v1277_v33 = vadd.f32 %v1276_v10, %v6362_v31  ;;  %v3668_v60 = vld [vmem:[%s4924_s9 + $0x58] sm:$0xff]  }
 0x328   : > { %4555 = vpow2.f32 %v3389_v19  ;;  %v1429_v57 = vadd.f32 %v3597_v58, %v1282_v15  ;;  %v3605_v58 = vunpack.c.h.bf16 %v3667_v46  ;;  %v3604_v15 = vunpack.c.l.bf16 %v3667_v46 }
 0x329   : > { %4557 = vpow2.f32 %v3388_v43  ;;  %v1428_v63 = vadd.f32 %v3596_v0, %v1277_v33  ;;  %v3998_v7 = vpop.f32.mrb[6].mxu1 }
 0x32a   : > { %v3391_v23 = vmul.f32 -1.442695, %v1429_v57  ;;  %v1292_v47 = vadd.f32 %v3998_v7, %v6363_v37  ;;  %v1286_v55 = vpop.f32.mrb[7].mxu1 }
 0x32b   : > { %v3390_v16 = vmul.f32 -1.442695, %v1428_v63  ;;  %v1287_v27 = vadd.f32 %v1286_v55, %v6364_v39 }
 0x32c   : > { %4559 = vpow2.f32 %v3391_v23  ;;  %v1431_v3 = vadd.f32 %v3601_v11, %v1292_v47  ;;  %v3609_v11 = vunpack.c.h.bf16 %v3668_v60 }
 0x32d   : > { %4561 = vpow2.f32 %v3390_v16  ;;  %v1430_v45 = vadd.f32 %v3600_v41, %v1287_v27  ;;  %v4001_v9 = vpop.f32.mrb[8].mxu1  ;;  %v6367_v41 = vld [vmem:[#allocation11_spill] sm:$0xff]  ;;  %v6368_v16 = vld [vmem:[#allocation12_spill] sm:$0xff] }
 0x32e   : > { %v4552_v53 = vpop.eup %4551  ;;  %v3393_v13 = vmul.f32 -1.442695, %v1431_v3  ;;  %v1296_v14 = vpop.f32.mrb[9].mxu1  ;;  %v1302_v56 = vadd.f32 %v4001_v9, %v6365_v54  ;;  %v3608_v3 = vunpack.c.l.bf16 %v3668_v60 }
 0x32f   : > { %v4554_v22 = vpop.eup %4553  ;;  %v1417_v24 = vadd.f32 1.0, %v4552_v53  ;;  %v3392_v26 = vmul.f32 -1.442695, %v1430_v45  ;;  %v1297_v19 = vadd.f32 %v1296_v14, %v6366_v6 }
 0x330   : > { %v1416_v28 = vadd.f32 1.0, %v4554_v22  ;;  %4563 = vpow2.f32 %v3393_v13 }
 0x331   : > { %4565 = vrcp.f32 %v1417_v24  ;;  %v4004_v30 = vpop.f32.mrb[10].mxu1 }
 0x332   : > { %v4556_v32 = vpop.eup %4555  ;;  %4567 = vrcp.f32 %v1416_v28  ;;  %v1306_v34 = vpop.f32.mrb[11].mxu1  ;;  %v1312_v23 = vadd.f32 %v4004_v30, %v6367_v41 }
 0x333   : > { %v4558_v36 = vpop.eup %4557  ;;  %v1419_v38 = vadd.f32 1.0, %v4556_v32  ;;  %4569 = vpow2.f32 %v3392_v26  ;;  %v1307_v27 = vadd.f32 %v1306_v34, %v6368_v16 }
 0x334   : > { %v1418_v40 = vadd.f32 1.0, %v4558_v36 }
 0x335   : > { %4571 = vrcp.f32 %v1419_v38 }
 0x336   : > { %v4560_v42 = vpop.eup %4559  ;;  %4573 = vrcp.f32 %v1418_v40 }
 0x337   : > { %v4562_v44 = vpop.eup %4561  ;;  %v1445_v48 = vadd.f32 1.0, %v4560_v42 }
 0x338   : > { %v1444_v52 = vadd.f32 1.0, %v4562_v44 }
 0x339   : > { %4575 = vrcp.f32 %v1445_v48 }
 0x33a   : > { %v4564_v50 = vpop.eup %4563  ;;  %4577 = vrcp.f32 %v1444_v52  ;;  %v6369_v52 = vld [vmem:[#allocation13_spill] sm:$0xff] }
 0x33b   : > { %v4566_v62 = vpop.eup %4565  ;;  %v1447_v0 = vadd.f32 1.0, %v4564_v50 }
 0x33c   : > { %v4568_v10 = vpop.eup %4567  ;;  %v1457_v43 = vmul.f32 %v4566_v62, %v1302_v56 }
 0x33d   : > { %v4570_v33 = vpop.eup %4569  ;;  %v1456_v57 = vmul.f32 %v4568_v10, %v1297_v19  ;;  %4579 = vrcp.f32 %v1447_v0 }
 0x33e   : > { %v1446_v63 = vadd.f32 1.0, %v4570_v33  ;;  %v1461_v7 = vadd.f32 %v3605_v58, %v1457_v43  ;;  %v6370_v43 = vld [vmem:[#allocation14_spill] sm:$0xff] }
 0x33f   : > { %v4572_v47 = vpop.eup %4571  ;;  %v1460_v55 = vadd.f32 %v3604_v15, %v1456_v57 }
 0x340   : > { %v4574_v45 = vpop.eup %4573  ;;  %4581 = vrcp.f32 %v1446_v63  ;;  %v1459_v9 = vmul.f32 %v4572_v47, %v1312_v23 }
 0x341   : > { %4583 = vtanh.f32 %v1461_v7  ;;  %v1458_v53 = vmul.f32 %v4574_v45, %v1307_v27  ;;  %v6373_v27 = vld [vmem:[#allocation17_spill] sm:$0xff]  ;;  %v6375_v45 = vld [vmem:[#allocation19_spill] sm:$0xff] }
 0x342   : > { %4585 = vtanh.f32 %v1460_v55  ;;  %v1463_v13 = vadd.f32 %v3609_v11, %v1459_v9  ;;  %v6371_v11 = vld [vmem:[#allocation15_spill] sm:$0xff]  ;;  %v6372_v55 = vld [vmem:[#allocation16_spill] sm:$0xff] }
 0x343   : > { %v1462_v14 = vadd.f32 %v3608_v3, %v1458_v53  ;;  %v4576_v26 = vpop.eup %4575  ;;  %v6374_v3 = vld [vmem:[#allocation18_spill] sm:$0xff]  ;;  %v6376_v9 = vld [vmem:[#allocation20_spill] sm:$0xff]  ;;  %v6377_v53 = vld [vmem:[#allocation21_spill] sm:$0xff] }
 0x344   : > { %4587 = vtanh.f32 %v1463_v13  ;;  %v4578_v28 = vpop.eup %4577  ;;  %v1469_v38 = vsub.f32 1.0, %v4576_v26  ;;  %v1477_v48 = vmul.f32 %v4576_v26, %v5288_v4  ;;  %v6378_v13 = vld [vmem:[#allocation22_spill] sm:$0xff]  ;;  %v6380_v26 = vld [vmem:[#allocation24_spill] sm:$0xff] }
 0x345   : > { %4589 = vtanh.f32 %v1462_v14  ;;  %v5515_v22 = vpop.f32.mrb[20].mxu1  ;;  %v1468_v42 = vsub.f32 1.0, %v4578_v28  ;;  %v1476_v56 = vmul.f32 %v4578_v28, %v6369_v52  ;;  %v6379_v14 = vld [vmem:[#allocation23_spill] sm:$0xff]  ;;  %v6381_v28 = vld [vmem:[#allocation25_spill] sm:$0xff] }
 0x346   : > { %v5517_v24 = vpop.f32.mrb[21].mxu1 }
 0x347   : > { %v4580_v30 = vpop.eup %4579 }
 0x348   : > { %v1471_v58 = vsub.f32 1.0, %v4580_v30  ;;  %v1479_v33 = vmul.f32 %v4580_v30, %v6370_v43  ;;  %v6382_v30 = vld [vmem:[#allocation26_spill] sm:$0xff] }
 0x349   : > { %v5519_v32 = vpop.f32.mrb[22].mxu1 }
 0x34a   : > { %v4582_v34 = vpop.eup %4581  ;;  %v5521_v36 = vpop.f32.mrb[23].mxu1 }
 0x34b   : > { %v4584_v40 = vpop.eup %4583  ;;  %v1470_v0 = vsub.f32 1.0, %v4582_v34  ;;  %v1478_v63 = vmul.f32 %v4582_v34, %v6371_v11  ;;  %v4791_v34 = vld [vmem:[%s6243_s1] sm:$0xff] }
 0x34c   : > { %v4586_v44 = vpop.eup %4585  ;;  %v1473_v46 = vmul.f32 %v4584_v40, %v1469_v38  ;;  %v6383_v40 = vld [vmem:[#allocation27_spill] sm:$0xff] }
 0x34d   : > { %v1472_v50 = vmul.f32 %v4586_v44, %v1468_v42  ;;  %v6387_v11 = vld [vmem:[#allocation31_spill] sm:$0xff] }
 0x34e   : > { %v4588_v60 = vpop.eup %4587  ;;  %v5525_v62 = vadd.f32 %v1477_v48, %v1473_v46  ;;  %v6384_v46 = vld [vmem:[#allocation28_spill] sm:$0xff] }
 0x34f   : > { %v4590_v19 = vpop.eup %4589  ;;  %v5527_v15 = vadd.f32 %v1476_v56, %v1472_v50  ;;  %v1475_v10 = vmul.f32 %v4588_v60, %v1471_v58  ;;  %v6385_v58 = vld [vmem:[#allocation29_spill] sm:$0xff] }
 0x350   : > { %v1474_v57 = vmul.f32 %v4590_v19, %v1470_v0  ;;  %v6386_v19 = vld [vmem:[#allocation30_spill] sm:$0xff] }
 0x351   : > { %v4277_v4 = vpack.c.bf16 %v5525_v62, %v5527_v15  ;;  %v5533_v7 = vadd.f32 %v1479_v33, %v1475_v10 }
 0x352   : > { %v5535_v23 = vadd.f32 %v1478_v63, %v1474_v57 }
 0x353   : > { %4278 = vmatprep.subr.bf16.mxu1 %v4277_v4  ;;  %4286 = vmatprep.subr.bf16.mxu0 %v4277_v4 }
 0x354   : > { %4280 = vmatpush3.bf16.msra.mxu1 %v4277_v4  ;;  %4288 = vmatpush3.bf16.msra.mxu0 %v4277_v4  ;;  %v4281_v47 = vpack.c.bf16 %v5533_v7, %v5535_v23 }
 0x356   : > { %4282 = vmatprep.subr.bf16.mxu1 %v4281_v47  ;;  %4290 = vmatprep.subr.bf16.mxu0 %v4281_v47 }
 0x358   : > { %4284 = vmatpush3.bf16.msra.mxu1 %v4281_v47  ;;  %4292 = vmatpush3.bf16.msra.mxu0 %v4281_v47  ;;  %v6388_v47 = vld [vmem:[#allocation32_spill] sm:$0xff] }
 0x35b   : > { %4032 = vmatmul.mubr.msk.f32.vlgmr.msra.gmra.mrb[12].mxu1 %vm944_vm2, %v6372_v55 }
 0x35c   : > { %4034 = vmatprep.mubr.msk.f32.mxu1 %vm944_vm2, %v6373_v27 }
 0x35f   : > { %4035 = vmatmul.mubr.msk.f32.gmra.mrb[14].mxu1 %vm944_vm2, %v6374_v3 }
 0x360   : > { %4037 = vmatprep.mubr.msk.f32.mxu1 %vm944_vm2, %v6375_v45 }
 0x363   : > { %4038 = vmatmul.mubr.msk.f32.gmra.mrb[16].mxu1 %vm944_vm2, %v6376_v9  ;;  %v6389_v9 = vld [vmem:[#allocation33_spill] sm:$0xff] }
 0x364   : > { %4040 = vmatprep.mubr.msk.f32.mxu1 %vm944_vm2, %v6377_v53 }
 0x367   : > { %4041 = vmatmul.mubr.msk.f32.gmra.mrb[18].mxu1 %vm944_vm2, %v6378_v13 }
 0x368   : > { %4043 = vmatprep.mubr.msk.f32.mxu1 %vm944_vm2, %v6379_v14  ;;  %v6390_v14 = vld [vmem:[#allocation34_spill] sm:$0xff] }
 0x36b   : > { %4044 = vmatmul.mubr.msk.f32.gmra.mrb[24].mxu1 %vm944_vm2, %v6380_v26 }
 0x36c   : > { %4046 = vmatprep.mubr.msk.f32.mxu1 %vm944_vm2, %v6381_v28 }
 0x36f   : > { %4047 = vmatmul.mubr.msk.f32.gmra.mrb[26].mxu1 %vm944_vm2, %v6382_v30 }
 0x370   : > { %4143 = vmatprep.mubr.msk.f32.mxu1 %vm518_vm1, %v4791_v34 }
 0x42e   : > { %v4033_v38 = vpop.f32.mrb[12].mxu1 }
 0x42f   : > { %v4358_v42 = vadd.f32 %v6383_v40, %v4033_v38  ;;  %v1550_v44 = vpop.f32.mrb[13].mxu1 }
 0x430   : > { %v4360_v48 = vadd.f32 %v6384_v46, %v1550_v44 }
 0x431   : > { %v3407_v50 = vmul.f32 -1.442695, %v4358_v42 }
 0x432   : > { %v3406_v52 = vmul.f32 -1.442695, %v4360_v48  ;;  %v4036_v56 = vpop.f32.mrb[14].mxu1 }
 0x433   : > { %4591 = vpow2.f32 %v3407_v50  ;;  %v4362_v60 = vadd.f32 %v6385_v58, %v4036_v56  ;;  %v1560_v0 = vpop.f32.mrb[15].mxu1 }
 0x434   : > { %4593 = vpow2.f32 %v3406_v52  ;;  %v4364_v10 = vadd.f32 %v6386_v19, %v1560_v0 }
 0x435   : > { %v3409_v43 = vmul.f32 -1.442695, %v4362_v60 }
 0x436   : > { %v3408_v33 = vmul.f32 -1.442695, %v4364_v10  ;;  %v4039_v57 = vpop.f32.mrb[16].mxu1 }
 0x437   : > { %4595 = vpow2.f32 %v3409_v43  ;;  %v4366_v63 = vadd.f32 %v6387_v11, %v4039_v57  ;;  %v1570_v4 = vpop.f32.mrb[17].mxu1 }
 0x438   : > { %4597 = vpow2.f32 %v3408_v33  ;;  %v4368_v55 = vadd.f32 %v6388_v47, %v1570_v4 }
 0x439   : > { %v3411_v27 = vmul.f32 -1.442695, %v4366_v63 }
 0x43a   : > { %v3410_v3 = vmul.f32 -1.442695, %v4368_v55  ;;  %v4042_v45 = vpop.f32.mrb[18].mxu1  ;;  %v6391_v55 = vld [vmem:[#allocation35_spill] sm:$0xff] }
 0x43b   : > { %4599 = vpow2.f32 %v3411_v27  ;;  %v4370_v53 = vadd.f32 %v6389_v9, %v4042_v45  ;;  %v1580_v13 = vpop.f32.mrb[19].mxu1  ;;  %v1362_v27 = vadd.f32 %v5515_v22, %v6391_v55 }
 0x43c   : > { %4601 = vpow2.f32 %v3410_v3  ;;  %v4372_v26 = vadd.f32 %v6390_v14, %v1580_v13 }
 0x43d   : > { %v4592_v28 = vpop.eup %4591  ;;  %v3413_v30 = vmul.f32 -1.442695, %v4370_v53  ;;  %v1357_v53 = vadd.f32 %v5517_v24, %v5407_v59  ;;  %v1367_v24 = vadd.f32 %v5521_v36, %v5415_v5 }
 0x43e   : > { %v4594_v34 = vpop.eup %4593  ;;  %v1626_v38 = vadd.f32 1.0, %v4592_v28  ;;  %v3412_v42 = vmul.f32 -1.442695, %v4372_v26  ;;  %v4045_v44 = vpop.f32.mrb[24].mxu1 }
 0x43f   : > { %v1625_v48 = vadd.f32 1.0, %v4594_v34  ;;  %4603 = vpow2.f32 %v3413_v30  ;;  %v1590_v50 = vpop.f32.mrb[25].mxu1  ;;  %v1596_v28 = vadd.f32 %v4045_v44, %v5409_v1 }
 0x440   : > { %4605 = vrcp.f32 %v1626_v38  ;;  %v1591_v38 = vadd.f32 %v1590_v50, %v5411_v2 }
 0x441   : > { %v4596_v52 = vpop.eup %4595  ;;  %4607 = vrcp.f32 %v1625_v48  ;;  %v1372_v48 = vadd.f32 %v5519_v32, %v5413_v49 }
 0x442   : > { %v4598_v56 = vpop.eup %4597  ;;  %v1628_v60 = vadd.f32 1.0, %v4596_v52  ;;  %4609 = vpow2.f32 %v3412_v42  ;;  %v4048_v0 = vpop.f32.mrb[26].mxu1 }
 0x443   : > { %v1627_v10 = vadd.f32 1.0, %v4598_v56  ;;  %v1600_v43 = vpop.f32.mrb[27].mxu1  ;;  %v1606_v44 = vadd.f32 %v4048_v0, %v5425_v18 }
 0x444   : > { %4611 = vrcp.f32 %v1628_v60  ;;  %v1601_v50 = vadd.f32 %v1600_v43, %v5429_v35 }
 0x445   : > { %v4600_v33 = vpop.eup %4599  ;;  %4613 = vrcp.f32 %v1627_v10 }
 0x446   : > { %v4602_v57 = vpop.eup %4601  ;;  %v1654_v63 = vadd.f32 1.0, %v4600_v33 }
 0x447   : > { %v1653_v3 = vadd.f32 1.0, %v4602_v57 }
 0x448   : > { %4615 = vrcp.f32 %v1654_v63 }
 0x449   : > { %v4604_v4 = vpop.eup %4603  ;;  %4617 = vrcp.f32 %v1653_v3 }
 0x44a   : > { %v4606_v45 = vpop.eup %4605  ;;  %v1656_v13 = vadd.f32 1.0, %v4604_v4 }
 0x44b   : > { %v4608_v26 = vpop.eup %4607  ;;  %v1666_v30 = vmul.f32 %v4606_v45, %v1362_v27 }
 0x44c   : > { %v4610_v34 = vpop.eup %4609  ;;  %v1665_v42 = vmul.f32 %v4608_v26, %v1357_v53  ;;  %4619 = vrcp.f32 %v1656_v13 }
 0x44d   : > { %v1655_v22 = vadd.f32 1.0, %v4610_v34  ;;  %v1670_v52 = vadd.f32 %v1666_v30, %v1596_v28 }
 0x44e   : > { %v4612_v56 = vpop.eup %4611  ;;  %v1669_v60 = vadd.f32 %v1665_v42, %v1591_v38 }
 0x44f   : > { %v4614_v10 = vpop.eup %4613  ;;  %4621 = vrcp.f32 %v1655_v22  ;;  %v1668_v33 = vmul.f32 %v4612_v56, %v1372_v48 }
 0x450   : > { %4623 = vtanh.f32 %v1670_v52  ;;  %v1667_v57 = vmul.f32 %v4614_v10, %v1367_v24 }
 0x451   : > { %4625 = vtanh.f32 %v1669_v60  ;;  %v1672_v32 = vadd.f32 %v1668_v33, %v1606_v44 }
 0x452   : > { %v1671_v63 = vadd.f32 %v1667_v57, %v1601_v50  ;;  %v4616_v4 = vpop.eup %4615  ;;  %v5618_v50 = vld [vmem:[%s6243_s1 + $0x18] sm:$0xff]  ;;  %v5625_v57 = vld [vmem:[%s6243_s1 + $0x20] sm:$0xff] }
 0x453   : > { %4627 = vtanh.f32 %v1672_v32  ;;  %v4618_v27 = vpop.eup %4617  ;;  %v1678_v45 = vsub.f32 1.0, %v4616_v4  ;;  %v1686_v0 = vmul.f32 %v4616_v4, %v5435_v12  ;;  %v5632_v32 = vld [vmem:[%s6243_s1 + $0x28] sm:$0xff]  ;;  %v5646_v4 = vld [vmem:[%s6243_s1 + $0x38] sm:$0xff] }
 0x454   : > { %4629 = vtanh.f32 %v1671_v63  ;;  %v1677_v13 = vsub.f32 1.0, %v4618_v27  ;;  %v1685_v43 = vmul.f32 %v4618_v27, %v5437_v51  ;;  %v5639_v63 = vld [vmem:[%s6243_s1 + $0x30] sm:$0xff]  ;;  %v5653_v27 = vld [vmem:[%s6243_s1 + $0x40] sm:$0xff] }
 0x456   : > { %v4620_v3 = vpop.eup %4619 }
 0x457   : > { %v1680_v34 = vsub.f32 1.0, %v4620_v3  ;;  %v1688_v24 = vmul.f32 %v4620_v3, %v5443_v17  ;;  %v5604_v17 = vld [vmem:[%s6243_s1 + $0x8] sm:$0xff] }
 0x458   : > { %v5660_v3 = vld [vmem:[%s6243_s1 + $0x48] sm:$0xff] }
 0x459   : > { %v4622_v36 = vpop.eup %4621 }
 0x45a   : > { %v4624_v53 = vpop.eup %4623  ;;  %v1679_v48 = vsub.f32 1.0, %v4622_v36  ;;  %v1687_v10 = vmul.f32 %v4622_v36, %v5445_v8  ;;  %v5611_v8 = vld [vmem:[%s6243_s1 + $0x10] sm:$0xff] }
 0x45b   : > { %v4626_v26 = vpop.eup %4625  ;;  %v1682_v28 = vmul.f32 %v4624_v53, %v1678_v45  ;;  %v5667_v36 = vld [vmem:[%s6243_s1 + $0x50] sm:$0xff]  ;;  %v5674_v45 = vld [vmem:[%s6243_s1 + $0x58] sm:$0xff]  ;;  %v5681_v53 = vld [vmem:[%s6243_s1 + $0x60] sm:$0xff] }
 0x45c   : > { %v1681_v30 = vmul.f32 %v4626_v26, %v1677_v13  ;;  %6392 = vst [vmem:[#allocation10_spill] sm:$0xff] %v5667_v36  ;;  %6393 = vst [vmem:[#allocation11_spill] sm:$0xff] %v5674_v45  ;;  %v5688_v13 = vld [vmem:[%s6243_s1 + $0x68] sm:$0xff]  ;;  %v5695_v26 = vld [vmem:[%s6243_s1 + $0x70] sm:$0xff] }
 0x45d   : > { %v4628_v38 = vpop.eup %4627  ;;  %v5587_v42 = vadd.f32 %v1686_v0, %v1682_v28  ;;  %6394 = vst [vmem:[#allocation12_spill] sm:$0xff] %v5681_v53  ;;  %6395 = vst [vmem:[#allocation13_spill] sm:$0xff] %v5688_v13  ;;  %v5702_v28 = vld [vmem:[%s6243_s1 + $0x78] sm:$0xff]  ;;  %v5709_v0 = vld [vmem:[%s6243_s1 + $0x80] sm:$0xff] }
 0x45e   : > { %v4630_v22 = vpop.eup %4629  ;;  %v5589_v52 = vadd.f32 %v1685_v43, %v1681_v30  ;;  %v1684_v56 = vmul.f32 %v4628_v38, %v1680_v34  ;;  %6396 = vst [vmem:[#allocation14_spill] sm:$0xff] %v5695_v26  ;;  %6397 = vst [vmem:[#allocation15_spill] sm:$0xff] %v5702_v28  ;;  %v5716_v30 = vld [vmem:[%s6243_s1 + $0x88] sm:$0xff]  ;;  %v5723_v43 = vld [vmem:[%s6243_s1 + $0x90] sm:$0xff] }
 0x45f   : > { %v1683_v60 = vmul.f32 %v4630_v22, %v1679_v48  ;;  %6398 = vst [vmem:[#allocation16_spill] sm:$0xff] %v5709_v0  ;;  %6399 = vst [vmem:[#allocation17_spill] sm:$0xff] %v5716_v30  ;;  %v5730_v34 = vld [vmem:[%s6243_s1 + $0x98] sm:$0xff]  ;;  %v5737_v38 = vld [vmem:[%s6243_s1 + $0xa0] sm:$0xff] }
 0x460   : > { %v4293_v12 = vpack.c.bf16 %v5587_v42, %v5589_v52  ;;  %v5595_v44 = vadd.f32 %v1688_v24, %v1684_v56  ;;  %6400 = vst [vmem:[#allocation18_spill] sm:$0xff] %v5723_v43  ;;  %6401 = vst [vmem:[#allocation19_spill] sm:$0xff] %v5730_v34  ;;  %v5744_v48 = vld [vmem:[%s6243_s1 + $0xa8] sm:$0xff]  ;;  %v5751_v22 = vld [vmem:[%s6243_s1 + $0xb0] sm:$0xff] }
 0x461   : > { %v5597_v51 = vadd.f32 %v1687_v10, %v1683_v60  ;;  %6402 = vst [vmem:[#allocation20_spill] sm:$0xff] %v5737_v38  ;;  %6403 = vst [vmem:[#allocation21_spill] sm:$0xff] %v5744_v48  ;;  %v5758_v56 = vld [vmem:[%s6243_s1 + $0xb8] sm:$0xff]  ;;  %v5765_v24 = vld [vmem:[%s6244_s2] sm:$0xff] }
 0x462   : > { %4294 = vmatprep.subr.bf16.mxu0 %v4293_v12  ;;  %6404 = vst [vmem:[#allocation22_spill] sm:$0xff] %v5751_v22  ;;  %6405 = vst [vmem:[#allocation23_spill] sm:$0xff] %v5758_v56  ;;  %v3669_v60 = vld [vmem:[%s4924_s9 + $0x60] sm:$0xff]  }
 0x463   : > { %4296 = vmatpush3.bf16.msra.mxu0 %v4293_v12  ;;  %v4297_v33 = vpack.c.bf16 %v5595_v44, %v5597_v51  ;;  %6406 = vst [vmem:[#allocation24_spill] sm:$0xff] %v5765_v24  ;;  %v3613_v10 = vunpack.c.h.bf16 %v3669_v60 }
 0x465   : > { %4298 = vmatprep.subr.bf16.mxu0 %v4297_v33 }
 0x467   : > { %4300 = vmatpush3.bf16.msra.mxu0 %v4297_v33  ;;  %v3612_v33 = vunpack.c.l.bf16 %v3669_v60 }
 0x46a   : > { %4066 = vmatmul.mubr.msk.f32.vlgmr.msra.gmra.mrb[28].mxu0 %vm518_vm1, %v5604_v17 }
 0x46b   : > { %4068 = vmatprep.mubr.msk.f32.mxu0 %vm518_vm1, %v5611_v8 }
 0x46e   : > { %4069 = vmatmul.mubr.msk.f32.gmra.mrb[30].mxu0 %vm518_vm1, %v5618_v50 }
 0x46f   : > { %4071 = vmatprep.mubr.msk.f32.mxu0 %vm518_vm1, %v5625_v57 }
 0x472   : > { %4072 = vmatmul.mubr.msk.f32.gmra.mrb[32].mxu0 %vm518_vm1, %v5632_v32 }
 0x473   : > { %4074 = vmatprep.mubr.msk.f32.mxu0 %vm518_vm1, %v5639_v63 }
 0x476   : > { %4075 = vmatmul.mubr.msk.f32.gmra.mrb[34].mxu0 %vm518_vm1, %v5646_v4 }
 0x477   : > { %4077 = vmatprep.mubr.msk.f32.mxu0 %vm518_vm1, %v5653_v27 }
 0x47a   : > { %4078 = vmatmul.mubr.msk.f32.gmra.mrb[36].mxu0 %vm518_vm1, %v5660_v3 }
 0x47b   : > { %4080 = vmatprep.mubr.msk.f32.mxu0 %vm518_vm1, %v5667_v36 }
 0x47e   : > { %4081 = vmatmul.mubr.msk.f32.gmra.mrb[38].mxu0 %vm518_vm1, %v5674_v45 }
 0x47f   : > { %4083 = vmatprep.mubr.msk.f32.mxu0 %vm518_vm1, %v5681_v53 }
 0x482   : > { %4084 = vmatmul.mubr.msk.f32.gmra.mrb[40].mxu0 %vm518_vm1, %v5688_v13 }
 0x483   : > { %4086 = vmatprep.mubr.msk.f32.mxu0 %vm518_vm1, %v5695_v26  ;;  %v3671_v26 = vld [vmem:[%s4924_s9 + $0x70] sm:$0xff]  }
 0x486   : > { %4087 = vmatmul.mubr.msk.f32.gmra.mrb[42].mxu0 %vm518_vm1, %v5702_v28 }
 0x487   : > { %4089 = vmatprep.mubr.msk.f32.mxu0 %vm518_vm1, %v5709_v0 }
 0x48a   : > { %4090 = vmatmul.mubr.msk.f32.gmra.mrb[44].mxu0 %vm518_vm1, %v5716_v30 }
 0x48b   : > { %4092 = vmatprep.mubr.msk.f32.mxu0 %vm518_vm1, %v5723_v43 }
 0x48e   : > { %4093 = vmatmul.mubr.msk.f32.gmra.mrb[46].mxu0 %vm518_vm1, %v5730_v34 }
 0x48f   : > { %4095 = vmatprep.mubr.msk.f32.mxu0 %vm518_vm1, %v5737_v38 }
 0x492   : > { %4096 = vmatmul.mubr.msk.f32.gmra.mrb[48].mxu0 %vm518_vm1, %v5744_v48 }
 0x493   : > { %4098 = vmatprep.mubr.msk.f32.mxu0 %vm518_vm1, %v5751_v22  ;;  %v3670_v22 = vld [vmem:[%s4924_s9 + $0x68] sm:$0xff]  }
 0x494   : > { %v3617_v43 = vunpack.c.h.bf16 %v3670_v22  ;;  %v3616_v28 = vunpack.c.l.bf16 %v3670_v22 }
 0x496   : > { %4099 = vmatmul.mubr.msk.f32.gmra.mrb[50].mxu0 %vm518_vm1, %v5758_v56 }
 0x497   : > { %4109 = vmatprep.mubr.msk.f32.mxu0 %vm944_vm2, %v5765_v24 }
 0x53d   : > { %v4067_v12 = vpop.f32.mrb[28].mxu0 }
 0x53e   : > { %v1765_v48 = vadd.f32 %v4067_v12, %v5241_v25  ;;  %v1759_v38 = vpop.f32.mrb[29].mxu0  ;;  %v3621_v12 = vunpack.c.h.bf16 %v3671_v26 }
 0x53f   : > { %v1760_v34 = vadd.f32 %v1759_v38, %v5236_v20 }
 0x540   : > { %v1904_v56 = vadd.f32 %v3613_v10, %v1765_v48  ;;  %v3620_v48 = vunpack.c.l.bf16 %v3671_v26  ;;  %v3672_v10 = vld [vmem:[%s4924_s9 + $0x78] sm:$0xff]  }
 0x541   : > { %v1903_v30 = vadd.f32 %v3612_v33, %v1760_v34  ;;  %v4070_v0 = vpop.f32.mrb[30].mxu0 }
 0x542   : > { %v3451_v13 = vmul.f32 -1.442695, %v1904_v56  ;;  %v1775_v24 = vadd.f32 %v4070_v0, %v5243_v29  ;;  %v1769_v53 = vpop.f32.mrb[31].mxu0 }
 0x543   : > { %v3450_v45 = vmul.f32 -1.442695, %v1903_v30  ;;  %v1770_v60 = vadd.f32 %v1769_v53, %v5238_v21  ;;  %v3625_v30 = vunpack.c.h.bf16 %v3672_v10 }
 0x544   : > { %4631 = vpow2.f32 %v3451_v13  ;;  %v1906_v36 = vadd.f32 %v3617_v43, %v1775_v24  ;;  %v3624_v43 = vunpack.c.l.bf16 %v3672_v10 }
 0x545   : > { %4633 = vpow2.f32 %v3450_v45  ;;  %v1905_v25 = vadd.f32 %v3616_v28, %v1770_v60  ;;  %v4073_v38 = vpop.f32.mrb[32].mxu0 }
 0x546   : > { %v3453_v34 = vmul.f32 -1.442695, %v1906_v36  ;;  %v1785_v33 = vadd.f32 %v4073_v38, %v5250_v61  ;;  %v1779_v22 = vpop.f32.mrb[33].mxu0 }
 0x547   : > { %v3452_v20 = vmul.f32 -1.442695, %v1905_v25  ;;  %v1780_v56 = vadd.f32 %v1779_v22, %v6362_v31 }
 0x548   : > { %4635 = vpow2.f32 %v3453_v34  ;;  %v1932_v0 = vadd.f32 %v3621_v12, %v1785_v33 }
 0x549   : > { %4637 = vpow2.f32 %v3452_v20  ;;  %v1931_v53 = vadd.f32 %v3620_v48, %v1780_v56  ;;  %v4076_v13 = vpop.f32.mrb[34].mxu0 }
 0x54a   : > { %v3455_v24 = vmul.f32 -1.442695, %v1932_v0  ;;  %v1795_v45 = vadd.f32 %v4076_v13, %v6363_v37  ;;  %v1789_v28 = vpop.f32.mrb[35].mxu0 }
 0x54b   : > { %v3454_v26 = vmul.f32 -1.442695, %v1931_v53  ;;  %v1790_v36 = vadd.f32 %v1789_v28, %v6364_v39  ;;  %v3673_v28 = vld [vmem:[%s4924_s9 + $0x80] sm:$0xff]  }
 0x54c   : > { %4639 = vpow2.f32 %v3455_v24  ;;  %v1934_v60 = vadd.f32 %v3625_v30, %v1795_v45  ;;  %v3628_v39 = vunpack.c.l.bf16 %v3673_v28 }
 0x54d   : > { %4641 = vpow2.f32 %v3454_v26  ;;  %v1933_v25 = vadd.f32 %v3624_v43, %v1790_v36  ;;  %v4079_v38 = vpop.f32.mrb[36].mxu0 }
 0x54e   : > { %v4632_v22 = vpop.eup %4631  ;;  %v3457_v34 = vmul.f32 -1.442695, %v1934_v60  ;;  %v1799_v12 = vpop.f32.mrb[37].mxu0 }
 0x54f   : > { %v4634_v33 = vpop.eup %4633  ;;  %v1920_v20 = vadd.f32 1.0, %v4632_v22  ;;  %v3456_v48 = vmul.f32 -1.442695, %v1933_v25  ;;  %v1805_v25 = vadd.f32 %v4079_v38, %v6365_v54  ;;  %v3629_v22 = vunpack.c.h.bf16 %v3673_v28 }
 0x550   : > { %v1919_v10 = vadd.f32 1.0, %v4634_v33  ;;  %4643 = vpow2.f32 %v3457_v34  ;;  %v3674_v34 = vld [vmem:[%s4924_s9 + $0x88] sm:$0xff]  }
 0x551   : > { %4645 = vrcp.f32 %v1920_v20  ;;  %v4082_v56 = vpop.f32.mrb[38].mxu0 }
 0x552   : > { %v4636_v0 = vpop.eup %4635  ;;  %4647 = vrcp.f32 %v1919_v10  ;;  %v1809_v53 = vpop.f32.mrb[39].mxu0  ;;  %v1800_v10 = vadd.f32 %v1799_v12, %v6366_v6 }
 0x553   : > { %v4638_v13 = vpop.eup %4637  ;;  %v1922_v30 = vadd.f32 1.0, %v4636_v0  ;;  %4649 = vpow2.f32 %v3456_v48  ;;  %v1810_v54 = vadd.f32 %v1809_v53, %v6368_v16 }
 0x554   : > { %v1921_v43 = vadd.f32 1.0, %v4638_v13 }
 0x555   : > { %4651 = vrcp.f32 %v1922_v30 }
 0x556   : > { %v4640_v24 = vpop.eup %4639  ;;  %4653 = vrcp.f32 %v1921_v43  ;;  %v3633_v43 = vunpack.c.h.bf16 %v3674_v34 }
 0x557   : > { %v4642_v45 = vpop.eup %4641  ;;  %v1948_v26 = vadd.f32 1.0, %v4640_v24 }
 0x558   : > { %v1947_v60 = vadd.f32 1.0, %v4642_v45  ;;  %v1815_v45 = vadd.f32 %v4082_v56, %v6367_v41 }
 0x559   : > { %4655 = vrcp.f32 %v1948_v26 }
 0x55a   : > { %v4644_v36 = vpop.eup %4643  ;;  %4657 = vrcp.f32 %v1947_v60 }
 0x55b   : > { %v4646_v33 = vpop.eup %4645  ;;  %v1950_v20 = vadd.f32 1.0, %v4644_v36  ;;  %v3632_v36 = vunpack.c.l.bf16 %v3674_v34 }
 0x55c   : > { %v4648_v0 = vpop.eup %4647  ;;  %v1960_v48 = vmul.f32 %v4646_v33, %v1805_v25 }
 0x55d   : > { %v4650_v13 = vpop.eup %4649  ;;  %v1959_v30 = vmul.f32 %v4648_v0, %v1800_v10  ;;  %4659 = vrcp.f32 %v1950_v20 }
 0x55e   : > { %v1949_v37 = vadd.f32 1.0, %v4650_v13  ;;  %v1964_v24 = vadd.f32 %v3629_v22, %v1960_v48 }
 0x55f   : > { %v4652_v31 = vpop.eup %4651  ;;  %v1963_v38 = vadd.f32 %v3628_v39, %v1959_v30 }
 0x560   : > { %v4654_v61 = vpop.eup %4653  ;;  %4661 = vrcp.f32 %v1949_v37  ;;  %v1962_v12 = vmul.f32 %v4652_v31, %v1815_v45 }
 0x561   : > { %4663 = vtanh.f32 %v1964_v24  ;;  %v1961_v28 = vmul.f32 %v4654_v61, %v1810_v54 }
 0x562   : > { %4665 = vtanh.f32 %v1963_v38  ;;  %v1966_v26 = vadd.f32 %v3633_v43, %v1962_v12 }
 0x563   : > { %v1965_v25 = vadd.f32 %v3632_v36, %v1961_v28  ;;  %v4656_v56 = vpop.eup %4655 }
 0x564   : > { %4667 = vtanh.f32 %v1966_v26  ;;  %v4658_v33 = vpop.eup %4657  ;;  %v1972_v31 = vsub.f32 1.0, %v4656_v56  ;;  %v1980_v0 = vmul.f32 %v4656_v56, %v5525_v62 }
 0x565   : > { %4669 = vtanh.f32 %v1965_v25  ;;  %v5787_v60 = vpop.f32.mrb[48].mxu0  ;;  %v1971_v61 = vsub.f32 1.0, %v4658_v33  ;;  %v1979_v13 = vmul.f32 %v4658_v33, %v5527_v15 }
 0x566   : > { %v5789_v22 = vpop.f32.mrb[49].mxu0 }
 0x567   : > { %v4660_v39 = vpop.eup %4659 }
 0x568   : > { %v1974_v30 = vsub.f32 1.0, %v4660_v39  ;;  %v1982_v28 = vmul.f32 %v4660_v39, %v5533_v7  ;;  %v5814_v7 = vld [vmem:[%s6244_s2 + $0x8] sm:$0xff]  ;;  %v5828_v39 = vld [vmem:[%s6244_s2 + $0x18] sm:$0xff] }
 0x569   : > { %v5791_v20 = vpop.f32.mrb[50].mxu0 }
 0x56a   : > { %v4662_v53 = vpop.eup %4661  ;;  %v5793_v34 = vpop.f32.mrb[51].mxu0 }
 0x56b   : > { %v4664_v37 = vpop.eup %4663  ;;  %v1973_v45 = vsub.f32 1.0, %v4662_v53  ;;  %v1981_v25 = vmul.f32 %v4662_v53, %v5535_v23  ;;  %v5821_v23 = vld [vmem:[%s6244_s2 + $0x10] sm:$0xff]  ;;  %v5835_v53 = vld [vmem:[%s6244_s2 + $0x20] sm:$0xff] }
 0x56c   : > { %v4666_v54 = vpop.eup %4665  ;;  %v1976_v10 = vmul.f32 %v4664_v37, %v1972_v31  ;;  %v5842_v31 = vld [vmem:[%s6244_s2 + $0x28] sm:$0xff]  ;;  %v5849_v37 = vld [vmem:[%s6244_s2 + $0x30] sm:$0xff] }
 0x56d   : > { %v1975_v48 = vmul.f32 %v4666_v54, %v1971_v61  ;;  %v5856_v61 = vld [vmem:[%s6244_s2 + $0x38] sm:$0xff]  ;;  %v5863_v54 = vld [vmem:[%s6244_s2 + $0x40] sm:$0xff] }
 0x56e   : > { %v4668_v43 = vpop.eup %4667  ;;  %v5797_v24 = vadd.f32 %v1980_v0, %v1976_v10  ;;  %v5870_v10 = vld [vmem:[%s6244_s2 + $0x48] sm:$0xff]  ;;  %v5877_v0 = vld [vmem:[%s6244_s2 + $0x50] sm:$0xff] }
 0x56f   : > { %v4670_v38 = vpop.eup %4669  ;;  %v5799_v36 = vadd.f32 %v1979_v13, %v1975_v48  ;;  %v1978_v12 = vmul.f32 %v4668_v43, %v1974_v30  ;;  %6407 = vst [vmem:[#allocation25_spill] sm:$0xff] %v5870_v10  ;;  %6408 = vst [vmem:[#allocation26_spill] sm:$0xff] %v5877_v0  ;;  %v5884_v48 = vld [vmem:[%s6244_s2 + $0x58] sm:$0xff] }
 0x570   : > { %v1977_v26 = vmul.f32 %v4670_v38, %v1973_v45  ;;  %6409 = vst [vmem:[#allocation27_spill] sm:$0xff] %v5884_v48 }
 0x571   : > { %v4301_v62 = vpack.c.bf16 %v5797_v24, %v5799_v36  ;;  %v5805_v56 = vadd.f32 %v1982_v28, %v1978_v12 }
 0x572   : > { %v5807_v15 = vadd.f32 %v1981_v25, %v1977_v26 }
 0x573   : > { %4302 = vmatprep.subr.bf16.mxu0 %v4301_v62  ;;  %4310 = vmatprep.subr.bf16.mxu1 %v4301_v62 }
 0x574   : > { %4304 = vmatpush3.bf16.msra.mxu0 %v4301_v62  ;;  %4312 = vmatpush3.bf16.msra.mxu1 %v4301_v62  ;;  %v4305_v33 = vpack.c.bf16 %v5805_v56, %v5807_v15 }
 0x576   : > { %4306 = vmatprep.subr.bf16.mxu0 %v4305_v33  ;;  %4314 = vmatprep.subr.bf16.mxu1 %v4305_v33 }
 0x578   : > { %4308 = vmatpush3.bf16.msra.mxu0 %v4305_v33  ;;  %4316 = vmatpush3.bf16.msra.mxu1 %v4305_v33 }
 0x57b   : > { %4110 = vmatmul.mubr.msk.f32.vlgmr.msra.gmra.mrb[40].mxu0 %vm944_vm2, %v5814_v7 }
 0x57c   : > { %4112 = vmatprep.mubr.msk.f32.mxu0 %vm944_vm2, %v5821_v23 }
 0x57f   : > { %4113 = vmatmul.mubr.msk.f32.gmra.mrb[42].mxu0 %vm944_vm2, %v5828_v39 }
 0x580   : > { %4115 = vmatprep.mubr.msk.f32.mxu0 %vm944_vm2, %v5835_v53 }
 0x583   : > { %4116 = vmatmul.mubr.msk.f32.gmra.mrb[44].mxu0 %vm944_vm2, %v5842_v31 }
 0x584   : > { %4118 = vmatprep.mubr.msk.f32.mxu0 %vm944_vm2, %v5849_v37 }
 0x587   : > { %4119 = vmatmul.mubr.msk.f32.gmra.mrb[46].mxu0 %vm944_vm2, %v5856_v61 }
 0x588   : > { %4121 = vmatprep.mubr.msk.f32.mxu0 %vm944_vm2, %v5863_v54 }
 0x58b   : > { %4122 = vmatmul.mubr.msk.f32.gmra.mrb[52].mxu0 %vm944_vm2, %v5870_v10 }
 0x58c   : > { %4124 = vmatprep.mubr.msk.f32.mxu0 %vm944_vm2, %v5877_v0 }
 0x58f   : > { %4125 = vmatmul.mubr.msk.f32.gmra.mrb[54].mxu0 %vm944_vm2, %v5884_v48 }
 0x64e   : > { %v4111_v13 = vpop.f32.mrb[40].mxu0 }
 0x64f   : > { %v4374_v30 = vadd.f32 %v6383_v40, %v4111_v13  ;;  %v2053_v43 = vpop.f32.mrb[41].mxu0 }
 0x650   : > { %v4376_v45 = vadd.f32 %v6384_v46, %v2053_v43 }
 0x651   : > { %v3471_v38 = vmul.f32 -1.442695, %v4374_v30 }
 0x652   : > { %v3470_v12 = vmul.f32 -1.442695, %v4376_v45  ;;  %v4114_v28 = vpop.f32.mrb[42].mxu0 }
 0x653   : > { %4671 = vpow2.f32 %v3471_v38  ;;  %v4378_v26 = vadd.f32 %v6385_v58, %v4114_v28  ;;  %v2063_v25 = vpop.f32.mrb[43].mxu0 }
 0x654   : > { %4673 = vpow2.f32 %v3470_v12  ;;  %v4380_v62 = vadd.f32 %v6386_v19, %v2063_v25 }
 0x655   : > { %v3473_v33 = vmul.f32 -1.442695, %v4378_v26 }
 0x656   : > { %v3472_v0 = vmul.f32 -1.442695, %v4380_v62  ;;  %v4117_v10 = vpop.f32.mrb[44].mxu0 }
 0x657   : > { %4675 = vpow2.f32 %v3473_v33  ;;  %v4382_v48 = vadd.f32 %v6387_v11, %v4117_v10  ;;  %v2073_v13 = vpop.f32.mrb[45].mxu0 }
 0x658   : > { %4677 = vpow2.f32 %v3472_v0  ;;  %v4384_v43 = vadd.f32 %v6388_v47, %v2073_v13 }
 0x659   : > { %v3475_v30 = vmul.f32 -1.442695, %v4382_v48 }
 0x65a   : > { %v3474_v45 = vmul.f32 -1.442695, %v4384_v43  ;;  %v4120_v46 = vpop.f32.mrb[46].mxu0 }
 0x65b   : > { %4679 = vpow2.f32 %v3475_v30  ;;  %v4386_v38 = vadd.f32 %v6389_v9, %v4120_v46  ;;  %v2083_v28 = vpop.f32.mrb[47].mxu0 }
 0x65c   : > { %4681 = vpow2.f32 %v3474_v45  ;;  %v4388_v12 = vadd.f32 %v6390_v14, %v2083_v28 }
 0x65d   : > { %v4672_v26 = vpop.eup %4671  ;;  %v3477_v25 = vmul.f32 -1.442695, %v4386_v38 }
 0x65e   : > { %v4674_v62 = vpop.eup %4673  ;;  %v2129_v33 = vadd.f32 1.0, %v4672_v26  ;;  %v3476_v19 = vmul.f32 -1.442695, %v4388_v12  ;;  %v4123_v10 = vpop.f32.mrb[52].mxu0  ;;  %v1865_v12 = vadd.f32 %v5787_v60, %v6391_v55 }
 0x65f   : > { %v2128_v11 = vadd.f32 1.0, %v4674_v62  ;;  %4683 = vpow2.f32 %v3477_v25  ;;  %v2093_v0 = vpop.f32.mrb[53].mxu0 }
 0x660   : > { %4685 = vrcp.f32 %v2129_v33 }
 0x661   : > { %v4676_v48 = vpop.eup %4675  ;;  %4687 = vrcp.f32 %v2128_v11  ;;  %v1860_v11 = vadd.f32 %v5789_v22, %v5407_v59  ;;  %v1870_v22 = vadd.f32 %v5793_v34, %v5415_v5 }
 0x662   : > { %v4678_v13 = vpop.eup %4677  ;;  %v2131_v43 = vadd.f32 1.0, %v4676_v48  ;;  %4689 = vpow2.f32 %v3476_v19  ;;  %v4126_v46 = vpop.f32.mrb[54].mxu0  ;;  %v2099_v19 = vadd.f32 %v4123_v10, %v5409_v1 }
 0x663   : > { %v2130_v30 = vadd.f32 1.0, %v4678_v13  ;;  %v2103_v45 = vpop.f32.mrb[55].mxu0  ;;  %v2109_v10 = vadd.f32 %v4126_v46, %v5425_v18 }
 0x664   : > { %4691 = vrcp.f32 %v2131_v43  ;;  %v2094_v43 = vadd.f32 %v2093_v0, %v5411_v2  ;;  %v2104_v0 = vadd.f32 %v2103_v45, %v5429_v35 }
 0x665   : > { %v4680_v28 = vpop.eup %4679  ;;  %4693 = vrcp.f32 %v2130_v30 }
 0x666   : > { %v4682_v38 = vpop.eup %4681  ;;  %v2157_v14 = vadd.f32 1.0, %v4680_v28  ;;  %v1875_v28 = vadd.f32 %v5791_v20, %v5413_v49 }
 0x667   : > { %v2156_v25 = vadd.f32 1.0, %v4682_v38 }
 0x668   : > { %4695 = vrcp.f32 %v2157_v14 }
 0x669   : > { %v4684_v26 = vpop.eup %4683  ;;  %4697 = vrcp.f32 %v2156_v25 }
 0x66a   : > { %v4686_v62 = vpop.eup %4685  ;;  %v2159_v33 = vadd.f32 1.0, %v4684_v26 }
 0x66b   : > { %v4688_v48 = vpop.eup %4687  ;;  %v2169_v13 = vmul.f32 %v4686_v62, %v1865_v12 }
 0x66c   : > { %v4690_v9 = vpop.eup %4689  ;;  %v2168_v30 = vmul.f32 %v4688_v48, %v1860_v11  ;;  %4699 = vrcp.f32 %v2159_v33 }
 0x66d   : > { %v2158_v60 = vadd.f32 1.0, %v4690_v9  ;;  %v2173_v38 = vadd.f32 %v2169_v13, %v2099_v19 }
 0x66e   : > { %v4692_v55 = vpop.eup %4691  ;;  %v2172_v26 = vadd.f32 %v2168_v30, %v2094_v43 }
 0x66f   : > { %v4694_v59 = vpop.eup %4693  ;;  %4701 = vrcp.f32 %v2158_v60  ;;  %v2171_v14 = vmul.f32 %v4692_v55, %v1875_v28 }
 0x670   : > { %4703 = vtanh.f32 %v2173_v38  ;;  %v2170_v12 = vmul.f32 %v4694_v59, %v1870_v22 }
 0x671   : > { %4705 = vtanh.f32 %v2172_v26  ;;  %v2175_v20 = vadd.f32 %v2171_v14, %v2109_v10 }
 0x672   : > { %v2174_v25 = vadd.f32 %v2170_v12, %v2104_v0  ;;  %v4696_v9 = vpop.eup %4695 }
 0x673   : > { %4707 = vtanh.f32 %v2175_v20  ;;  %v4698_v62 = vpop.eup %4697  ;;  %v2181_v33 = vsub.f32 1.0, %v4696_v9  ;;  %v2189_v55 = vmul.f32 %v4696_v9, %v5587_v42  ;;  %v6422_v9 = vld [vmem:[#allocation22_spill] sm:$0xff] }
 0x674   : > { %4709 = vtanh.f32 %v2174_v25  ;;  %v2180_v19 = vsub.f32 1.0, %v4698_v62  ;;  %v2188_v45 = vmul.f32 %v4698_v62, %v5589_v52  ;;  %v6421_v25 = vld [vmem:[#allocation21_spill] sm:$0xff]  ;;  %v6423_v62 = vld [vmem:[#allocation23_spill] sm:$0xff] }
 0x676   : > { %v4700_v11 = vpop.eup %4699 }
 0x677   : > { %v2183_v59 = vsub.f32 1.0, %v4700_v11  ;;  %v2191_v10 = vmul.f32 %v4700_v11, %v5595_v44  ;;  %v6410_v44 = vld [vmem:[#allocation10_spill] sm:$0xff]  ;;  %v6424_v11 = vld [vmem:[#allocation24_spill] sm:$0xff] }
 0x679   : > { %v4702_v34 = vpop.eup %4701 }
 0x67a   : > { %v4704_v48 = vpop.eup %4703  ;;  %v2182_v60 = vsub.f32 1.0, %v4702_v34  ;;  %v2190_v0 = vmul.f32 %v4702_v34, %v5597_v51  ;;  %v6411_v51 = vld [vmem:[#allocation11_spill] sm:$0xff]  ;;  %v3675_v34 = vld [vmem:[%s4924_s9 + $0x90] sm:$0xff]  }
 0x67b   : > { %v4706_v13 = vpop.eup %4705  ;;  %v2185_v43 = vmul.f32 %v4704_v48, %v2181_v33  ;;  %v3637_v33 = vunpack.c.h.bf16 %v3675_v34 }
 0x67c   : > { %v2184_v46 = vmul.f32 %v4706_v13, %v2180_v19  ;;  %v3636_v19 = vunpack.c.l.bf16 %v3675_v34  ;;  %v3676_v13 = vld [vmem:[%s4924_s9 + $0x98] sm:$0xff]  }
 0x67d   : > { %v4708_v30 = vpop.eup %4707  ;;  %v5910_v28 = vadd.f32 %v2189_v55, %v2185_v43  ;;  %v6425_v43 = vld [vmem:[#allocation4_spill] sm:$0xff] }
 0x67e   : > { %v4710_v38 = vpop.eup %4709  ;;  %v5912_v22 = vadd.f32 %v2188_v45, %v2184_v46  ;;  %v2187_v26 = vmul.f32 %v4708_v30, %v2183_v59  ;;  %v6426_v45 = vld [vmem:[#allocation3_spill] sm:$0xff] }
 0x67f   : > { %v2186_v14 = vmul.f32 %v4710_v38, %v2182_v60  ;;  %v3641_v60 = vunpack.c.h.bf16 %v3676_v13 }
 0x680   : > { %v4317_v42 = vpack.c.bf16 %v5910_v28, %v5912_v22  ;;  %v5918_v12 = vadd.f32 %v2191_v10, %v2187_v26  ;;  %v3640_v10 = vunpack.c.l.bf16 %v3676_v13  ;;  %v6429_v13 = vld [vmem:[#allocation7_spill] sm:$0xff] }
 0x681   : > { %v5920_v52 = vadd.f32 %v2190_v0, %v2186_v14  ;;  %v3677_v14 = vld [vmem:[%s4924_s9 + $0xa0] sm:$0xff]  }
 0x682   : > { %4318 = vmatprep.subr.bf16.mxu1 %v4317_v42 }
 0x683   : > { %4320 = vmatpush3.bf16.msra.mxu1 %v4317_v42  ;;  %v4321_v20 = vpack.c.bf16 %v5918_v12, %v5920_v52 }
 0x685   : > { %4322 = vmatprep.subr.bf16.mxu1 %v4321_v20 }
 0x687   : > { %4324 = vmatpush3.bf16.msra.mxu1 %v4321_v20 }
 0x68a   : > { %4144 = vmatmul.mubr.msk.f32.vlgmr.msra.gmra.mrb[28].mxu1 %vm518_vm1, %v5604_v17  ;;  %v6412_v17 = vld [vmem:[#allocation12_spill] sm:$0xff] }
 0x68b   : > { %4146 = vmatprep.mubr.msk.f32.mxu1 %vm518_vm1, %v5611_v8  ;;  %v6413_v8 = vld [vmem:[#allocation13_spill] sm:$0xff] }
 0x68e   : > { %4147 = vmatmul.mubr.msk.f32.gmra.mrb[30].mxu1 %vm518_vm1, %v5618_v50  ;;  %v6414_v50 = vld [vmem:[#allocation14_spill] sm:$0xff] }
 0x68f   : > { %4149 = vmatprep.mubr.msk.f32.mxu1 %vm518_vm1, %v5625_v57  ;;  %v6415_v57 = vld [vmem:[#allocation15_spill] sm:$0xff] }
 0x692   : > { %4150 = vmatmul.mubr.msk.f32.gmra.mrb[32].mxu1 %vm518_vm1, %v5632_v32  ;;  %v6416_v32 = vld [vmem:[#allocation16_spill] sm:$0xff] }
 0x693   : > { %4152 = vmatprep.mubr.msk.f32.mxu1 %vm518_vm1, %v5639_v63  ;;  %v6417_v63 = vld [vmem:[#allocation17_spill] sm:$0xff] }
 0x696   : > { %4153 = vmatmul.mubr.msk.f32.gmra.mrb[34].mxu1 %vm518_vm1, %v5646_v4  ;;  %v6418_v4 = vld [vmem:[#allocation18_spill] sm:$0xff] }
 0x697   : > { %4155 = vmatprep.mubr.msk.f32.mxu1 %vm518_vm1, %v5653_v27  ;;  %v6419_v27 = vld [vmem:[#allocation19_spill] sm:$0xff] }
 0x69a   : > { %4156 = vmatmul.mubr.msk.f32.gmra.mrb[36].mxu1 %vm518_vm1, %v5660_v3  ;;  %v6420_v3 = vld [vmem:[#allocation20_spill] sm:$0xff] }
 0x69b   : > { %4158 = vmatprep.mubr.msk.f32.mxu1 %vm518_vm1, %v6410_v44 }
 0x69e   : > { %4159 = vmatmul.mubr.msk.f32.gmra.mrb[38].mxu1 %vm518_vm1, %v6411_v51 }
 0x69f   : > { %4161 = vmatprep.mubr.msk.f32.mxu1 %vm518_vm1, %v6412_v17 }
 0x6a2   : > { %4162 = vmatmul.mubr.msk.f32.gmra.mrb[40].mxu1 %vm518_vm1, %v6413_v8  ;;  %v3645_v8 = vunpack.c.h.bf16 %v3677_v14 }
 0x6a3   : > { %4164 = vmatprep.mubr.msk.f32.mxu1 %vm518_vm1, %v6414_v50 }
 0x6a6   : > { %4165 = vmatmul.mubr.msk.f32.gmra.mrb[42].mxu1 %vm518_vm1, %v6415_v57 }
 0x6a7   : > { %4167 = vmatprep.mubr.msk.f32.mxu1 %vm518_vm1, %v6416_v32  ;;  %v3644_v32 = vunpack.c.l.bf16 %v3677_v14 }
 0x6aa   : > { %4168 = vmatmul.mubr.msk.f32.gmra.mrb[44].mxu1 %vm518_vm1, %v6417_v63  ;;  %v3678_v63 = vld [vmem:[%s4924_s9 + $0xa8] sm:$0xff]  }
 0x6ab   : > { %4170 = vmatprep.mubr.msk.f32.mxu1 %vm518_vm1, %v6418_v4  ;;  %v3649_v34 = vunpack.c.h.bf16 %v3678_v63 }
 0x6ae   : > { %4171 = vmatmul.mubr.msk.f32.gmra.mrb[46].mxu1 %vm518_vm1, %v6419_v27  ;;  %v6427_v27 = vld [vmem:[#allocation5_spill] sm:$0xff] }
 0x6af   : > { %4173 = vmatprep.mubr.msk.f32.mxu1 %vm518_vm1, %v6420_v3 }
 0x6b2   : > { %4174 = vmatmul.mubr.msk.f32.gmra.mrb[48].mxu1 %vm518_vm1, %v6421_v25 }
 0x6b3   : > { %4176 = vmatprep.mubr.msk.f32.mxu1 %vm518_vm1, %v6422_v9 }
 0x6b6   : > { %4177 = vmatmul.mubr.msk.f32.gmra.mrb[50].mxu1 %vm518_vm1, %v6423_v62  ;;  %v6428_v62 = vld [vmem:[#allocation6_spill] sm:$0xff] }
 0x6b7   : > { %4187 = vmatprep.mubr.msk.f32.mxu1 %vm944_vm2, %v6424_v11 }
 0x75d   : > { %v4145_v48 = vpop.f32.mrb[28].mxu1 }
 0x75e   : > { %v2268_v55 = vadd.f32 %v4145_v48, %v6425_v43  ;;  %v2262_v46 = vpop.f32.mrb[29].mxu1  ;;  %v3648_v48 = vunpack.c.l.bf16 %v3678_v63 }
 0x75f   : > { %v2263_v59 = vadd.f32 %v2262_v46, %v6426_v45  ;;  %v6430_v45 = vld [vmem:[#allocation8_spill] sm:$0xff] }
 0x760   : > { %v2407_v30 = vadd.f32 %v3637_v33, %v2268_v55 }
 0x761   : > { %v2406_v38 = vadd.f32 %v3636_v19, %v2263_v59  ;;  %v4148_v26 = vpop.f32.mrb[30].mxu1 }
 0x762   : > { %v3515_v0 = vmul.f32 -1.442695, %v2407_v30  ;;  %v2278_v42 = vadd.f32 %v4148_v26, %v5243_v29  ;;  %v2272_v20 = vpop.f32.mrb[31].mxu1 }
 0x763   : > { %v3514_v44 = vmul.f32 -1.442695, %v2406_v38  ;;  %v2273_v51 = vadd.f32 %v2272_v20, %v5238_v21 }
 0x764   : > { %4711 = vpow2.f32 %v3515_v0  ;;  %v2409_v17 = vadd.f32 %v3641_v60, %v2278_v42 }
 0x765   : > { %4713 = vpow2.f32 %v3514_v44  ;;  %v2408_v50 = vadd.f32 %v3640_v10, %v2273_v51  ;;  %v4151_v57 = vpop.f32.mrb[32].mxu1 }
 0x766   : > { %v3517_v4 = vmul.f32 -1.442695, %v2409_v17  ;;  %v2288_v3 = vadd.f32 %v4151_v57, %v6427_v27  ;;  %v2282_v25 = vpop.f32.mrb[33].mxu1  ;;  %v3679_v27 = vld [vmem:[%s4924_s9 + $0xb0] sm:$0xff]  }
 0x767   : > { %v3516_v9 = vmul.f32 -1.442695, %v2408_v50  ;;  %v2283_v11 = vadd.f32 %v2282_v25, %v6428_v62  ;;  %v6431_v62 = vld [vmem:[#allocation9_spill] sm:$0xff] }
 0x768   : > { %4715 = vpow2.f32 %v3517_v4  ;;  %v2435_v29 = vadd.f32 %v3645_v8, %v2288_v3 }
 0x769   : > { %4717 = vpow2.f32 %v3516_v9  ;;  %v2434_v21 = vadd.f32 %v3644_v32, %v2283_v11  ;;  %v4154_v33 = vpop.f32.mrb[34].mxu1 }
 0x76a   : > { %v3519_v19 = vmul.f32 -1.442695, %v2435_v29  ;;  %v2298_v43 = vadd.f32 %v4154_v33, %v6429_v13  ;;  %v2292_v55 = vpop.f32.mrb[35].mxu1  ;;  %v3653_v29 = vunpack.c.h.bf16 %v3679_v27 }
 0x76b   : > { %v3518_v46 = vmul.f32 -1.442695, %v2434_v21  ;;  %v2293_v59 = vadd.f32 %v2292_v55, %v6430_v45 }
 0x76c   : > { %4719 = vpow2.f32 %v3519_v19  ;;  %v2437_v30 = vadd.f32 %v3649_v34, %v2298_v43  ;;  %v3680_v34 = vld [vmem:[%s4924_s9 + $0xb8] sm:$0xff]   ;;  %v3652_v19 = vunpack.c.l.bf16 %v3679_v27 }
 0x76d   : > { %4721 = vpow2.f32 %v3518_v46  ;;  %v2436_v60 = vadd.f32 %v3648_v48, %v2293_v59  ;;  %v4157_v38 = vpop.f32.mrb[36].mxu1  ;;  %v3657_v45 = vunpack.c.h.bf16 %v3680_v34 }
 0x76e   : > { %v4712_v26 = vpop.eup %4711  ;;  %v3521_v10 = vmul.f32 -1.442695, %v2437_v30  ;;  %v2302_v14 = vpop.f32.mrb[37].mxu1  ;;  %v2308_v11 = vadd.f32 %v4157_v38, %v6431_v62 }
 0x76f   : > { %v4714_v0 = vpop.eup %4713  ;;  %v2423_v42 = vadd.f32 1.0, %v4712_v26  ;;  %v3520_v20 = vmul.f32 -1.442695, %v2436_v60  ;;  %v2303_v48 = vadd.f32 %v2302_v14, %v6366_v6 }
 0x770   : > { %v2422_v44 = vadd.f32 1.0, %v4714_v0  ;;  %4723 = vpow2.f32 %v3521_v10  ;;  %v3656_v0 = vunpack.c.l.bf16 %v3680_v34 }
 0x771   : > { %4725 = vrcp.f32 %v2423_v42  ;;  %v4160_v51 = vpop.f32.mrb[38].mxu1 }
 0x772   : > { %v4716_v17 = vpop.eup %4715  ;;  %4727 = vrcp.f32 %v2422_v44  ;;  %v2312_v8 = vpop.f32.mrb[39].mxu1  ;;  %v2318_v60 = vadd.f32 %v4160_v51, %v6367_v41 }
 0x773   : > { %v4718_v50 = vpop.eup %4717  ;;  %v2425_v57 = vadd.f32 1.0, %v4716_v17  ;;  %4729 = vpow2.f32 %v3520_v20  ;;  %v2313_v10 = vadd.f32 %v2312_v8, %v6368_v16 }
 0x774   : > { %v2424_v32 = vadd.f32 1.0, %v4718_v50 }
 0x775   : > { %4731 = vrcp.f32 %v2425_v57 }
 0x776   : > { %v4720_v63 = vpop.eup %4719  ;;  %4733 = vrcp.f32 %v2424_v32 }
 0x777   : > { %v4722_v4 = vpop.eup %4721  ;;  %v2451_v3 = vadd.f32 1.0, %v4720_v63 }
 0x778   : > { %v2450_v9 = vadd.f32 1.0, %v4722_v4 }
 0x779   : > { %4735 = vrcp.f32 %v2451_v3 }
 0x77a   : > { %v4724_v25 = vpop.eup %4723  ;;  %4737 = vrcp.f32 %v2450_v9 }
 0x77b   : > { %v4726_v21 = vpop.eup %4725  ;;  %v2453_v33 = vadd.f32 1.0, %v4724_v25 }
 0x77c   : > { %v4728_v13 = vpop.eup %4727  ;;  %v2463_v43 = vmul.f32 %v4726_v21, %v2308_v11 }
 0x77d   : > { %v4730_v55 = vpop.eup %4729  ;;  %v2462_v46 = vmul.f32 %v4728_v13, %v2303_v48  ;;  %4739 = vrcp.f32 %v2453_v33 }
 0x77e   : > { %v2452_v59 = vadd.f32 1.0, %v4730_v55  ;;  %v2467_v30 = vadd.f32 %v3653_v29, %v2463_v43 }
 0x77f   : > { %v4732_v26 = vpop.eup %4731  ;;  %v2466_v38 = vadd.f32 %v3652_v19, %v2462_v46 }
 0x780   : > { %v4734_v42 = vpop.eup %4733  ;;  %4741 = vrcp.f32 %v2452_v59  ;;  %v2465_v6 = vmul.f32 %v4732_v26, %v2318_v60 }
 0x781   : > { %4743 = vtanh.f32 %v2467_v30  ;;  %v2464_v14 = vmul.f32 %v4734_v42, %v2313_v10 }
 0x782   : > { %4745 = vtanh.f32 %v2466_v38  ;;  %v2469_v20 = vadd.f32 %v3657_v45, %v2465_v6  ;;  %v6436_v38 = vld [vmem:[#allocation30_spill] sm:$0xff] }
 0x783   : > { %v2468_v44 = vadd.f32 %v3656_v0, %v2464_v14  ;;  %v4736_v41 = vpop.eup %4735  ;;  %v6437_v14 = vld [vmem:[#allocation31_spill] sm:$0xff] }
 0x784   : > { %4747 = vtanh.f32 %v2469_v20  ;;  %v4738_v51 = vpop.eup %4737  ;;  %v2475_v63 = vsub.f32 1.0, %v4736_v41  ;;  %v2483_v9 = vmul.f32 %v4736_v41, %v5797_v24 }
 0x785   : > { %4749 = vtanh.f32 %v2468_v44  ;;  %v5990_v17 = vpop.f32.mrb[48].mxu1  ;;  %v2474_v27 = vsub.f32 1.0, %v4738_v51  ;;  %v2482_v11 = vmul.f32 %v4738_v51, %v5799_v36 }
 0x786   : > { %v5992_v50 = vpop.f32.mrb[49].mxu1 }
 0x787   : > { %v4740_v57 = vpop.eup %4739 }
 0x788   : > { %v2477_v29 = vsub.f32 1.0, %v4740_v57  ;;  %v2485_v43 = vmul.f32 %v4740_v57, %v5805_v56  ;;  %v6432_v56 = vld [vmem:[#allocation25_spill] sm:$0xff] }
 0x789   : > { %v5994_v32 = vpop.f32.mrb[50].mxu1 }
 0x78a   : > { %v4742_v16 = vpop.eup %4741  ;;  %v5996_v8 = vpop.f32.mrb[51].mxu1 }
 0x78b   : > { %v4744_v4 = vpop.eup %4743  ;;  %v2476_v33 = vsub.f32 1.0, %v4742_v16  ;;  %v2484_v46 = vmul.f32 %v4742_v16, %v5807_v15  ;;  %v6433_v15 = vld [vmem:[#allocation26_spill] sm:$0xff]  ;;  %v6438_v16 = vld [vmem:[#allocation33_spill] sm:$0xff] }
 0x78c   : > { %v4746_v3 = vpop.eup %4745  ;;  %v2479_v25 = vmul.f32 %v4744_v4, %v2475_v63  ;;  %v6439_v4 = vld [vmem:[#allocation34_spill] sm:$0xff] }
 0x78d   : > { %v2478_v62 = vmul.f32 %v4746_v3, %v2474_v27 }
 0x78e   : > { %v4748_v34 = vpop.eup %4747  ;;  %v2487_v21 = vadd.f32 %v2483_v9, %v2479_v25 }
 0x78f   : > { %v4750_v48 = vpop.eup %4749  ;;  %v2486_v19 = vadd.f32 %v2482_v11, %v2478_v62  ;;  %v2481_v13 = vmul.f32 %v4748_v34, %v2477_v29 }
 0x790   : > { %2701 = vst.msk [vmem:[#allocation2 + $0x8] sm:$0xff] %vm2699_vm3, %v2487_v21  ;;  %v2480_v55 = vmul.f32 %v4750_v48, %v2476_v33 }
 0x791   : > { %v4325_v45 = vpack.c.bf16 %v2487_v21, %v2486_v19  ;;  %2700 = vst.msk [vmem:[#allocation2] sm:$0xff] %vm2699_vm3, %v2486_v19  ;;  %v2489_v24 = vadd.f32 %v2485_v43, %v2481_v13 }
 0x792   : > { %v2488_v36 = vadd.f32 %v2484_v46, %v2480_v55 }
 0x793   : > { %4326 = vmatprep.subr.bf16.mxu1 %v4325_v45  ;;  %2703 = vst.msk [vmem:[#allocation2 + $0x18] sm:$0xff] %vm2699_vm3, %v2489_v24 }
 0x794   : > { %4328 = vmatpush3.bf16.msra.mxu1 %v4325_v45  ;;  %v4329_v59 = vpack.c.bf16 %v2489_v24, %v2488_v36  ;;  %2702 = vst.msk [vmem:[#allocation2 + $0x10] sm:$0xff] %vm2699_vm3, %v2488_v36  ;;  %v6440_v36 = vld [vmem:[#allocation35_spill] sm:$0xff] }
 0x796   : > { %4330 = vmatprep.subr.bf16.mxu1 %v4329_v59 }
 0x798   : > { %4332 = vmatpush3.bf16.msra.mxu1 %v4329_v59  ;;  %v2368_v59 = vadd.f32 %v5990_v17, %v6440_v36  ;;  %v2723_v36 = vld [vmem:[%s6247_s5 + $0x58] sm:$0xff] (!%p3542_p6) }
 0x79b   : > { %4188 = vmatmul.mubr.msk.f32.vlgmr.msra.gmra.mrb[40].mxu1 %vm944_vm2, %v5814_v7  ;;  %v6434_v7 = vld [vmem:[#allocation27_spill] sm:$0xff] }
 0x79c   : > { %4190 = vmatprep.mubr.msk.f32.mxu1 %vm944_vm2, %v5821_v23 }
 0x79f   : > { %4191 = vmatmul.mubr.msk.f32.gmra.mrb[42].mxu1 %vm944_vm2, %v5828_v39 }
 0x7a0   : > { %4193 = vmatprep.mubr.msk.f32.mxu1 %vm944_vm2, %v5835_v53 }
 0x7a3   : > { %4194 = vmatmul.mubr.msk.f32.gmra.mrb[44].mxu1 %vm944_vm2, %v5842_v31  ;;  %v6435_v31 = vld [vmem:[#allocation28_spill] sm:$0xff] }
 0x7a4   : > { %4196 = vmatprep.mubr.msk.f32.mxu1 %vm944_vm2, %v5849_v37 }
 0x7a7   : > { %4197 = vmatmul.mubr.msk.f32.gmra.mrb[46].mxu1 %vm944_vm2, %v5856_v61 }
 0x7a8   : > { %4199 = vmatprep.mubr.msk.f32.mxu1 %vm944_vm2, %v5863_v54 }
 0x7ab   : > { %4200 = vmatmul.mubr.msk.f32.gmra.mrb[52].mxu1 %vm944_vm2, %v6432_v56 }
 0x7ac   : > { %4202 = vmatprep.mubr.msk.f32.mxu1 %vm944_vm2, %v6433_v15 }
 0x7af   : > { %4203 = vmatmul.mubr.msk.f32.gmra.mrb[54].mxu1 %vm944_vm2, %v6434_v7  ;;  %v6441_v7 = vld [vmem:[#allocation36_spill] sm:$0xff] }
 0x86e   : > { %v4189_v23 = vpop.f32.mrb[40].mxu1 }
 0x86f   : > { %v4390_v39 = vadd.f32 %v6383_v40, %v4189_v23  ;;  %v2556_v53 = vpop.f32.mrb[41].mxu1  ;;  %v2363_v23 = vadd.f32 %v5992_v50, %v6441_v7  ;;  %v2373_v50 = vadd.f32 %v5996_v8, %v5415_v5  ;;  %v2733_v7 = vld [vmem:[%s6248_s6 + $0x28] sm:$0xff] (!%p3542_p6) }
 0x870   : > { %v4392_v37 = vadd.f32 %v6435_v31, %v2556_v53 }
 0x871   : > { %v3535_v30 = vmul.f32 -1.442695, %v4390_v39 }
 0x872   : > { %v3534_v61 = vmul.f32 -1.442695, %v4392_v37  ;;  %v4192_v60 = vpop.f32.mrb[42].mxu1 }
 0x873   : > { %4751 = vpow2.f32 %v3535_v30  ;;  %v4394_v54 = vadd.f32 %v6385_v58, %v4192_v60  ;;  %v2566_v26 = vpop.f32.mrb[43].mxu1 }
 0x874   : > { %4753 = vpow2.f32 %v3534_v61  ;;  %v4396_v10 = vadd.f32 %v6436_v38, %v2566_v26 }
 0x875   : > { %v3537_v0 = vmul.f32 -1.442695, %v4394_v54  ;;  %v2378_v54 = vadd.f32 %v5994_v32, %v5413_v49 }
 0x876   : > { %v3536_v42 = vmul.f32 -1.442695, %v4396_v10  ;;  %v4195_v6 = vpop.f32.mrb[44].mxu1 }
 0x877   : > { %4755 = vpow2.f32 %v3537_v0  ;;  %v4398_v20 = vadd.f32 %v6437_v14, %v4195_v6  ;;  %v2576_v40 = vpop.f32.mrb[45].mxu1 }
 0x878   : > { %4757 = vpow2.f32 %v3536_v42  ;;  %v4400_v44 = vadd.f32 %v6388_v47, %v2576_v40 }
 0x879   : > { %v3539_v41 = vmul.f32 -1.442695, %v4398_v20 }
 0x87a   : > { %v3538_v51 = vmul.f32 -1.442695, %v4400_v44  ;;  %v4198_v57 = vpop.f32.mrb[46].mxu1 }
 0x87b   : > { %4759 = vpow2.f32 %v3539_v41  ;;  %v4402_v58 = vadd.f32 %v6438_v16, %v4198_v57  ;;  %v2586_v63 = vpop.f32.mrb[47].mxu1 }
 0x87c   : > { %4761 = vpow2.f32 %v3538_v51  ;;  %v4404_v27 = vadd.f32 %v6439_v4, %v2586_v63 }
 0x87d   : > { %v4752_v3 = vpop.eup %4751  ;;  %v3541_v25 = vmul.f32 -1.442695, %v4402_v58 }
 0x87e   : > { %v4754_v9 = vpop.eup %4753  ;;  %v2632_v62 = vadd.f32 1.0, %v4752_v3  ;;  %v3540_v11 = vmul.f32 -1.442695, %v4404_v27  ;;  %v4201_v29 = vpop.f32.mrb[52].mxu1 }
 0x87f   : > { %v2631_v34 = vadd.f32 1.0, %v4754_v9  ;;  %4763 = vpow2.f32 %v3541_v25  ;;  %v2596_v21 = vpop.f32.mrb[53].mxu1  ;;  %v2602_v31 = vadd.f32 %v4201_v29, %v5409_v1 }
 0x880   : > { %4765 = vrcp.f32 %v2632_v62  ;;  %v2597_v61 = vadd.f32 %v2596_v21, %v5411_v2  ;;  %v2720_v21 = vld [vmem:[%s6247_s5 + $0x40] sm:$0xff] (!%p3542_p6) }
 0x881   : > { %v4756_v47 = vpop.eup %4755  ;;  %4767 = vrcp.f32 %v2631_v34  ;;  %4225 = vmatprep.mubr.msk.f32.mxu1 (!%p3542_p6), %vm944_vm2, %v2720_v21 }
 0x882   : > { %v4758_v33 = vpop.eup %4757  ;;  %v2634_v48 = vadd.f32 1.0, %v4756_v47  ;;  %4769 = vpow2.f32 %v3540_v11  ;;  %v4204_v19 = vpop.f32.mrb[54].mxu1  ;;  %v4859_v47 = vmov (!%p3542_p6), 0  }
 0x883   : > { %v2633_v13 = vadd.f32 1.0, %v4758_v33  ;;  %v2606_v43 = vpop.f32.mrb[55].mxu1  ;;  %v2612_v1 = vadd.f32 %v4204_v19, %v5425_v18  ;;  %4827 = vset.pattern.permute.xlu0 (!%p3542_p6), %v4859_v47  ;;  %v2728_v33 = vld [vmem:[%s6248_s6] sm:$0xff] (!%p3542_p6)  ;;  %4828 = vset.pattern.permute.xlu1 (!%p3542_p6), %v4859_v47  ;;  %v2713_v19 = vld [vmem:[%s6247_s5 + $0x8] sm:$0xff] (!%p3542_p6) }
 0x884   : > { %4771 = vrcp.f32 %v2634_v48  ;;  %v2607_v2 = vadd.f32 %v2606_v43, %v5429_v35  ;;  %2746 = vperm.xlu0 (!%p3542_p6), %4827, %v2728_v33   ;;  %v2730_v48 = vld [vmem:[%s6248_s6 + $0x10] sm:$0xff] (!%p3542_p6) }
 0x885   : > { %v4760_v55 = vpop.eup %4759  ;;  %4773 = vrcp.f32 %v2633_v13  ;;  %v2721_v13 = vld [vmem:[%s6247_s5 + $0x48] sm:$0xff] (!%p3542_p6)  ;;  %v2714_v43 = vld [vmem:[%s6247_s5 + $0x10] sm:$0xff] (!%p3542_p6)  ;;  %2756 = vperm.xlu1 (!%p3542_p6), %4828, %v2730_v48  }
 0x886   : > { %v4762_v46 = vpop.eup %4761  ;;  %v2660_v45 = vadd.f32 1.0, %v4760_v55  ;;  %v2722_v55 = vld [vmem:[%s6247_s5 + $0x50] sm:$0xff] (!%p3542_p6) }
 0x887   : > { %v2659_v56 = vadd.f32 1.0, %v4762_v46  ;;  %v2729_v46 = vld [vmem:[%s6248_s6 + $0x8] sm:$0xff] (!%p3542_p6) }
 0x888   : > { %4775 = vrcp.f32 %v2660_v45  ;;  %v2731_v45 = vld [vmem:[%s6248_s6 + $0x18] sm:$0xff] (!%p3542_p6)  ;;  %2751 = vperm.xlu0 (!%p3542_p6), %4827, %v2729_v46  }
 0x889   : > { %v4764_v24 = vpop.eup %4763  ;;  %4777 = vrcp.f32 %v2659_v56  ;;  %v2724_v56 = vld [vmem:[%s6247_s5 + $0x60] sm:$0xff] (!%p3542_p6)  ;;  %2761 = vperm.xlu1 (!%p3542_p6), %4828, %v2731_v45  }
 0x88a   : > { %v4766_v15 = vpop.eup %4765  ;;  %v2662_v39 = vadd.f32 1.0, %v4764_v24  ;;  %v2715_v24 = vld [vmem:[%s6247_s5 + $0x18] sm:$0xff] (!%p3542_p6) }
 0x88b   : > { %v4768_v53 = vpop.eup %4767  ;;  %v2672_v37 = vmul.f32 %v4766_v15, %v2368_v59  ;;  %v2716_v59 = vld [vmem:[%s6247_s5 + $0x20] sm:$0xff] (!%p3542_p6) }
 0x88c   : > { %v4770_v30 = vpop.eup %4769  ;;  %v2671_v60 = vmul.f32 %v4768_v53, %v2363_v23  ;;  %4779 = vrcp.f32 %v2662_v39  ;;  %v2732_v15 = vld [vmem:[%s6248_s6 + $0x20] sm:$0xff] (!%p3542_p6)  ;;  %v2717_v23 = vld [vmem:[%s6247_s5 + $0x28] sm:$0xff] (!%p3542_p6)  ;;  %v2718_v53 = vld [vmem:[%s6247_s5 + $0x30] sm:$0xff] (!%p3542_p6) }
 0x88d   : > { %v2661_v17 = vadd.f32 1.0, %v4770_v30  ;;  %v2676_v26 = vadd.f32 %v2672_v37, %v2602_v31  ;;  %v2725_v39 = vld [vmem:[%s6247_s5 + $0x68] sm:$0xff] (!%p3542_p6)  ;;  %v2726_v31 = vld [vmem:[%s6247_s5 + $0x70] sm:$0xff] (!%p3542_p6)  ;;  %2766 = vperm.xlu0 (!%p3542_p6), %4827, %v2732_v15   ;;  %2771 = vperm.xlu1 (!%p3542_p6), %4828, %v2733_v7   ;;  %v2735_v30 = vld [vmem:[%s6248_s6 + $0x38] sm:$0xff] (!%p3542_p6) }
 0x88e   : > { %v4772_v38 = vpop.eup %4771  ;;  %v2675_v10 = vadd.f32 %v2671_v60, %v2597_v61  ;;  %v2734_v37 = vld [vmem:[%s6248_s6 + $0x30] sm:$0xff] (!%p3542_p6)  ;;  %v2719_v61 = vld [vmem:[%s6247_s5 + $0x38] sm:$0xff] (!%p3542_p6) }
 0x88f   : > { %v4774_v0 = vpop.eup %4773  ;;  %4781 = vrcp.f32 %v2661_v17  ;;  %v2674_v42 = vmul.f32 %v4772_v38, %v2378_v54  ;;  %v2727_v60 = vld [vmem:[%s6247_s5 + $0x78] sm:$0xff] (!%p3542_p6)  ;;  %v2736_v54 = vld [vmem:[%s6248_s6 + $0x40] sm:$0xff] (!%p3542_p6)  ;;  %v2737_v17 = vld [vmem:[%s6248_s6 + $0x48] sm:$0xff] (!%p3542_p6) }
 0x890   : > { %4783 = vtanh.f32 %v2676_v26  ;;  %v2673_v6 = vmul.f32 %v4774_v0, %v2373_v50  ;;  %v2738_v26 = vld [vmem:[%s6248_s6 + $0x50] sm:$0xff] (!%p3542_p6)  ;;  %v2739_v38 = vld [vmem:[%s6248_s6 + $0x58] sm:$0xff] (!%p3542_p6)  ;;  %v2740_v50 = vld [vmem:[%s6248_s6 + $0x60] sm:$0xff] (!%p3542_p6) }
 0x891   : > { %4785 = vtanh.f32 %v2675_v10  ;;  %v2678_v49 = vadd.f32 %v2674_v42, %v2612_v1  ;;  %2776 = vperm.xlu0 (!%p3542_p6), %4827, %v2734_v37   ;;  %2781 = vperm.xlu1 (!%p3542_p6), %4828, %v2735_v30   ;;  %v2741_v10 = vld [vmem:[%s6248_s6 + $0x68] sm:$0xff] (!%p3542_p6)  ;;  %v2742_v0 = vld [vmem:[%s6248_s6 + $0x70] sm:$0xff] (!%p3542_p6)  ;;  %v2743_v1 = vld [vmem:[%s6248_s6 + $0x78] sm:$0xff] (!%p3542_p6)  ;;  %v3161_v30 = vlaneseq (!%p3542_p6) }
 0x892   : > { %v2677_v32 = vadd.f32 %v2673_v6, %v2607_v2  ;;  %v4776_v14 = vpop.eup %4775 }
 0x893   : > { %4787 = vtanh.f32 %v2678_v49  ;;  %v4778_v20 = vpop.eup %4777  ;;  %v2684_v8 = vsub.f32 1.0, %v4776_v14  ;;  %v2692_v18 = vmul.f32 %v4776_v14, %v5910_v28 }
 0x894   : > { %4789 = vtanh.f32 %v2677_v32  ;;  %v2683_v41 = vsub.f32 1.0, %v4778_v20  ;;  %v2691_v16 = vmul.f32 %v4778_v20, %v5912_v22 }
 0x895   : > { %2786 = vperm.xlu0 (!%p3542_p6), %4827, %v2736_v54   ;;  %2791 = vperm.xlu1 (!%p3542_p6), %4828, %v2737_v17  }
 0x896   : > { %v4780_v40 = vpop.eup %4779 }
 0x897   : > { %v2686_v35 = vsub.f32 1.0, %v4780_v40  ;;  %v2694_v25 = vmul.f32 %v4780_v40, %v5918_v12 }
 0x899   : > { %v4782_v5 = vpop.eup %4781  ;;  %2796 = vperm.xlu0 (!%p3542_p6), %4827, %v2738_v26   ;;  %2801 = vperm.xlu1 (!%p3542_p6), %4828, %v2739_v38  }
 0x89a   : > { %v4784_v44 = vpop.eup %4783  ;;  %v2685_v4 = vsub.f32 1.0, %v4782_v5  ;;  %v2693_v11 = vmul.f32 %v4782_v5, %v5920_v52  ;;  %v2712_v52 = vld [vmem:[%s6247_s5] sm:$0xff] (!%p3542_p6) }
 0x89b   : > { %v4786_v51 = vpop.eup %4785  ;;  %v2688_v57 = vmul.f32 %v4784_v44, %v2684_v8  ;;  %4213 = vmatprep.mubr.msk.f32.mxu0 (!%p3542_p6), %vm944_vm2, %v2712_v52 }
 0x89c   : > { %v2687_v58 = vmul.f32 %v4786_v51, %v2683_v41 }
 0x89d   : > { %v4788_v63 = vpop.eup %4787  ;;  %v2696_v27 = vadd.f32 %v2692_v18, %v2688_v57  ;;  %2711 = sbr.rel (%p3542_p6) target bundleno = 2469 (0x9a5), region = 56  ;;  %2806 = vperm.xlu0 (!%p3542_p6), %4827, %v2740_v50   ;;  %2811 = vperm.xlu1 (!%p3542_p6), %4828, %v2741_v10  }
 0x89e   : > { %v4790_v3 = vpop.eup %4789  ;;  %v2695_v9 = vadd.f32 %v2691_v16, %v2687_v58  ;;  %v2690_v62 = vmul.f32 %v4788_v63, %v2686_v35 }
 0x89f   : > { %2705 = vst.msk [vmem:[#allocation2 + $0x28] sm:$0xff] %vm2699_vm3, %v2696_v27  ;;  %v2689_v29 = vmul.f32 %v4790_v3, %v2685_v4 }
 0x8a0   : > { %2704 = vst.msk [vmem:[#allocation2 + $0x20] sm:$0xff] %vm2699_vm3, %v2695_v9  ;;  %v2698_v28 = vadd.f32 %v2694_v25, %v2690_v62  ;;  %v4333_v22 = vpack.c.bf16 (!%p3542_p6), %v2696_v27, %v2695_v9 }
 0x8a1   : > { %v2697_v34 = vadd.f32 %v2693_v11, %v2689_v29  ;;  %2816 = vperm.xlu0 (!%p3542_p6), %4827, %v2742_v0   ;;  %2821 = vperm.xlu1 (!%p3542_p6), %4828, %v2743_v1  }
 0x8a2   : > { %2707 = vst.msk [vmem:[#allocation2 + $0x38] sm:$0xff] %vm2699_vm3, %v2698_v28  ;;  %4334 = vmatprep.subr.bf16.mxu0 (!%p3542_p6), %v4333_v22  ;;  %4437 = vmatprep.subr.bf16.mxu1 (!%p3542_p6), %v4333_v22 }
 0x8a3   : > { %2706 = vst.msk [vmem:[#allocation2 + $0x30] sm:$0xff] %vm2699_vm3, %v2697_v34  ;;  %v4337_v12 = vpack.c.bf16 (!%p3542_p6), %v2698_v28, %v2697_v34  ;;  %4336 = vmatpush3.bf16.msra.mxu0 (!%p3542_p6), %v4333_v22  ;;  %4439 = vmatpush3.bf16.msra.mxu1 (!%p3542_p6), %v4333_v22 }
 0x8a5   : > { %4338 = vmatprep.subr.bf16.mxu0 %v4337_v12  ;;  %4438 = vmatprep.subr.bf16.mxu1 %v4337_v12 }
 0x8a7   : > { %4340 = vmatpush3.bf16.msra.mxu0 %v4337_v12  ;;  %4440 = vmatpush3.bf16.msra.mxu1 %v4337_v12 }
 0x8aa   : > { %4214 = vmatmul.mubr.msk.f32.vlgmr.msra.gmra.mrb[0].mxu0 %vm944_vm2, %v2713_v19  ;;  %4226 = vmatmul.mubr.msk.f32.vlgmr.msra.gmra.mrb[0].mxu1 %vm944_vm2, %v2721_v13 }
 0x8ab   : > { %4216 = vmatprep.mubr.msk.f32.mxu0 %vm944_vm2, %v2714_v43  ;;  %4228 = vmatprep.mubr.msk.f32.mxu1 %vm944_vm2, %v2722_v55 }
 0x8ae   : > { %4217 = vmatmul.mubr.msk.f32.gmra.mrb[2].mxu0 %vm944_vm2, %v2715_v24  ;;  %4229 = vmatmul.mubr.msk.f32.gmra.mrb[2].mxu1 %vm944_vm2, %v2723_v36 }
 0x8af   : > { %4219 = vmatprep.mubr.msk.f32.mxu0 %vm944_vm2, %v2716_v59  ;;  %4231 = vmatprep.mubr.msk.f32.mxu1 %vm944_vm2, %v2724_v56 }
 0x8b2   : > { %4220 = vmatmul.mubr.msk.f32.gmra.mrb[4].mxu0 %vm944_vm2, %v2717_v23  ;;  %4232 = vmatmul.mubr.msk.f32.gmra.mrb[4].mxu1 %vm944_vm2, %v2725_v39 }
 0x8b3   : > { %4222 = vmatprep.mubr.msk.f32.mxu0 %vm944_vm2, %v2718_v53  ;;  %4234 = vmatprep.mubr.msk.f32.mxu1 %vm944_vm2, %v2726_v31 }
 0x8b6   : > { %4223 = vmatmul.mubr.msk.f32.gmra.mrb[6].mxu0 %vm944_vm2, %v2719_v61  ;;  %4235 = vmatmul.mubr.msk.f32.gmra.mrb[6].mxu1 %vm944_vm2, %v2727_v60  ;;  %v3162_v61 = vshrl.u32 %v3161_v30, 7 }
 0x8b8   : > { %vm3178_vm4 = vcmp.eq.s32.totalorder %v3162_v61, 1 }
 0x903   : > { %v2747_v42 = vpop.permute.xlu0 %2746 }
 0x904   : > { %v2757_v2 = vpop.permute.xlu1 %2756 }
 0x907   : > { %v2752_v6 = vpop.permute.xlu0 %2751 }
 0x908   : > { %v2762_v49 = vpop.permute.xlu1 %2761 }
 0x90c   : > { %v2767_v32 = vpop.permute.xlu0 %2766  ;;  %v2772_v14 = vpop.permute.xlu1 %2771 }
 0x910   : > { %v2777_v20 = vpop.permute.xlu0 %2776  ;;  %v2782_v40 = vpop.permute.xlu1 %2781 }
 0x914   : > { %v2787_v5 = vpop.permute.xlu0 %2786  ;;  %v2792_v8 = vpop.permute.xlu1 %2791 }
 0x918   : > { %v2797_v44 = vpop.permute.xlu0 %2796  ;;  %v2802_v41 = vpop.permute.xlu1 %2801 }
 0x91c   : > { %v2807_v27 = vpop.permute.xlu0 %2806  ;;  %v2812_v3 = vpop.permute.xlu1 %2811 }
 0x920   : > { %v2817_v45 = vpop.permute.xlu0 %2816  ;;  %v2822_v24 = vpop.permute.xlu1 %2821 }
 0x97d   : > { %v4215_v51 = vpop.f32.mrb[0].mxu0  ;;  %v4227_v18 = vpop.f32.mrb[0].mxu1 }
 0x97e   : > { %v2944_v57 = vadd.f32 %v4215_v51, %v2752_v6  ;;  %v2984_v16 = vadd.f32 %v4227_v18, %v2792_v8  ;;  %v2938_v35 = vpop.f32.mrb[1].mxu0  ;;  %v2978_v58 = vpop.f32.mrb[1].mxu1 }
 0x97f   : > { %v2939_v63 = vadd.f32 %v2938_v35, %v2747_v42  ;;  %v2979_v4 = vadd.f32 %v2978_v58, %v2787_v5 }
 0x980   : > { %3211 = vst.msk [vmem:[%s6249_s7 + $0x8] sm:$0xff] %vm2699_vm3, %v2944_v57  ;;  %3219 = vst.msk [vmem:[%s6249_s7 + $0x48] sm:$0xff] %vm2699_vm3, %v2984_v16 }
 0x981   : > { %v3033_v25 = vand.u32 2147483647, %v2939_v63  ;;  %3218 = vst.msk [vmem:[%s6249_s7 + $0x40] sm:$0xff] %vm2699_vm3, %v2979_v4  ;;  %v4230_v9 = vpop.f32.mrb[2].mxu1  ;;  %v4218_v62 = vpop.f32.mrb[2].mxu0  ;;  %v3017_v54 = vmax.f32 %v2939_v63, 0.0 }
 0x982   : > { %v2994_v11 = vadd.f32 %v4230_v9, %v2802_v41  ;;  %v2988_v29 = vpop.f32.mrb[3].mxu1  ;;  %v2954_v28 = vadd.f32 %v4218_v62, %v2762_v49  ;;  %v2948_v34 = vpop.f32.mrb[3].mxu0 }
 0x983   : > { %v3049_v22 = vsub.f32 0.0, %v3033_v25  ;;  %v2989_v12 = vadd.f32 %v2988_v29, %v2797_v44  ;;  %v2949_v52 = vadd.f32 %v2948_v34, %v2757_v2 }
 0x984   : > { %3221 = vst.msk [vmem:[%s6249_s7 + $0x58] sm:$0xff] %vm2699_vm3, %v2994_v11  ;;  %3213 = vst.msk [vmem:[%s6249_s7 + $0x18] sm:$0xff] %vm2699_vm3, %v2954_v28 }
 0x985   : > { %v3065_v21 = vmul.f32 1.442695, %v3049_v22  ;;  %3220 = vst.msk [vmem:[%s6249_s7 + $0x50] sm:$0xff] %vm2699_vm3, %v2989_v12  ;;  %3212 = vst.msk [vmem:[%s6249_s7 + $0x10] sm:$0xff] %vm2699_vm3, %v2949_v52  ;;  %v4221_v47 = vpop.f32.mrb[4].mxu0  ;;  %v4233_v33 = vpop.f32.mrb[4].mxu1 }
 0x986   : > { %v2964_v48 = vadd.f32 %v4221_v47, %v2772_v14  ;;  %v3004_v19 = vadd.f32 %v4233_v33, %v2812_v3  ;;  %v2958_v13 = vpop.f32.mrb[5].mxu0  ;;  %v2998_v43 = vpop.f32.mrb[5].mxu1 }
 0x987   : > { %4829 = vpow2.f32 %v3065_v21  ;;  %v2959_v55 = vadd.f32 %v2958_v13, %v2767_v32  ;;  %v2999_v46 = vadd.f32 %v2998_v43, %v2807_v27 }
 0x988   : > { %3215 = vst.msk [vmem:[%s6249_s7 + $0x28] sm:$0xff] %vm2699_vm3, %v2964_v48  ;;  %3223 = vst.msk [vmem:[%s6249_s7 + $0x68] sm:$0xff] %vm2699_vm3, %v3004_v19 }
 0x989   : > { %3214 = vst.msk [vmem:[%s6249_s7 + $0x20] sm:$0xff] %vm2699_vm3, %v2959_v55  ;;  %3222 = vst.msk [vmem:[%s6249_s7 + $0x60] sm:$0xff] %vm2699_vm3, %v2999_v46  ;;  %v4224_v36 = vpop.f32.mrb[6].mxu0  ;;  %v4236_v59 = vpop.f32.mrb[6].mxu1 }
 0x98a   : > { %v2974_v56 = vadd.f32 %v4224_v36, %v2782_v40  ;;  %v3014_v15 = vadd.f32 %v4236_v59, %v2822_v24  ;;  %v2968_v7 = vpop.f32.mrb[7].mxu0  ;;  %v3008_v23 = vpop.f32.mrb[7].mxu1 }
 0x98b   : > { %v2969_v39 = vadd.f32 %v2968_v7, %v2777_v20  ;;  %v3009_v53 = vadd.f32 %v3008_v23, %v2817_v45 }
 0x98c   : > { %3217 = vst.msk [vmem:[%s6249_s7 + $0x38] sm:$0xff] %vm2699_vm3, %v2974_v56  ;;  %3225 = vst.msk [vmem:[%s6249_s7 + $0x78] sm:$0xff] %vm2699_vm3, %v3014_v15 }
 0x98d   : > { %3216 = vst.msk [vmem:[%s6249_s7 + $0x30] sm:$0xff] %vm2699_vm3, %v2969_v39  ;;  %3224 = vst.msk [vmem:[%s6249_s7 + $0x70] sm:$0xff] %vm2699_vm3, %v3009_v53 }
 0x991   : > { %v4830_v31 = vpop.eup %4829 }
 0x992   : > { %v3097_v37 = vadd.f32 1.0, %v4830_v31 }
 0x994   : > { %4831 = vlog2.f32 %v3097_v37 }
 0x99e   : > { %v4832_v60 = vpop.eup %4831 }
 0x99f   : > { %v3114_v17 = vmul.f32 0.6931472, %v4832_v60 }
 0x9a1   : > { %v3145_v26 = vadd.f32 %v3114_v17, %v3017_v54 }
 0x9a3   : > { %v3194_v38 = vsel %vm3178_vm4, %v3145_v26, %v2939_v63 }
 0x9a4   : > { %3210 = vst.msk [vmem:[%s6249_s7] sm:$0xff] %vm2699_vm3, %v3194_v38 }
 0x9a5 PF: > { %s17_s26 = sadd.s32 1, %s4855_s26   ;;  %s6442_s24 = smov %s4851_s25 }
 0x9a6   : > { %p14_p7 = scmp.ge.s32.totalorder %s17_s26, 4   ;;  %s6443_s25 = smov %s6445_s27 }
 0x9a8   :  { %16 = sbr.rel (!%p14_p7) target bundleno = 2 (0x2), region = 89 }

</bundles_post_ra>
